<compile_context>
chip_gen: v7x
topology: tpu7x:2x2x1
jax: 0.10.0
libtpu: 0.0.40
codegen_flags: <defaults>
</compile_context>

<pallas_src>
import jax
import jax.numpy as jnp
from jax import lax
from jax.experimental import pallas as pl
from jax.experimental.pallas import tpu as pltpu


# ----------------------------------------------------------------------------
# Fused Pallas kernel: MLP forward + closed-form SCOD prior predictive variance
# ----------------------------------------------------------------------------
def _scod_fused_kernel(prior_ref, x_ref, w1t_ref, b1_ref, w2t_ref, b2_ref,
                       z_ref, var_ref):
    x = x_ref[...]                                      # (bn, D_in)
    w1t = w1t_ref[...]                                  # (D_in, D_h) - K on sublanes
    w2t = w2t_ref[...]                                  # (D_h, D_out)

    # Forward pass:  h = tanh(x W1^T + b1),  z = h W2^T + b2
    h = jnp.tanh(
        jnp.dot(x, w1t, preferred_element_type=jnp.float32,
                precision=lax.Precision.HIGHEST)
        + b1_ref[...]
    )                                                   # (bn, D_h)
    z = (
        jnp.dot(h, w2t, preferred_element_type=jnp.float32,
                precision=lax.Precision.HIGHEST)
        + b2_ref[...]
    )                                                   # (bn, D_out)
    z_ref[...] = z.astype(z_ref.dtype)

    # Closed-form per-output squared weight-gradient norm for the 2-layer MLP:
    #   dz_j/dW2  -> ||h||^2           dz_j/db2 -> 1
    #   dz_j/dW1  -> (||x||^2) * sum_i (W2[j,i] (1-h_i^2))^2
    #   dz_j/db1  ->              sum_i (W2[j,i] (1-h_i^2))^2
    xsq = jnp.sum(x * x, axis=-1, keepdims=True)        # (bn, 1)
    hsq = jnp.sum(h * h, axis=-1, keepdims=True)        # (bn, 1)
    s = 1.0 - h * h                                     # tanh'(pre-activation)
    g2 = jnp.dot(s * s, w2t * w2t, preferred_element_type=jnp.float32,
                 precision=lax.Precision.HIGHEST)       # (bn, D_out)

    prior = prior_ref[0]                                # SMEM scalar: exp(log_prior)*mult
    var = prior * ((xsq + 1.0) * g2 + (hsq + 1.0))
    var_ref[...] = var.astype(var_ref.dtype)


def scod_fused_pallas(x_flat, w1, b1, w2, b2, prior_scale):
    """Runs the fused SCOD forward. Returns (z_mean, z_var), both (N, D_out)."""
    N, d_in = x_flat.shape
    d_h = w1.shape[0]
    d_out = w2.shape[0]

    # One-time relayout of the weights so the MXU contraction dim is on sublanes
    # (avoids an in-kernel XLU relayout of the largest reused operand).
    w1t = jnp.transpose(w1)                # (d_in, d_h)
    w2t = jnp.transpose(w2)                # (d_h, d_out)
    b1r = b1.reshape(1, d_h)
    b2r = b2.reshape(1, d_out)
    prior = prior_scale.reshape(1).astype(jnp.float32)

    # Batch tiling: single full block when N is small / not sublane-aligned,
    # otherwise 8-aligned chunks so the "parallel" batch axis can shard across
    # v7x's two TensorCores.  Capped at 256 rows -> block stays tiny vs VMEM.
    if N % 8 == 0 and N > 8:
        bn = 8
        while bn < min(N, 256) and N % (bn * 2) == 0:
            bn *= 2
    else:
        bn = N
    grid = (N // bn,)

    out_shapes = (
        jax.ShapeDtypeStruct((N, d_out), jnp.float32),   # z_mean
        jax.ShapeDtypeStruct((N, d_out), jnp.float32),   # z_var
    )

    return pl.pallas_call(
        _scod_fused_kernel,
        out_shape=out_shapes,
        grid_spec=pltpu.PrefetchScalarGridSpec(
            num_scalar_prefetch=0,
            grid=grid,
            in_specs=[
                pl.BlockSpec(memory_space=pltpu.MemorySpace.SMEM),     # prior scalar
                pl.BlockSpec((bn, d_in), lambda i: (i, 0)),            # x
                pl.BlockSpec((d_in, d_h), lambda i: (0, 0)),           # W1^T (resident)
                pl.BlockSpec((1, d_h), lambda i: (0, 0)),              # b1
                pl.BlockSpec((d_h, d_out), lambda i: (0, 0)),          # W2^T (resident)
                pl.BlockSpec((1, d_out), lambda i: (0, 0)),            # b2
            ],
            out_specs=(
                pl.BlockSpec((bn, d_out), lambda i: (i, 0)),
                pl.BlockSpec((bn, d_out), lambda i: (i, 0)),
            ),
        ),
        compiler_params=pltpu.CompilerParams(
            dimension_semantics=("parallel",),
        ),
    )(prior, x_flat, w1t, b1r, w2t, b2r)


# ----------------------------------------------------------------------------
# Plain-JAX reference model (used only for the correctness check via jacrev)
# ----------------------------------------------------------------------------
def mlp_forward_ref(params, x_flat):
    w1, b1, w2, b2 = params
    h = jnp.tanh(jnp.dot(x_flat, w1.T, precision=lax.Precision.HIGHEST) + b1)
    return jnp.dot(h, w2.T, precision=lax.Precision.HIGHEST) + b2


# ----------------------------------------------------------------------------
# SCOD.forward wrapper (configured=False, scalar prior, T=None, use_prior=False)
# ----------------------------------------------------------------------------
def scod_forward(params, log_prior_scale, x, prior_multiplier=1.0):
    N = x.shape[0]
    x_flat = x.reshape(N, -1)
    w1, b1, w2, b2 = params

    # sqrt_prior^2 after the in-place log_prior += log(prior_multiplier) dance:
    prior_scale = jnp.exp(log_prior_scale) * prior_multiplier   # (1,)

    z_mean, z_var = scod_fused_pallas(x_flat, w1, b1, w2, b2, prior_scale)

    # TODO(synk): the closed-form grad-norm is specific to the wrapped 2-layer
    # tanh MLP; for arbitrary wrapped models the per-output squared grad norms
    # would need a vjp-based (Jacobian-free) reduction instead.
    # TODO(synk): GGN eigen-basis correction (configured=True) and the online
    # output-projection path (QR + Cholesky) are not exercised by a fresh SCOD
    # module and are left unimplemented.
    return z_mean, z_var.reshape(z_mean.shape)


# ----------------------------------------------------------------------------
# Main
# ----------------------------------------------------------------------------
if __name__ == "__main__":
    key = jax.random.PRNGKey(0)
    kx, k1, k2, k3, k4 = jax.random.split(key, 5)

    # Small shapes: batch=2, channels=4, spatial=16x16 -> D_in=1024, hidden=32, d_out=8
    N, C, H, W = 2, 4, 16, 16
    D_in = C * H * W
    D_h = 32
    D_out = 8

    x = jax.random.normal(kx, (N, C, H, W), dtype=jnp.float32)

    # Deterministic synthetic "pre-trained" model parameters
    w1 = jax.random.normal(k1, (D_h, D_in), dtype=jnp.float32) * (1.0 / jnp.sqrt(D_in))
    b1 = jax.random.normal(k2, (D_h,), dtype=jnp.float32) * 0.1
    w2 = jax.random.normal(k3, (D_out, D_h), dtype=jnp.float32) * (1.0 / jnp.sqrt(D_h))
    b2 = jax.random.normal(k4, (D_out,), dtype=jnp.float32) * 0.1
    params = (w1, b1, w2, b2)

    # SCOD._init_log_prior with prior_type='scalar'
    log_prior_scale = jnp.zeros((1,), dtype=jnp.float32)

    z_mean, z_var = jax.jit(scod_forward)(params, log_prior_scale, x)
    z_mean = jax.block_until_ready(z_mean)
    z_var = jax.block_until_ready(z_var)

    # ---- Pure-JAX reference check (full Jacobian via jacrev, outside hot path) ----
    x_flat = x.reshape(N, -1)
    z_ref = mlp_forward_ref(params, x_flat)
    jac = jax.jacrev(lambda p: mlp_forward_ref(p, x_flat))(params)
    J_ref = jnp.concatenate([g.reshape(N, D_out, -1) for g in jac], axis=-1)
    var_ref = jnp.exp(log_prior_scale) * jnp.sum(J_ref * J_ref, axis=-1)  # diag(J J^T) * prior

    assert z_mean.shape == (N, D_out) and z_var.shape == (N, D_out)
    assert jnp.allclose(z_mean, z_ref, rtol=1e-4, atol=1e-4), "z_mean mismatch"
    assert jnp.allclose(z_var, var_ref, rtol=2e-4, atol=1e-3), "z_var mismatch"

    print("KERNEL_OK")
</pallas_src>

<mosaic_0001>
module attributes {stable_mosaic.version = 11 : i64} {
  func.func @_scod_fused_kernel(%arg0: i32, %arg1: memref<1xf32, #tpu.memory_space<smem>>, %arg2: memref<2x1024xf32, #tpu.memory_space<vmem>>, %arg3: memref<1024x32xf32, #tpu.memory_space<vmem>>, %arg4: memref<1x32xf32, #tpu.memory_space<vmem>>, %arg5: memref<32x8xf32, #tpu.memory_space<vmem>>, %arg6: memref<1x8xf32, #tpu.memory_space<vmem>>, %arg7: memref<2x8xf32, #tpu.memory_space<vmem>>, %arg8: memref<2x8xf32, #tpu.memory_space<vmem>>) attributes {dimension_semantics = [#tpu.dimension_semantics<parallel>], iteration_bounds = array<i64: 1>, scalar_prefetch = 0 : i64, scratch_operands = 0 : i64, tpu.core_type = #tpu.core_type<tc>, window_params = [{transform_indices = @transform_0, window_bounds = array<i64: 1>}, {transform_indices = @transform_1, window_bounds = array<i64: 2, 1024>}, {pipeline_mode = #tpu.pipeline_mode<synchronous>, transform_indices = @transform_2, window_bounds = array<i64: 1024, 32>}, {pipeline_mode = #tpu.pipeline_mode<synchronous>, transform_indices = @transform_3, window_bounds = array<i64: 1, 32>}, {pipeline_mode = #tpu.pipeline_mode<synchronous>, transform_indices = @transform_4, window_bounds = array<i64: 32, 8>}, {pipeline_mode = #tpu.pipeline_mode<synchronous>, transform_indices = @transform_5, window_bounds = array<i64: 1, 8>}, {transform_indices = @transform_6, window_bounds = array<i64: 2, 8>}, {transform_indices = @transform_7, window_bounds = array<i64: 2, 8>}]} {
    %c0 = arith.constant 0 : index
    %c0_0 = arith.constant 0 : index
    %0 = vector.load %arg2[%c0, %c0_0] : memref<2x1024xf32, #tpu.memory_space<vmem>>, vector<2x1024xf32>
    %c0_1 = arith.constant 0 : index
    %c0_2 = arith.constant 0 : index
    %1 = vector.load %arg3[%c0_1, %c0_2] : memref<1024x32xf32, #tpu.memory_space<vmem>>, vector<1024x32xf32>
    %c0_3 = arith.constant 0 : index
    %c0_4 = arith.constant 0 : index
    %2 = vector.load %arg5[%c0_3, %c0_4] : memref<32x8xf32, #tpu.memory_space<vmem>>, vector<32x8xf32>
    %cst = arith.constant dense<0.000000e+00> : vector<2x32xf32>
    %3 = tpu.matmul %0, %1, %cst {dimension_numbers = #tpu.dot_dimension_numbers<[1], [0], [0], [1], [0, 0, 1, 1], [], []>, precision = #tpu.contract_precision<fp32>} : vector<2x1024xf32>, vector<1024x32xf32>, vector<2x32xf32> -> vector<2x32xf32>
    %c0_5 = arith.constant 0 : index
    %c0_6 = arith.constant 0 : index
    %4 = vector.load %arg4[%c0_5, %c0_6] : memref<1x32xf32, #tpu.memory_space<vmem>>, vector<1x32xf32>
    %5 = vector.broadcast %4 : vector<1x32xf32> to vector<2x32xf32>
    %6 = arith.addf %3, %5 : vector<2x32xf32>
    %7 = math.tanh %6 : vector<2x32xf32>
    %cst_7 = arith.constant dense<0.000000e+00> : vector<2x8xf32>
    %8 = tpu.matmul %7, %2, %cst_7 {dimension_numbers = #tpu.dot_dimension_numbers<[1], [0], [0], [1], [0, 0, 1, 1], [], []>, precision = #tpu.contract_precision<fp32>} : vector<2x32xf32>, vector<32x8xf32>, vector<2x8xf32> -> vector<2x8xf32>
    %c0_8 = arith.constant 0 : index
    %c0_9 = arith.constant 0 : index
    %9 = vector.load %arg6[%c0_8, %c0_9] : memref<1x8xf32, #tpu.memory_space<vmem>>, vector<1x8xf32>
    %10 = vector.broadcast %9 : vector<1x8xf32> to vector<2x8xf32>
    %11 = arith.addf %8, %10 : vector<2x8xf32>
    %c0_10 = arith.constant 0 : index
    %c0_11 = arith.constant 0 : index
    %12 = vector.load %arg7[%c0_10, %c0_11] : memref<2x8xf32, #tpu.memory_space<vmem>>, vector<2x8xf32>
    tpu.vector_store %arg7[%c0_10, %c0_11], %11 {strides = array<i32>} : memref<2x8xf32, #tpu.memory_space<vmem>>, vector<2x8xf32>,
    %13 = arith.mulf %0, %0 : vector<2x1024xf32>
    %cst_12 = arith.constant dense<0.000000e+00> : vector<2xf32>
    %14 = vector.multi_reduction <add>, %13, %cst_12 [1] : vector<2x1024xf32> to vector<2xf32>
    %15 = vector.shape_cast %14 : vector<2xf32> to vector<2x1xf32>
    %16 = arith.mulf %7, %7 : vector<2x32xf32>
    %cst_13 = arith.constant dense<0.000000e+00> : vector<2xf32>
    %17 = vector.multi_reduction <add>, %16, %cst_13 [1] : vector<2x32xf32> to vector<2xf32>
    %18 = vector.shape_cast %17 : vector<2xf32> to vector<2x1xf32>
    %19 = arith.mulf %7, %7 : vector<2x32xf32>
    %cst_14 = arith.constant 1.000000e+00 : f32
    %20 = vector.broadcast %cst_14 : f32 to vector<2x32xf32>
    %21 = arith.subf %20, %19 : vector<2x32xf32>
    %22 = arith.mulf %21, %21 : vector<2x32xf32>
    %23 = arith.mulf %2, %2 : vector<32x8xf32>
    %cst_15 = arith.constant dense<0.000000e+00> : vector<2x8xf32>
    %24 = tpu.matmul %22, %23, %cst_15 {dimension_numbers = #tpu.dot_dimension_numbers<[1], [0], [0], [1], [0, 0, 1, 1], [], []>, precision = #tpu.contract_precision<fp32>} : vector<2x32xf32>, vector<32x8xf32>, vector<2x8xf32> -> vector<2x8xf32>
    %c0_16 = arith.constant 0 : index
    %25 = memref.load %arg1[%c0_16] : memref<1xf32, #tpu.memory_space<smem>>
    %cst_17 = arith.constant 1.000000e+00 : f32
    %26 = vector.broadcast %cst_17 : f32 to vector<2x1xf32>
    %27 = arith.addf %15, %26 : vector<2x1xf32>
    %28 = vector.broadcast %27 : vector<2x1xf32> to vector<2x8xf32>
    %29 = arith.mulf %28, %24 : vector<2x8xf32>
    %cst_18 = arith.constant 1.000000e+00 : f32
    %30 = vector.broadcast %cst_18 : f32 to vector<2x1xf32>
    %31 = arith.addf %18, %30 : vector<2x1xf32>
    %32 = vector.broadcast %31 : vector<2x1xf32> to vector<2x8xf32>
    %33 = arith.addf %29, %32 : vector<2x8xf32>
    %34 = vector.broadcast %25 : f32 to vector<2x8xf32>
    %35 = arith.mulf %34, %33 : vector<2x8xf32>
    %c0_19 = arith.constant 0 : index
    %c0_20 = arith.constant 0 : index
    %36 = vector.load %arg8[%c0_19, %c0_20] : memref<2x8xf32, #tpu.memory_space<vmem>>, vector<2x8xf32>
    tpu.vector_store %arg8[%c0_19, %c0_20], %35 {strides = array<i32>} : memref<2x8xf32, #tpu.memory_space<vmem>>, vector<2x8xf32>,
    return
  }
  func.func @transform_0(%arg0: i32) -> i32 {
    %c0_i32 = arith.constant 0 : i32
    %c0_i32_0 = arith.constant 0 : i32
    return %c0_i32 : i32
  }
  func.func @transform_1(%arg0: i32) -> (i32, i32) {
    %c0_i32 = arith.constant 0 : i32
    %c0_i32_0 = arith.constant 0 : i32
    return %arg0, %c0_i32 : i32, i32
  }
  func.func @transform_2(%arg0: i32) -> (i32, i32) {
    %c0_i32 = arith.constant 0 : i32
    %c0_i32_0 = arith.constant 0 : i32
    %c0_i32_1 = arith.constant 0 : i32
    return %c0_i32, %c0_i32_0 : i32, i32
  }
  func.func @transform_3(%arg0: i32) -> (i32, i32) {
    %c0_i32 = arith.constant 0 : i32
    %c0_i32_0 = arith.constant 0 : i32
    %c0_i32_1 = arith.constant 0 : i32
    return %c0_i32, %c0_i32_0 : i32, i32
  }
  func.func @transform_4(%arg0: i32) -> (i32, i32) {
    %c0_i32 = arith.constant 0 : i32
    %c0_i32_0 = arith.constant 0 : i32
    %c0_i32_1 = arith.constant 0 : i32
    return %c0_i32, %c0_i32_0 : i32, i32
  }
  func.func @transform_5(%arg0: i32) -> (i32, i32) {
    %c0_i32 = arith.constant 0 : i32
    %c0_i32_0 = arith.constant 0 : i32
    %c0_i32_1 = arith.constant 0 : i32
    return %c0_i32, %c0_i32_0 : i32, i32
  }
  func.func @transform_6(%arg0: i32) -> (i32, i32) {
    %c0_i32 = arith.constant 0 : i32
    %c0_i32_0 = arith.constant 0 : i32
    return %arg0, %c0_i32 : i32, i32
  }
  func.func @transform_7(%arg0: i32) -> (i32, i32) {
    %c0_i32 = arith.constant 0 : i32
    %c0_i32_0 = arith.constant 0 : i32
    return %arg0, %c0_i32 : i32, i32
  }
}

</mosaic_0001>

<bundles_post_ra>
// kernel: scod_forward.1
= control target key start
LH: loop header
LB: loop body
LE: loop exit
PB: predicated region body
PF: predicated region fallthrough
CT: control target
= control target key end

     0   :  { %14 = vsyncpa [#allocation4], 0  ;;  %v6714_v42 = vmov 1983009808   ;;  %s9997_s0 = inlined_call_operand.<no memory space> [shape: f32[1], index: 0, kind: input, shape index: {}]   ;;  %s9998_s1 = inlined_call_operand.vmem [shape: f32[2,1024], index: 1, kind: input, shape index: {}]   ;;  %s9999_s2 = inlined_call_operand.vmem [shape: f32[1024,32], index: 2, kind: input, shape index: {}]   ;;  %s10000_s3 = inlined_call_operand.vmem [shape: f32[1,32], index: 3, kind: input, shape index: {}]   ;;  %s10001_s4 = inlined_call_operand.vmem [shape: f32[32,8], index: 4, kind: input, shape index: {}]   ;;  %s10002_s5 = inlined_call_operand.vmem [shape: f32[1,8], index: 5, kind: input, shape index: {}]   ;;  %s10003_s6 = inlined_call_operand.hbm [shape: f32[2,8], index: 6, kind: output, shape index: {0}]   ;;  %s10004_s7 = inlined_call_operand.hbm [shape: f32[2,8], index: 7, kind: output, shape index: {1}]  }
   0x1   :  { %v46_v0 = vld [vmem:[%s9999_s2 + $0x80] sm:$0xff]  ;;  %v47_v1 = vld [vmem:[%s9999_s2 + $0x88] sm:$0xff]  ;;  %v48_v7 = vld [vmem:[%s9999_s2 + $0x90] sm:$0xff]  ;;  %v6832_v43 = vunpack.c.l.s4 %v6714_v42 }
   0x2   :  { %v30_v2 = vld [vmem:[%s9999_s2] sm:$0xff]  ;;  %v262_v3 = vand.u32 4294901760, %v46_v0  ;;  %v265_v4 = vand.u32 4294901760, %v47_v1  ;;  %v31_v5 = vld [vmem:[%s9999_s2 + $0x8] sm:$0xff]  ;;  %v49_v8 = vld [vmem:[%s9999_s2 + $0x98] sm:$0xff]  ;;  %v268_v10 = vand.u32 4294901760, %v48_v7 }
   0x3   :  { %v214_v6 = vand.u32 4294901760, %v30_v2  ;;  %v217_v9 = vand.u32 4294901760, %v31_v5  ;;  %v271_v11 = vand.u32 4294901760, %v49_v8  ;;  %v32_v12 = vld [vmem:[%s9999_s2 + $0x10] sm:$0xff]  ;;  %v33_v13 = vld [vmem:[%s9999_s2 + $0x18] sm:$0xff]  ;;  %v50_v18 = vld [vmem:[%s9999_s2 + $0xa0] sm:$0xff] }
   0x4   :  { %v6784_v14 = vpack.c.bf16 %v265_v4, %v262_v3  ;;  %v220_v16 = vand.u32 4294901760, %v32_v12  ;;  %v223_v17 = vand.u32 4294901760, %v33_v13  ;;  %v51_v19 = vld [vmem:[%s9999_s2 + $0xa8] sm:$0xff]  ;;  %v34_v23 = vld [vmem:[%s9999_s2 + $0x20] sm:$0xff]  ;;  %v6807_v25 = vsub.f32 %v48_v7, %v268_v10  ;;  %v52_v37 = vld [vmem:[%s9999_s2 + $0xb0] sm:$0xff] }
   0x5   :  { %v6786_v15 = vsub.f32 %v30_v2, %v214_v6  ;;  %v6794_v20 = vpack.c.bf16 %v217_v9, %v214_v6  ;;  %v6796_v21 = vsub.f32 %v31_v5, %v217_v9  ;;  %v6798_v22 = vpack.c.bf16 %v271_v11, %v268_v10  ;;  %v35_v24 = vld [vmem:[%s9999_s2 + $0x28] sm:$0xff]  ;;  %v53_v41 = vld [vmem:[%s9999_s2 + $0xb8] sm:$0xff]  ;;  %v36_v56 = vld [vmem:[%s9999_s2 + $0x30] sm:$0xff] }
   0x6   :  { %5794 = vmatprep.subr.bf16.mxu0 %v6784_v14  ;;  %v6809_v26 = vsub.f32 %v49_v8, %v271_v11  ;;  %v6811_v27 = vpack.c.bf16 %v223_v17, %v220_v16  ;;  %v274_v29 = vand.u32 4294901760, %v50_v18  ;;  %v277_v30 = vand.u32 4294901760, %v51_v19  ;;  %v37_v57 = vld [vmem:[%s9999_s2 + $0x38] sm:$0xff]  ;;  %v54_v6 = vld [vmem:[%s9999_s2 + $0xc0] sm:$0xff]  ;;  %v55_v7 = vld [vmem:[%s9999_s2 + $0xc8] sm:$0xff] }
   0x7   :  { %5796 = vmatpush3.bf16.msra.mxu0 %v6794_v20  ;;  %v6814_v31 = vsub.f32 %v46_v0, %v262_v3  ;;  %v6816_v32 = vsub.f32 %v47_v1, %v265_v4  ;;  %v226_v33 = vand.u32 4294901760, %v34_v23  ;;  %v229_v34 = vand.u32 4294901760, %v35_v24 }
   0x8   :  { %5798 = vmatprep.subr.bf16.mxu0 %v6798_v22  ;;  %v10020_v35 = vand.u32 4294901760, %v6786_v15  ;;  %v10017_v36 = vand.u32 4294901760, %v6796_v21  ;;  %v6824_v38 = vsub.f32 %v32_v12, %v220_v16  ;;  %v6826_v39 = vpack.c.bf16 %v277_v30, %v274_v29  ;;  %v38_v12 = vld [vmem:[%s9999_s2 + $0x40] sm:$0xff] }
   0x9   :  { %v10022_v40 = vand.u32 4294901760, %v6814_v31  ;;  %v6834_v44 = vsub.f32 %v33_v13, %v223_v17  ;;  %v6836_v45 = vsub.f32 %v50_v18, %v274_v29  ;;  %v10021_v46 = vand.u32 4294901760, %v6816_v32 }
   0xa   :  { %v6839_v47 = vpack.c.bf16 %v229_v34, %v226_v33  ;;  %v329_v49 = vsub.f32 %v6786_v15, %v10020_v35  ;;  %v336_v50 = vsub.f32 %v6796_v21, %v10017_v36  ;;  %v280_v51 = vand.u32 4294901760, %v52_v37 }
   0xb   :  { %5800 = vmatpush3.bf16.msra.mxu0 %v6811_v27  ;;  %v441_v48 = vsub.f32 %v6814_v31, %v10022_v40  ;;  %v448_v52 = vsub.f32 %v6816_v32, %v10021_v46  ;;  %v283_v53 = vand.u32 4294901760, %v53_v41  ;;  %v10015_v54 = vand.u32 4294901760, %v6807_v25 }
   0xc   :  { %5802 = vmatprep.subr.bf16.mxu0 %v6826_v39  ;;  %v10014_v55 = vand.u32 4294901760, %v6809_v26  ;;  %v6863_v58 = vsub.f32 %v51_v19, %v277_v30  ;;  %v330_v60 = vand.u32 4294901760, %v329_v49  ;;  %v337_v61 = vand.u32 4294901760, %v336_v50 }
   0xd   :  { %v442_v59 = vand.u32 4294901760, %v441_v48  ;;  %v449_v62 = vand.u32 4294901760, %v448_v52  ;;  %v6865_v63 = vsub.f32 %v34_v23, %v226_v33  ;;  %v6867_v0 = vpack.c.bf16 %v283_v53, %v280_v51 }
   0xe   :  { %v455_v1 = vsub.f32 %v6807_v25, %v10015_v54  ;;  %v5827_v2 = vpack.c.bf16 %v337_v61, %v330_v60  ;;  %v462_v3 = vsub.f32 %v6809_v26, %v10014_v55  ;;  %v232_v4 = vand.u32 4294901760, %v36_v56 }
   0xf   :  { %5804 = vmatpush3.bf16.msra.mxu0 %v6839_v47  ;;  %v235_v5 = vand.u32 4294901760, %v37_v57  ;;  %v5825_v8 = vpack.c.bf16 %v449_v62, %v442_v59  ;;  %v10012_v10 = vand.u32 4294901760, %v6824_v38  ;;  %v10011_v11 = vand.u32 4294901760, %v6834_v44 }
  0x10   :  { %5806 = vmatprep.subr.bf16.mxu0 %v6867_v0  ;;  %v456_v9 = vand.u32 4294901760, %v455_v1  ;;  %v6888_v13 = vsub.f32 %v35_v24, %v229_v34  ;;  %v6890_v16 = vsub.f32 %v52_v37, %v280_v51  ;;  %v463_v17 = vand.u32 4294901760, %v462_v3  ;;  %v39_v24 = vld [vmem:[%s9999_s2 + $0x48] sm:$0xff]  ;;  %v40_v3 = vld [vmem:[%s9999_s2 + $0x50] sm:$0xff] }
  0x11   :  { %v6892_v18 = vpack.c.bf16 %v235_v5, %v232_v4  ;;  %5826 = vmatprep.subr.bf16.mxu1 %v5825_v8  ;;  %v343_v19 = vsub.f32 %v6824_v38, %v10012_v10  ;;  %v350_v23 = vsub.f32 %v6834_v44, %v10011_v11  ;;  %v286_v29 = vand.u32 4294901760, %v54_v6 }
  0x12   :  { %v289_v30 = vand.u32 4294901760, %v55_v7  ;;  %5828 = vmatpush3.bf16.msra.mxu1 %v5827_v2  ;;  %v5829_v33 = vpack.c.bf16 %v463_v17, %v456_v9  ;;  %v10010_v34 = vand.u32 4294901760, %v6836_v45  ;;  %v10007_v37 = vand.u32 4294901760, %v6863_v58 }
  0x13   :  { %5808 = vmatpush3.bf16.msra.mxu0 %v6892_v18  ;;  %v238_v42 = vand.u32 4294901760, %v38_v12  ;;  %v6906_v48 = vsub.f32 %v53_v41, %v283_v53  ;;  %v344_v49 = vand.u32 4294901760, %v343_v19  ;;  %v351_v50 = vand.u32 4294901760, %v350_v23  ;;  %v56_v41 = vld [vmem:[%s9999_s2 + $0xd0] sm:$0xff]  ;;  %v57_v53 = vld [vmem:[%s9999_s2 + $0xd8] sm:$0xff] }
  0x14   :  { %v6908_v51 = vpack.c.bf16 %v289_v30, %v286_v29  ;;  %5830 = vmatprep.subr.bf16.mxu1 %v5829_v33  ;;  %v6910_v52 = vsub.f32 %v36_v56, %v232_v4  ;;  %v469_v59 = vsub.f32 %v6836_v45, %v10010_v34  ;;  %v476_v60 = vsub.f32 %v6863_v58, %v10007_v37 }
  0x15   :  { %v241_v61 = vand.u32 4294901760, %v39_v24  ;;  %v6924_v62 = vsub.f32 %v37_v57, %v235_v5  ;;  %v5831_v56 = vpack.c.bf16 %v351_v50, %v344_v49  ;;  %v10005_v1 = vand.u32 4294901760, %v6865_v63 }
  0x16   :  { %5810 = vmatprep.subr.bf16.mxu0 %v6908_v51  ;;  %v10006_v2 = vand.u32 4294901760, %v6888_v13  ;;  %v6932_v4 = vsub.f32 %v54_v6, %v286_v29  ;;  %v470_v8 = vand.u32 4294901760, %v469_v59  ;;  %v477_v9 = vand.u32 4294901760, %v476_v60 }
  0x17   :  { %v6934_v17 = vpack.c.bf16 %v241_v61, %v238_v42 }
  0x18   :  { %15 = vsyncpa [#allocation6], 0  ;;  %5832 = vmatpush3.bf16.msra.mxu1 %v5831_v56  ;;  %v357_v57 = vsub.f32 %v6865_v63, %v10005_v1  ;;  %v364_v5 = vsub.f32 %v6888_v13, %v10006_v2  ;;  %v292_v19 = vand.u32 4294901760, %v56_v41  ;;  %v295_v23 = vand.u32 4294901760, %v57_v53  ;;  %v41_v6 = vld [vmem:[%s9999_s2 + $0x58] sm:$0xff]  ;;  %s6718_s20 = smov [#allocation3]  }
  0x19   :  { %v5833_v29 = vpack.c.bf16 %v477_v9, %v470_v8  ;;  %5812 = vmatpush3.bf16.msra.mxu0 %v6934_v17  ;;  %v10009_v33 = vand.u32 4294901760, %v6890_v16  ;;  %v10008_v49 = vand.u32 4294901760, %v6906_v48  ;;  %v244_v50 = vand.u32 4294901760, %v40_v3  ;;  %s4737_s21 = sshll.u32 %s6718_s20, 4  ;;  %s4738_s21 = int_to_ptr.vmem [resolvable:$true] %s4737_s21 }
  0x1a   :  { %v6948_v59 = vsub.f32 %v55_v7, %v289_v30  ;;  %v358_v60 = vand.u32 4294901760, %v357_v57  ;;  %v365_v56 = vand.u32 4294901760, %v364_v5  ;;  %v6950_v1 = vpack.c.bf16 %v295_v23, %v292_v19  ;;  %v58_v7 = vld [vmem:[%s9999_s2 + $0xe0] sm:$0xff]  ;;  %v59_v30 = vld [vmem:[%s9999_s2 + $0xe8] sm:$0xff]  ;;  %s6666_s22 = scalar_lea.vmem %s4738_s21, 32  ;;  %p6671_p1 = scmp.lt.s32.totalorder %s4738_s21, %s4738_s21 }
  0x1b   :  { %5834 = vmatprep.subr.bf16.mxu1 %v5833_v29  ;;  %v6952_v2 = vsub.f32 %v38_v12, %v238_v42  ;;  %v483_v8 = vsub.f32 %v6890_v16, %v10009_v33  ;;  %v490_v9 = vsub.f32 %v6906_v48, %v10008_v49  ;;  %v247_v37 = vand.u32 4294901760, %v41_v6  ;;  %v42_v29 = vld [vmem:[%s9999_s2 + $0x60] sm:$0xff]  ;;  %p6667_p0 = scmp.ne.s32.totalorder %s4738_s21, %s6666_s22  ;;  %p6672_p2 = scmp.lt.s32.totalorder %s6666_s22, %s6666_s22 }
  0x1c   :  { %v6966_v57 = vsub.f32 %v39_v24, %v241_v61  ;;  %v5835_v12 = vpack.c.bf16 %v365_v56, %v358_v60  ;;  %5814 = vmatprep.subr.bf16.mxu0 %v6950_v1  ;;  %v10013_v42 = vand.u32 4294901760, %v6910_v52  ;;  %v10016_v5 = vand.u32 4294901760, %v6924_v62 }
  0x1d   :  { %v6974_v49 = vsub.f32 %v56_v41, %v292_v19  ;;  %v484_v33 = vand.u32 4294901760, %v483_v8  ;;  %v491_v34 = vand.u32 4294901760, %v490_v9  ;;  %v6976_v11 = vpack.c.bf16 %v247_v37, %v244_v50  ;;  %v43_v41 = vld [vmem:[%s9999_s2 + $0x68] sm:$0xff]  ;;  %p6673_p3 = por %p6672_p2, %p6671_p1 }
  0x1e   :  { %5836 = vmatpush3.bf16.msra.mxu1 %v5835_v12  ;;  %v371_v24 = vsub.f32 %v6910_v52, %v10013_v42  ;;  %v378_v61 = vsub.f32 %v6924_v62, %v10016_v5  ;;  %v298_v60 = vand.u32 4294901760, %v58_v7  ;;  %v301_v56 = vand.u32 4294901760, %v59_v30 }
  0x1f   :  { %10243 = vst [vmem:[#allocation9_spill] sm:$0xff] %v6976_v11  ;;  %v5837_v19 = vpack.c.bf16 %v491_v34, %v484_v33  ;;  %5816 = vmatpush3.bf16.msra.mxu0 %v6976_v11  ;;  %v10019_v8 = vand.u32 4294901760, %v6932_v4  ;;  %v10018_v9 = vand.u32 4294901760, %v6948_v59  ;;  %v250_v12 = vand.u32 4294901760, %v42_v29  ;;  %p6674_p4 = pnand %p6673_p3, %p6667_p0 }
  0x20   :  { %v6990_v10 = vsub.f32 %v57_v53, %v295_v23  ;;  %v372_v42 = vand.u32 4294901760, %v371_v24  ;;  %v379_v55 = vand.u32 4294901760, %v378_v61  ;;  %v6992_v54 = vpack.c.bf16 %v301_v56, %v298_v60  ;;  %v60_v53 = vld [vmem:[%s9999_s2 + $0xf0] sm:$0xff]  ;;  %v61_v23 = vld [vmem:[%s9999_s2 + $0xf8] sm:$0xff] }
  0x21   :  { %5838 = vmatprep.subr.bf16.mxu1 %v5837_v19  ;;  %v6994_v5 = vsub.f32 %v40_v3, %v244_v50  ;;  %v497_v34 = vsub.f32 %v6932_v4, %v10019_v8  ;;  %v504_v33 = vsub.f32 %v6948_v59, %v10018_v9  ;;  %v253_v36 = vand.u32 4294901760, %v43_v41  ;;  %v44_v19 = vld [vmem:[%s9999_s2 + $0x70] sm:$0xff] }
  0x22   :  { %10244 = vst [vmem:[#allocation10_spill] sm:$0xff] %v6992_v54  ;;  %v7008_v24 = vsub.f32 %v41_v6, %v247_v37  ;;  %v5839_v3 = vpack.c.bf16 %v379_v55, %v372_v42  ;;  %5818 = vmatprep.subr.bf16.mxu0 %v6992_v54  ;;  %v10023_v50 = vand.u32 4294901760, %v6952_v2  ;;  %v10026_v61 = vand.u32 4294901760, %v6966_v57 }
  0x23   :  { %v7016_v9 = vsub.f32 %v58_v7, %v298_v60  ;;  %v498_v8 = vand.u32 4294901760, %v497_v34  ;;  %v505_v35 = vand.u32 4294901760, %v504_v33  ;;  %v7018_v46 = vpack.c.bf16 %v253_v36, %v250_v12  ;;  %v45_v7 = vld [vmem:[%s9999_s2 + $0x78] sm:$0xff] }
  0x24   :  { %5840 = vmatpush3.bf16.msra.mxu1 %v5839_v3  ;;  %v385_v55 = vsub.f32 %v6952_v2, %v10023_v50  ;;  %v392_v37 = vsub.f32 %v6966_v57, %v10026_v61  ;;  %v304_v6 = vand.u32 4294901760, %v60_v53  ;;  %v307_v42 = vand.u32 4294901760, %v61_v23 }
  0x25   :  { %10245 = vst [vmem:[#allocation11_spill] sm:$0xff] %v7018_v46  ;;  %v5841_v60 = vpack.c.bf16 %v505_v35, %v498_v8  ;;  %5820 = vmatpush3.bf16.msra.mxu0 %v7018_v46  ;;  %v10031_v34 = vand.u32 4294901760, %v6974_v49  ;;  %v10036_v33 = vand.u32 4294901760, %v6990_v10  ;;  %v256_v3 = vand.u32 4294901760, %v44_v19 }
  0x26   :  { %v7032_v40 = vsub.f32 %v59_v30, %v301_v56  ;;  %v386_v50 = vand.u32 4294901760, %v385_v55  ;;  %v393_v28 = vand.u32 4294901760, %v392_v37  ;;  %v7034_v54 = vpack.c.bf16 %v307_v42, %v304_v6 }
  0x27   :  { %5842 = vmatprep.subr.bf16.mxu1 %v5841_v60  ;;  %v7036_v61 = vsub.f32 %v42_v29, %v250_v12  ;;  %v511_v35 = vsub.f32 %v6974_v49, %v10031_v34  ;;  %v518_v8 = vsub.f32 %v6990_v10, %v10036_v33  ;;  %v259_v46 = vand.u32 4294901760, %v45_v7 }
  0x28   :  { %10246 = vst [vmem:[#allocation12_spill] sm:$0xff] %v7034_v54  ;;  %v7044_v11 = vsub.f32 %v43_v41, %v253_v36  ;;  %v5843_v30 = vpack.c.bf16 %v393_v28, %v386_v50  ;;  %5822 = vmatprep.subr.bf16.mxu0 %v7034_v54  ;;  %v10035_v56 = vand.u32 4294901760, %v6994_v5  ;;  %v10032_v55 = vand.u32 4294901760, %v7008_v24 }
  0x29   :  { %v7049_v29 = vsub.f32 %v60_v53, %v304_v6  ;;  %v512_v12 = vand.u32 4294901760, %v511_v35  ;;  %v519_v37 = vand.u32 4294901760, %v518_v8  ;;  %v7051_v60 = vpack.c.bf16 %v259_v46, %v256_v3 }
  0x2a   :  { %5844 = vmatpush3.bf16.msra.mxu1 %v5843_v30  ;;  %v7053_v34 = vsub.f32 %v61_v23, %v307_v42  ;;  %v399_v36 = vsub.f32 %v6994_v5, %v10035_v56  ;;  %v406_v28 = vsub.f32 %v7008_v24, %v10032_v55  ;;  %v174_v41 = vunpack.c.0.s8 %v6832_v43  ;;  %v7070_v30 = vld [vmem:[%s9998_s1] sm:$0xff] }
  0x2b   :  { %10247 = vst [vmem:[#allocation13_spill] sm:$0xff] %v7049_v29  ;;  %10248 = vst [vmem:[#allocation14_spill] sm:$0xff] %v7051_v60  ;;  %v5845_v50 = vpack.c.bf16 %v519_v37, %v512_v12  ;;  %5824 = vmatpush3.bf16.msra.mxu0 %v7051_v60  ;;  %v7063_v53 = vsub.f32 %v44_v19, %v256_v3  ;;  %v10250_v6 = vlaneseq  ;;  %v10033_v23 = vand.u32 4294901760, %v7016_v9 }
  0x2c   :  { %v400_v42 = vand.u32 4294901760, %v399_v36  ;;  %v407_v8 = vand.u32 4294901760, %v406_v28  ;;  %10251 = vst [vmem:[#allocation16_spill] sm:$0xff] %v7070_v30  ;;  %v10034_v55 = vand.u32 4294901760, %v7032_v40  ;;  %v5857_v43 = vpack.c.bf16 %v6816_v32, %v6814_v31 }
  0x2d   :  { %10249 = vst [vmem:[#allocation15_spill] sm:$0xff] %v7063_v53  ;;  %v176_v35 = vshrl.u32 %v10250_v6, 7  ;;  %5846 = vmatprep.subr.bf16.mxu1 %v5845_v50  ;;  %v525_v19 = vsub.f32 %v7016_v9, %v10033_v23  ;;  %v10040_v3 = vand.u32 4294901760, %v7036_v61  ;;  %v10043_v37 = vand.u32 4294901760, %v7044_v11 }
  0x2e   :  { %v7082_v36 = vsub.f32 %v45_v7, %v259_v46  ;;  %v5847_v28 = vpack.c.bf16 %v407_v8, %v400_v42  ;;  %v532_v6 = vsub.f32 %v7032_v40, %v10034_v55  ;;  %5858 = vmatprep.subr.bf16.mxu0 %v5857_v43  ;;  %v538_v50 = vand.u32 4294901760, %v7049_v29 }
  0x2f   :  { %v7075_v12 = vsub.s32 %v174_v41, %v176_v35  ;;  %v526_v35 = vand.u32 4294901760, %v525_v19  ;;  %v413_v23 = vsub.f32 %v7036_v61, %v10040_v3  ;;  %v420_v46 = vsub.f32 %v7044_v11, %v10043_v37 }
  0x30   :  { %5848 = vmatpush3.bf16.msra.mxu1 %v5847_v28  ;;  %v533_v7 = vand.u32 4294901760, %v532_v6  ;;  %v539_v42 = vsub.f32 %v7049_v29, %v538_v50  ;;  %v545_v8 = vand.u32 4294901760, %v7053_v34  ;;  %v426_v3 = vand.u32 4294901760, %v7063_v53 }
  0x31   :  { %10252 = vst [vmem:[#allocation17_spill] sm:$0xff] %v7075_v12  ;;  %v178_v41 = vrot.slane %v7070_v30, %v7075_v12  ;;  %v414_v56 = vand.u32 4294901760, %v413_v23  ;;  %v421_v33 = vand.u32 4294901760, %v420_v46  ;;  %v433_v37 = vand.u32 4294901760, %v7082_v36 }
  0x32   :  { %v5849_v19 = vpack.c.bf16 %v533_v7, %v526_v35  ;;  %v540_v12 = vand.u32 4294901760, %v539_v42  ;;  %v546_v30 = vsub.f32 %v7053_v34, %v545_v8  ;;  %v427_v29 = vsub.f32 %v7063_v53, %v426_v3 }
  0x33   :  { %v186_v43 = vcombine.high %v178_v41, %v178_v41  ;;  %v7098_v55 = vand.u32 4294901760, %v178_v41  ;;  %v5851_v6 = vpack.c.bf16 %v421_v33, %v414_v56  ;;  %v434_v46 = vsub.f32 %v7082_v36, %v433_v37 }
  0x34   :  { %5850 = vmatprep.subr.bf16.mxu1 %v5849_v19  ;;  %v547_v54 = vand.u32 4294901760, %v546_v30  ;;  %v428_v42 = vand.u32 4294901760, %v427_v29  ;;  %vm4206_vm0 = vcmask 1041408   ;;  %vm6716_vm1 = vmmov 0  }
  0x35   :  { %10253 = vst [vmem:[#allocation18_spill] sm:$0xff] %v7098_v55  ;;  %v7102_v60 = vand.u32 4294901760, %v186_v43  ;;  %v7105_v28 = vsub.f32 %v178_v41, %v7098_v55  ;;  %5852 = vmatpush3.bf16.msra.mxu1 %v5851_v6  ;;  %v435_v56 = vand.u32 4294901760, %v434_v46  ;;  %v5861_v6 = vpack.c.bf16 %v6809_v26, %v6807_v25 }
  0x36   :  { %v5853_v7 = vpack.c.bf16 %v547_v54, %v540_v12  ;;  %v10256_v54 = vand.u32 4294901760, %v6816_v32  ;;  %v10257_v12 = vand.u32 4294901760, %v6786_v15  ;;  %v10258_v46 = vand.u32 4294901760, %v6796_v21 }
  0x37   :  { %10254 = vst [vmem:[#allocation19_spill] sm:$0xff] %v7102_v60  ;;  %v310_v23 = vsub.f32 %v186_v43, %v7102_v60  ;;  %v10050_v35 = vand.u32 4294901760, %v7105_v28  ;;  %550 = vmatprep.mubr.f32.mxu1 %v7102_v60  ;;  %v5859_v43 = vpack.c.bf16 %v6796_v21, %v6786_v15  ;;  %v5855_v19 = vpack.c.bf16 %v435_v56, %v428_v42 }
  0x38   :  { %5854 = vmatprep.subr.bf16.mxu1 %v5853_v7  ;;  %v10255_v60 = vand.u32 4294901760, %v6814_v31  ;;  %v7130_v7 = vpack.c.bf16 %v10258_v46, %v10257_v12  ;;  %v10259_v42 = vand.u32 4294901760, %v6807_v25  ;;  %v10261_v31 = vand.u32 4294901760, %v6824_v38 }
  0x39   :  { %v311_v41 = vand.u32 4294901760, %v310_v23  ;;  %v318_v33 = vsub.f32 %v7105_v28, %v10050_v35  ;;  %5856 = vmatpush3.bf16.msra.mxu1 %v5855_v19  ;;  %v10262_v32 = vand.u32 4294901760, %v6834_v44  ;;  %v10263_v15 = vand.u32 4294901760, %v6836_v45 }
  0x3a   :  { %v7124_v29 = vpack.c.bf16 %v10256_v54, %v10255_v60  ;;  %v10264_v21 = vand.u32 4294901760, %v6863_v58  ;;  %5890 = vmatprep.subr.bf16.mxu1 %v6784_v14  ;;  %v10265_v25 = vand.u32 4294901760, %v6865_v63  ;;  %v10268_v19 = vand.u32 4294901760, %v6890_v16 }
  0x3b   :  { %v312_v30 = vsub.f32 %v310_v23, %v311_v41  ;;  %v319_v53 = vand.u32 4294901760, %v318_v33  ;;  %v10260_v33 = vand.u32 4294901760, %v6809_v26  ;;  %v7142_v60 = vpack.c.bf16 %v10262_v32, %v10261_v31 }
  0x3c   :  { %v7148_v54 = vpack.c.bf16 %v10264_v21, %v10263_v15  ;;  %v10266_v26 = vand.u32 4294901760, %v6888_v13  ;;  %v10269_v12 = vand.u32 4294901760, %v6906_v48  ;;  %v10274_v32 = vand.u32 4294901760, %v6932_v4  ;;  %552 = vmatmul.mubr.f32.vlgmr.msra.gmra.mrb[0].mxu1 %v7098_v55  ;;  %v7593_v55 = vld [vmem:[%s9999_s2 + $0x1f0] sm:$0xff] }
  0x3d   :  { %v313_v35 = vand.u32 4294901760, %v312_v30  ;;  %v7136_v56 = vpack.c.bf16 %v10260_v33, %v10259_v42  ;;  %v10271_v42 = vand.u32 4294901760, %v6910_v52  ;;  %v10272_v33 = vand.u32 4294901760, %v6924_v62  ;;  %5892 = vmatpush3.bf16.msra.mxu1 %v6794_v20  ;;  %794 = vmatprep.mubr.f32.mxu1 %v311_v41  ;;  %v10293_v41 = vld [vmem:[#allocation15_spill] sm:$0xff]  ;;  %10340 = vst [vmem:[#allocation41_spill] sm:$0xff] %v7593_v55 }
  0x3e   :  { %v7155_v30 = vpack.c.bf16 %v10266_v26, %v10265_v25  ;;  %v7161_v46 = vpack.c.bf16 %v10269_v12, %v10268_v19  ;;  %v10275_v15 = vand.u32 4294901760, %v6948_v59  ;;  %v10276_v25 = vand.u32 4294901760, %v6952_v2  ;;  %5894 = vmatprep.subr.bf16.mxu1 %v6798_v22 }
  0x3f   :  { %v7167_v31 = vpack.c.bf16 %v10272_v33, %v10271_v42  ;;  %314 = vmatprep.mubr.f32.mxu0 %v313_v35  ;;  %v10277_v26 = vand.u32 4294901760, %v6966_v57  ;;  %v10278_v19 = vand.u32 4294901760, %v6974_v49  ;;  %v10279_v12 = vand.u32 4294901760, %v6990_v10 }
  0x40   :  { %10267 = vst [vmem:[#allocation20_spill] sm:$0xff] %v7155_v30  ;;  %10270 = vst [vmem:[#allocation21_spill] sm:$0xff] %v7161_v46  ;;  %v7173_v21 = vpack.c.bf16 %v10275_v15, %v10274_v32  ;;  %v10281_v42 = vand.u32 4294901760, %v6994_v5  ;;  %v10282_v33 = vand.u32 4294901760, %v7008_v24  ;;  %v10283_v35 = vand.u32 4294901760, %v7016_v9  ;;  %320 = vmatmul.mubr.f32.vlgmr.msra.gmra.mrb[0].mxu0 %v319_v53 }
  0x41   :  { %10273 = vst [vmem:[#allocation22_spill] sm:$0xff] %v7167_v31  ;;  %v7179_v30 = vpack.c.bf16 %v10277_v26, %v10276_v25  ;;  %v7185_v46 = vpack.c.bf16 %v10279_v12, %v10278_v19  ;;  %v10284_v32 = vand.u32 4294901760, %v7032_v40  ;;  %v10285_v25 = vand.u32 4294901760, %v7036_v61  ;;  %5860 = vmatpush3.bf16.msra.mxu0 %v5859_v43  ;;  %687 = vmatprep.mubr.f32.mxu0 %v310_v23  ;;  %v7288_v23 = vld [vmem:[%s9999_s2 + $0x118] sm:$0xff] }
  0x42   :  { %v7191_v31 = vpack.c.bf16 %v10282_v33, %v10281_v42  ;;  %v10286_v26 = vand.u32 4294901760, %v7044_v11  ;;  %v7206_v12 = vpack.c.bf16 %v545_v8, %v538_v50  ;;  %v5863_v42 = vpack.c.bf16 %v6834_v44, %v6824_v38  ;;  %5862 = vmatprep.subr.bf16.mxu0 %v5861_v6  ;;  %5896 = vmatpush3.bf16.msra.mxu1 %v6811_v27  ;;  %v7283_v8 = vld [vmem:[%s9999_s2 + $0x110] sm:$0xff] }
  0x43   :  { %10280 = vst [vmem:[#allocation23_spill] sm:$0xff] %v7185_v46  ;;  %v7197_v15 = vpack.c.bf16 %v10284_v32, %v10283_v35  ;;  %v7208_v46 = vpack.c.bf16 %v433_v37, %v426_v3  ;;  %v5865_v53 = vpack.c.bf16 %v6863_v58, %v6836_v45  ;;  %v5867_v50 = vpack.c.bf16 %v6888_v13, %v6865_v63  ;;  %v7237_v13 = vld [vmem:[%s9999_s2 + $0x180] sm:$0xff]  ;;  %v10290_v37 = vld [vmem:[#allocation10_spill] sm:$0xff]  ;;  %v10294_v6 = vld [vmem:[#allocation11_spill] sm:$0xff] }
  0x44   :  { %v7204_v19 = vpack.c.bf16 %v10286_v26, %v10285_v25  ;;  %v5869_v38 = vpack.c.bf16 %v6906_v48, %v6890_v16  ;;  %5898 = vmatprep.subr.bf16.mxu1 %v6826_v39  ;;  %v5871_v44 = vpack.c.bf16 %v6924_v62, %v6910_v52  ;;  %v5873_v45 = vpack.c.bf16 %v6948_v59, %v6932_v4  ;;  %v7242_v16 = vld [vmem:[%s9999_s2 + $0x188] sm:$0xff]  ;;  %v10295_v26 = vld [vmem:[#allocation12_spill] sm:$0xff] }
  0x45   :  { %5864 = vmatpush3.bf16.msra.mxu0 %v5863_v42  ;;  %v5875_v58 = vpack.c.bf16 %v6966_v57, %v6952_v2  ;;  %v5877_v63 = vpack.c.bf16 %v6990_v10, %v6974_v49  ;;  %v5879_v48 = vpack.c.bf16 %v7008_v24, %v6994_v5  ;;  %v1124_v10 = vand.u32 4294901760, %v7237_v13  ;;  %v62_v2 = vld [vmem:[%s9999_s2 + $0x100] sm:$0xff]  ;;  %v63_v4 = vld [vmem:[%s9999_s2 + $0x108] sm:$0xff]  ;;  %10292 = vst [vmem:[#allocation10_spill] sm:$0xff] %v7288_v23 }
  0x46   :  { %5866 = vmatprep.subr.bf16.mxu0 %v5865_v53  ;;  %5900 = vmatpush3.bf16.msra.mxu1 %v6839_v47  ;;  %v1127_v52 = vand.u32 4294901760, %v7242_v16  ;;  %v5881_v62 = vpack.c.bf16 %v7032_v40, %v7016_v9  ;;  %v5883_v49 = vpack.c.bf16 %v7044_v11, %v7036_v61  ;;  %v10287_v59 = vld [vmem:[#allocation9_spill] sm:$0xff]  ;;  %v1076_v5 = vand.u32 4294901760, %v62_v2  ;;  %v7270_v9 = vld [vmem:[%s9999_s2 + $0x190] sm:$0xff]  ;;  %v7278_v11 = vld [vmem:[%s9999_s2 + $0x198] sm:$0xff] }
  0x47   :  { %5902 = vmatprep.subr.bf16.mxu1 %v6867_v0  ;;  %v7262_v57 = vsub.f32 %v7237_v13, %v1124_v10  ;;  %v10289_v24 = vld [vmem:[#allocation13_spill] sm:$0xff]  ;;  %v1079_v61 = vand.u32 4294901760, %v63_v4  ;;  %v10054_v43 = vand.u32 4294901760, %v7270_v9  ;;  %v10051_v35 = vand.u32 4294901760, %v7278_v11 }
  0x48   :  { %v7265_v40 = vsub.f32 %v7242_v16, %v1127_v52  ;;  %v5885_v3 = vpack.c.bf16 %v7053_v34, %v10289_v24  ;;  %10291 = vst [vmem:[#allocation13_spill] sm:$0xff] %v7283_v8  ;;  %v5887_v34 = vpack.c.bf16 %v7082_v36, %v10293_v41  ;;  %v7294_v33 = vsub.f32 %v62_v2, %v1076_v5  ;;  %v7345_v2 = vld [vmem:[%s9999_s2 + $0x1b0] sm:$0xff]  ;;  %v10302_v41 = vld [vmem:[#allocation16_spill] sm:$0xff] }
  0x49   :  { %5868 = vmatpush3.bf16.msra.mxu0 %v5867_v50  ;;  %10288 = vst [vmem:[#allocation9_spill] sm:$0xff] %v7262_v57  ;;  %v10056_v32 = vand.u32 4294901760, %v7262_v57  ;;  %v10052_v42 = vand.u32 4294901760, %v7283_v8  ;;  %v10053_v36 = vand.u32 4294901760, %v7288_v23  ;;  %v7302_v53 = vsub.f32 %v63_v4, %v1079_v61  ;;  %v7307_v50 = vld [vmem:[%s9999_s2 + $0x1a0] sm:$0xff] }
  0x4a   :  { %5870 = vmatprep.subr.bf16.mxu0 %v5869_v38  ;;  %5904 = vmatpush3.bf16.msra.mxu1 %v6892_v18  ;;  %v10055_v25 = vand.u32 4294901760, %v7265_v40  ;;  %10296 = vst [vmem:[#allocation15_spill] sm:$0xff] %v7307_v50  ;;  %v7312_v38 = vld [vmem:[%s9999_s2 + $0x1a8] sm:$0xff]  ;;  %v7333_v13 = vsub.f32 %v7278_v11, %v10051_v35  ;;  %v10058_v24 = vand.u32 4294901760, %v7307_v50  ;;  %vm3669_vm2 = vcmask 261120  }
  0x4b   :  { %5906 = vmatprep.subr.bf16.mxu1 %v6908_v51  ;;  %10297 = vst [vmem:[#allocation11_spill] sm:$0xff] %v7312_v38  ;;  %v1303_v16 = vsub.f32 %v7262_v57, %v10056_v32  ;;  %v7352_v4 = vsub.f32 %v7283_v8, %v10052_v42  ;;  %v10303_v42 = vand.u32 4294901760, %v7105_v28  ;;  %vm4225_vm3 = vcmask 254976  }
  0x4c   :  { %vm4158_vm4 = vcmask 58368  }
  0x4d   :  { %5872 = vmatpush3.bf16.msra.mxu0 %v5871_v44  ;;  %v7317_v44 = vsub.f32 %v7270_v9, %v10054_v43  ;;  %v7371_v43 = vpack.c.bf16 %v1079_v61, %v1076_v5  ;;  %v7408_v5 = vld [vmem:[%s9999_s2 + $0x138] sm:$0xff]  ;;  %v7465_v61 = vld [vmem:[%s9999_s2 + $0x140] sm:$0xff] }
  0x4e   :  { %5874 = vmatprep.subr.bf16.mxu0 %v5873_v45  ;;  %5908 = vmatpush3.bf16.msra.mxu1 %v6934_v17  ;;  %v7322_v45 = vld [vmem:[%s9999_s2 + $0x120] sm:$0xff]  ;;  %10308 = vst [vmem:[#allocation28_spill] sm:$0xff] %v7408_v5  ;;  %10315 = vst [vmem:[#allocation31_spill] sm:$0xff] %v7465_v61 }
  0x4f   :  { %5910 = vmatprep.subr.bf16.mxu1 %v6950_v1  ;;  %10298 = vst [vmem:[#allocation12_spill] sm:$0xff] %v7322_v45  ;;  %10305 = vst [vmem:[#allocation25_spill] sm:$0xff] %v7371_v43  ;;  %v10062_v32 = vand.u32 4294901760, %v7317_v44  ;;  %v10327_v43 = vand.u32 4294901760, %v7408_v5 }
  0x51   :  { %5876 = vmatpush3.bf16.msra.mxu0 %v5875_v58  ;;  %v7327_v58 = vld [vmem:[%s9999_s2 + $0x128] sm:$0xff] }
  0x52   :  { %5878 = vmatprep.subr.bf16.mxu0 %v5877_v63  ;;  %5912 = vmatpush3.bf16.msra.mxu1 %v10287_v59  ;;  %10299 = vst [vmem:[#allocation24_spill] sm:$0xff] %v7327_v58  ;;  %v10300_v63 = vld [vmem:[#allocation14_spill] sm:$0xff] }
  0x53   :  { %5914 = vmatprep.subr.bf16.mxu1 %v10290_v37  ;;  %10301 = vst [vmem:[#allocation14_spill] sm:$0xff] %v7345_v2 }
  0x55   :  { %5880 = vmatpush3.bf16.msra.mxu0 %v5879_v48  ;;  %v1310_v48 = vsub.f32 %v7265_v40, %v10055_v25  ;;  %v10061_v25 = vand.u32 4294901760, %v7345_v2 }
  0x56   :  { %5882 = vmatprep.subr.bf16.mxu0 %v5881_v62  ;;  %5916 = vmatpush3.bf16.msra.mxu1 %v10294_v6  ;;  %v10059_v62 = vand.u32 4294901760, %v7294_v33 }
  0x57   :  { %5918 = vmatprep.subr.bf16.mxu1 %v10295_v26 }
  0x58   :  { %v7380_v35 = vsub.f32 %v7294_v33, %v10059_v62  ;;  %v7432_v62 = vld [vmem:[%s9999_s2 + $0x1c0] sm:$0xff] }
  0x59   :  { %5884 = vmatpush3.bf16.msra.mxu0 %v5883_v49  ;;  %v7357_v49 = vsub.f32 %v7288_v23, %v10053_v36  ;;  %v7369_v36 = vpack.c.bf16 %v1127_v52, %v1124_v10  ;;  %v10063_v10 = vand.u32 4294901760, %v7333_v13  ;;  %v7623_v23 = vld [vmem:[%s9999_s2 + $0x170] sm:$0xff] }
  0x5a   :  { %5886 = vmatprep.subr.bf16.mxu0 %v5885_v3  ;;  %5920 = vmatpush3.bf16.msra.mxu1 %v10300_v63  ;;  %v10057_v3 = vand.u32 4294901760, %v7312_v38 }
  0x5b   :  { %5954 = vmatprep.subr.bf16.mxu1 %v6784_v14  ;;  %10304 = vst [vmem:[#allocation16_spill] sm:$0xff] %v7369_v36  ;;  %v1311_v14 = vand.u32 4294901760, %v1310_v48 }
  0x5c   :  { %v7403_v52 = vsub.f32 %v7312_v38, %v10057_v3  ;;  %v10311_v3 = vand.u32 4294901760, %v7302_v53 }
  0x5d   :  { %5888 = vmatpush3.bf16.msra.mxu0 %v5887_v34  ;;  %v171_v34 = vcombine.high %v10302_v41, %v10302_v41  ;;  %798 = vmatmul.mubr.f32.vlgmr.msra.gmra.mrb[2].mxu1 %v10303_v42  ;;  %v1304_v41 = vand.u32 4294901760, %v1303_v16  ;;  %v10310_v16 = vand.u32 4294901760, %v7327_v58 }
  0x5e   :  { %5922 = vmatprep.subr.bf16.mxu0 %v7124_v29  ;;  %v10060_v29 = vand.u32 4294901760, %v7322_v45  ;;  %5956 = vmatpush3.bf16.msra.mxu1 %v6794_v20  ;;  %v7398_v20 = vsub.f32 %v7307_v50, %v10058_v24  ;;  %v7427_v24 = vsub.f32 %v7302_v53, %v10311_v3  ;;  %v7588_v50 = vld [vmem:[%s9999_s2 + $0x168] sm:$0xff] }
  0x5f   :  { %5958 = vmatprep.subr.bf16.mxu1 %v6798_v22  ;;  %v10309_v22 = vld [vmem:[#allocation19_spill] sm:$0xff]  ;;  %v7422_v48 = vsub.f32 %v7327_v58, %v10310_v16  ;;  %v7443_v16 = vsub.f32 %v7317_v44, %v10062_v32  ;;  %v7459_v32 = vsub.f32 %v7333_v13, %v10063_v10  ;;  %v7483_v10 = vld [vmem:[%s9999_s2 + $0x148] sm:$0xff]  ;;  %v10326_v58 = vld [vmem:[#allocation20_spill] sm:$0xff] }
  0x60   :  { %690 = vmatmul.mubr.f32.vlgmr.msra.gmra.mrb[2].mxu0 %v7105_v28  ;;  %v7385_v28 = vld [vmem:[%s9999_s2 + $0x1b8] sm:$0xff]  ;;  %1068 = vmatprep.mubr.f32.mxu1 %v10309_v22  ;;  %v7417_v42 = vsub.f32 %v7322_v45, %v10060_v29  ;;  %10312 = vst [vmem:[#allocation19_spill] sm:$0xff] %v7432_v62  ;;  %v7438_v29 = vsub.f32 %v7345_v2, %v10061_v25  ;;  %10320 = vst [vmem:[#allocation34_spill] sm:$0xff] %v7483_v10 }
  0x61   :  { %5924 = vmatpush3.bf16.msra.mxu0 %v7130_v7  ;;  %10306 = vst [vmem:[#allocation26_spill] sm:$0xff] %v7385_v28  ;;  %v7391_v7 = vld [vmem:[%s9999_s2 + $0x130] sm:$0xff]  ;;  %964 = vmatprep.mubr.f32.mxu0 %v10309_v22  ;;  %v7453_v22 = vpack.c.bf16 %v1311_v14, %v1304_v41  ;;  %10314 = vst [vmem:[#allocation30_spill] sm:$0xff] %v7459_v32  ;;  %v10318_v14 = vand.u32 4294901760, %v7357_v49  ;;  %v10324_v25 = vand.u32 4294901760, %v7385_v28 }
  0x62   :  { %10307 = vst [vmem:[#allocation27_spill] sm:$0xff] %v7391_v7  ;;  %5926 = vmatprep.subr.bf16.mxu0 %v7136_v56  ;;  %v7449_v56 = vld [vmem:[%s9999_s2 + $0x1c8] sm:$0xff]  ;;  %5960 = vmatpush3.bf16.msra.mxu1 %v6811_v27  ;;  %v10316_v27 = vand.u32 4294901760, %v7352_v4 }
  0x63   :  { %10313 = vst [vmem:[#allocation29_spill] sm:$0xff] %v7449_v56  ;;  %5962 = vmatprep.subr.bf16.mxu1 %v6826_v39  ;;  %v7477_v41 = vsub.f32 %v7357_v49, %v10318_v14  ;;  %v7495_v14 = vld [vmem:[%s9999_s2 + $0x1d0] sm:$0xff]  ;;  %v7500_v45 = vsub.f32 %v7385_v28, %v10324_v25  ;;  %v10325_v39 = vand.u32 4294901760, %v7391_v7  ;;  %v7515_v25 = vsub.f32 %v7408_v5, %v10327_v43  ;;  %v7568_v28 = vld [vmem:[%s9999_s2 + $0x1e8] sm:$0xff] }
  0x64   :  { %10323 = vst [vmem:[#allocation36_spill] sm:$0xff] %v7495_v14  ;;  %v10329_v43 = vand.u32 4294901760, %v7432_v62  ;;  %10336 = vst [vmem:[#allocation38_spill] sm:$0xff] %v7568_v28  ;;  %v10343_v32 = vand.u32 4294901760, %v7495_v14 }
  0x65   :  { %5928 = vmatpush3.bf16.msra.mxu0 %v7142_v60  ;;  %v7472_v60 = vsub.f32 %v7352_v4, %v10316_v27  ;;  %10319 = vst [vmem:[#allocation33_spill] sm:$0xff] %v7477_v41  ;;  %v7506_v27 = vsub.f32 %v7391_v7, %v10325_v39  ;;  %v7521_v39 = vld [vmem:[%s9999_s2 + $0x1d8] sm:$0xff]  ;;  %v7538_v7 = vld [vmem:[%s9999_s2 + $0x150] sm:$0xff] }
  0x66   :  { %5930 = vmatprep.subr.bf16.mxu0 %v7148_v54  ;;  %v10321_v54 = vld [vmem:[#allocation17_spill] sm:$0xff]  ;;  %5964 = vmatpush3.bf16.msra.mxu1 %v6839_v47  ;;  %10330 = vst [vmem:[#allocation20_spill] sm:$0xff] %v7538_v7  ;;  %v10334_v47 = vand.u32 4294901760, %v7398_v20  ;;  %v10347_v8 = vand.u32 4294901760, %v7538_v7 }
  0x67   :  { %10317 = vst [vmem:[#allocation32_spill] sm:$0xff] %v7472_v60  ;;  %v7486_v3 = vrot.slane %v171_v34, %v10321_v54  ;;  %5966 = vmatprep.subr.bf16.mxu1 %v6867_v0  ;;  %v7532_v34 = vsub.f32 %v7432_v62, %v10329_v43  ;;  %v7543_v0 = vld [vmem:[%s9999_s2 + $0x158] sm:$0xff]  ;;  %v10333_v43 = vand.u32 4294901760, %v7449_v56  ;;  %v10335_v62 = vand.u32 4294901760, %v7403_v52 }
  0x68   :  { %v7558_v5 = vsub.f32 %v7398_v20, %v10334_v47  ;;  %v10339_v47 = vand.u32 4294901760, %v7465_v61  ;;  %v10342_v60 = vand.u32 4294901760, %v7483_v10 }
  0x69   :  { %10322 = vst [vmem:[#allocation35_spill] sm:$0xff] %v7486_v3  ;;  %5932 = vmatpush3.bf16.msra.mxu0 %v10326_v58  ;;  %v187_v2 = vcombine.high %v7486_v3, %v7486_v3  ;;  %v10328_v58 = vld [vmem:[#allocation21_spill] sm:$0xff]  ;;  %v7553_v54 = vsub.f32 %v7449_v56, %v10333_v43  ;;  %v7563_v3 = vsub.f32 %v7403_v52, %v10335_v62  ;;  %v10341_v62 = vld [vmem:[#allocation22_spill] sm:$0xff] }
  0x6a   :  { %5934 = vmatprep.subr.bf16.mxu0 %v10328_v58  ;;  %10331 = vst [vmem:[#allocation21_spill] sm:$0xff] %v7543_v0  ;;  %v7548_v58 = vld [vmem:[%s9999_s2 + $0x1e0] sm:$0xff]  ;;  %v7580_v41 = vsub.f32 %v7465_v61, %v10339_v47  ;;  %v7598_v47 = vld [vmem:[%s9999_s2 + $0x1f8] sm:$0xff]  ;;  %5968 = vmatpush3.bf16.msra.mxu1 %v6892_v18  ;;  %v7605_v38 = vsub.f32 %v7483_v10, %v10342_v60  ;;  %v10346_v10 = vand.u32 4294901760, %v7521_v39 }
  0x6b   :  { %10332 = vst [vmem:[#allocation37_spill] sm:$0xff] %v7548_v58  ;;  %v7573_v43 = vld [vmem:[%s9999_s2 + $0x160] sm:$0xff]  ;;  %v7575_v56 = vand.u32 4294901760, %v187_v2  ;;  %5970 = vmatprep.subr.bf16.mxu1 %v6908_v51  ;;  %v10349_v61 = vand.u32 4294901760, %v7548_v58  ;;  %v10353_v51 = vand.u32 4294901760, %v7588_v50 }
  0x6c   :  { %10337 = vst [vmem:[#allocation39_spill] sm:$0xff] %v7573_v43  ;;  %v7639_v60 = vsub.f32 %v7521_v39, %v10346_v10 }
  0x6d   :  { %10338 = vst [vmem:[#allocation40_spill] sm:$0xff] %v7575_v56  ;;  %5936 = vmatpush3.bf16.msra.mxu0 %v10341_v62  ;;  %v7615_v62 = vsub.f32 %v7495_v14, %v10343_v32  ;;  %v7631_v32 = vld [vmem:[%s9999_s2 + $0x178] sm:$0xff]  ;;  %v7634_v18 = vsub.f32 %v187_v2, %v7575_v56  ;;  %v7649_v2 = vsub.f32 %v7538_v7, %v10347_v8  ;;  %v10348_v14 = vand.u32 4294901760, %v7543_v0 }
  0x6e   :  { %5938 = vmatprep.subr.bf16.mxu0 %v7173_v21  ;;  %10344 = vst [vmem:[#allocation22_spill] sm:$0xff] %v7631_v32  ;;  %5972 = vmatpush3.bf16.msra.mxu1 %v6934_v17  ;;  %v7659_v21 = vsub.f32 %v7548_v58, %v10349_v61  ;;  %v10351_v17 = vand.u32 4294901760, %v7568_v28  ;;  %v10361_v61 = vand.u32 4294901760, %v7262_v57 }
  0x6f   :  { %10345 = vst [vmem:[#allocation42_spill] sm:$0xff] %v7634_v18  ;;  %v7654_v10 = vsub.f32 %v7543_v0, %v10348_v14  ;;  %5974 = vmatprep.subr.bf16.mxu1 %v6950_v1  ;;  %v10352_v14 = vand.u32 4294901760, %v7573_v43  ;;  %v10354_v1 = vand.u32 4294901760, %v7593_v55 }
  0x70   :  { %v7667_v8 = vsub.f32 %v7568_v28, %v10351_v17  ;;  %v10356_v17 = vand.u32 4294901760, %v7598_v47  ;;  %v10360_v28 = vand.u32 4294901760, %v7634_v18 }
  0x71   :  { %5940 = vmatpush3.bf16.msra.mxu0 %v7179_v30  ;;  %v10350_v30 = vld [vmem:[#allocation23_spill] sm:$0xff]  ;;  %v7673_v0 = vsub.f32 %v7573_v43, %v10352_v14  ;;  %v7684_v58 = vsub.f32 %v7593_v55, %v10354_v1  ;;  %v10357_v55 = vand.u32 4294901760, %v7623_v23  ;;  %v10364_v1 = vand.u32 4294901760, %v7294_v33 }
  0x72   :  { %5942 = vmatprep.subr.bf16.mxu0 %v10350_v30  ;;  %v7679_v30 = vsub.f32 %v7588_v50, %v10353_v51  ;;  %v7689_v7 = vsub.f32 %v7598_v47, %v10356_v17  ;;  %5976 = vmatpush3.bf16.msra.mxu1 %v10287_v59  ;;  %v10359_v51 = vand.u32 4294901760, %v7631_v32  ;;  %v1174_v14 = vsub.f32 %v7634_v18, %v10360_v28 }
  0x73   :  { %10355 = vst [vmem:[#allocation23_spill] sm:$0xff] %v7684_v58  ;;  %v7702_v17 = vsub.f32 %v7623_v23, %v10357_v55  ;;  %5978 = vmatprep.subr.bf16.mxu1 %v10290_v37  ;;  %v10365_v55 = vand.u32 4294901760, %v7302_v53  ;;  %v10367_v28 = vand.u32 4294901760, %v7317_v44  ;;  %v10368_v43 = vand.u32 4294901760, %v7333_v13 }
  0x74   :  { %v10370_v37 = vand.u32 4294901760, %v7352_v4 }
  0x75   :  { %5944 = vmatpush3.bf16.msra.mxu0 %v7191_v31  ;;  %10358 = vst [vmem:[#allocation43_spill] sm:$0xff] %v7702_v17  ;;  %v7711_v31 = vsub.f32 %v7631_v32, %v10359_v51  ;;  %v10362_v51 = vand.u32 4294901760, %v7265_v40  ;;  %v7732_v59 = vpack.c.bf16 %v10365_v55, %v10364_v1  ;;  %v7738_v18 = vpack.c.bf16 %v10368_v43, %v10367_v28 }
  0x76   :  { %5946 = vmatprep.subr.bf16.mxu0 %v7197_v15  ;;  %v10371_v15 = vand.u32 4294901760, %v7357_v49  ;;  %5980 = vmatpush3.bf16.msra.mxu1 %v10294_v6  ;;  %v10373_v1 = vand.u32 4294901760, %v7398_v20  ;;  %v10374_v55 = vand.u32 4294901760, %v7403_v52  ;;  %v10376_v43 = vand.u32 4294901760, %v7417_v42 }
  0x77   :  { %v7726_v32 = vpack.c.bf16 %v10362_v51, %v10361_v61  ;;  %10366 = vst [vmem:[#allocation45_spill] sm:$0xff] %v7732_v59  ;;  %10369 = vst [vmem:[#allocation46_spill] sm:$0xff] %v7738_v18  ;;  %v10377_v28 = vand.u32 4294901760, %v7422_v48  ;;  %5982 = vmatprep.subr.bf16.mxu1 %v10295_v26  ;;  %v10391_v26 = vand.u32 4294901760, %v7615_v62  ;;  %v10392_v6 = vand.u32 4294901760, %v7639_v60 }
  0x78   :  { %v7744_v57 = vpack.c.bf16 %v10371_v15, %v10370_v37  ;;  %v7753_v51 = vpack.c.bf16 %v10374_v55, %v10373_v1  ;;  %v10379_v15 = vand.u32 4294901760, %v7438_v29  ;;  %v10382_v1 = vand.u32 4294901760, %v7506_v27 }
  0x79   :  { %10363 = vst [vmem:[#allocation44_spill] sm:$0xff] %v7726_v32  ;;  %5948 = vmatpush3.bf16.msra.mxu0 %v7204_v19  ;;  %v7759_v18 = vpack.c.bf16 %v10377_v28, %v10376_v43  ;;  %v10380_v19 = vand.u32 4294901760, %v7500_v45  ;;  %v10383_v55 = vand.u32 4294901760, %v7515_v25  ;;  %v10385_v43 = vand.u32 4294901760, %v7532_v34 }
  0x7a   :  { %10372 = vst [vmem:[#allocation47_spill] sm:$0xff] %v7744_v57  ;;  %10375 = vst [vmem:[#allocation48_spill] sm:$0xff] %v7753_v51  ;;  %5950 = vmatprep.subr.bf16.mxu0 %v7206_v12  ;;  %v10386_v28 = vand.u32 4294901760, %v7553_v54  ;;  %v10389_v12 = vand.u32 4294901760, %v7605_v38  ;;  %5984 = vmatpush3.bf16.msra.mxu1 %v10300_v63  ;;  %v10419_v63 = vand.u32 4294901760, %v7438_v29  ;;  %v10432_v51 = vld [vmem:[#allocation32_spill] sm:$0xff] }
  0x7b   :  { %10378 = vst [vmem:[#allocation49_spill] sm:$0xff] %v7759_v18  ;;  %v7765_v37 = vpack.c.bf16 %v10380_v19, %v10379_v15  ;;  %v7774_v61 = vpack.c.bf16 %v10383_v55, %v10382_v1  ;;  %v10388_v15 = vand.u32 4294901760, %v7580_v41  ;;  %v10394_v1 = vand.u32 4294901760, %v7649_v2  ;;  %6018 = vmatprep.subr.bf16.mxu1 %v7453_v22 }
  0x7c   :  { %v7780_v18 = vpack.c.bf16 %v10386_v28, %v10385_v43  ;;  %v10395_v55 = vand.u32 4294901760, %v7654_v10  ;;  %v10397_v43 = vand.u32 4294901760, %v7659_v21  ;;  %v10398_v28 = vand.u32 4294901760, %v7667_v8 }
  0x7d   :  { %10381 = vst [vmem:[#allocation50_spill] sm:$0xff] %v7765_v37  ;;  %10384 = vst [vmem:[#allocation51_spill] sm:$0xff] %v7774_v61  ;;  %v7786_v19 = vpack.c.bf16 %v10389_v12, %v10388_v15  ;;  %v7792_v37 = vpack.c.bf16 %v10392_v6, %v10391_v26  ;;  %v10400_v15 = vand.u32 4294901760, %v7673_v0  ;;  %v10401_v12 = vand.u32 4294901760, %v7679_v30  ;;  %5952 = vmatpush3.bf16.msra.mxu0 %v7208_v46 }
  0x7e   :  { %10387 = vst [vmem:[#allocation52_spill] sm:$0xff] %v7780_v18  ;;  %v7798_v61 = vpack.c.bf16 %v10395_v55, %v10394_v1  ;;  %v7804_v18 = vpack.c.bf16 %v10398_v28, %v10397_v43  ;;  %v10403_v6 = vand.u32 4294901760, %v7417_v42  ;;  %v10405_v55 = vand.u32 4294901760, %v7684_v58  ;;  %5986 = vmatprep.subr.bf16.mxu0 %v7369_v36 }
  0x7f   :  { %10390 = vst [vmem:[#allocation53_spill] sm:$0xff] %v7786_v19  ;;  %10393 = vst [vmem:[#allocation54_spill] sm:$0xff] %v7792_v37  ;;  %v7810_v19 = vpack.c.bf16 %v10401_v12, %v10400_v15  ;;  %v10404_v37 = vand.u32 4294901760, %v7422_v48  ;;  %v10408_v28 = vand.u32 4294901760, %v7702_v17  ;;  %v10411_v12 = vand.u32 4294901760, %v7270_v9  ;;  %v10417_v9 = vld [vmem:[#allocation30_spill] sm:$0xff] }
  0x80   :  { %10396 = vst [vmem:[#allocation55_spill] sm:$0xff] %v7798_v61  ;;  %10399 = vst [vmem:[#allocation56_spill] sm:$0xff] %v7804_v18  ;;  %v1219_v26 = vsub.f32 %v7417_v42, %v10403_v6  ;;  %v10406_v61 = vand.u32 4294901760, %v7689_v7  ;;  %v10409_v18 = vand.u32 4294901760, %v7711_v31  ;;  %v10412_v6 = vand.u32 4294901760, %v7278_v11 }
  0x81   :  { %10402 = vst [vmem:[#allocation57_spill] sm:$0xff] %v7810_v19  ;;  %v1226_v1 = vsub.f32 %v7422_v48, %v10404_v37  ;;  %v10414_v37 = vand.u32 4294901760, %v7380_v35  ;;  %v10416_v46 = vand.u32 4294901760, %v7443_v16  ;;  %v10418_v11 = vand.u32 4294901760, %v10417_v9  ;;  %v10427_v16 = vld [vmem:[#allocation15_spill] sm:$0xff] }
  0x82   :  { %v7822_v43 = vpack.c.bf16 %v10406_v61, %v10405_v55  ;;  %v7828_v15 = vpack.c.bf16 %v10409_v18, %v10408_v28  ;;  %v7835_v19 = vpack.c.bf16 %v10412_v6, %v10411_v12  ;;  %v10415_v61 = vand.u32 4294901760, %v7427_v24  ;;  %v10429_v9 = vld [vmem:[#allocation11_spill] sm:$0xff] }
  0x83   :  { %v1339_v18 = vand.u32 4294901760, %v7563_v3  ;;  %v6021_v28 = vpack.c.bf16 %v10418_v11, %v10416_v46  ;;  %v1345_v35 = vsub.f32 %v7438_v29, %v10419_v63  ;;  %v10420_v24 = vand.u32 4294901760, %v7500_v45  ;;  %v10423_v3 = vld [vmem:[#allocation10_spill] sm:$0xff] }
  0x84   :  { %10407 = vst [vmem:[#allocation58_spill] sm:$0xff] %v7822_v43  ;;  %10410 = vst [vmem:[#allocation59_spill] sm:$0xff] %v7828_v15  ;;  %v6019_v55 = vpack.c.bf16 %v10415_v61, %v10414_v37  ;;  %v1332_v43 = vand.u32 4294901760, %v7558_v5  ;;  %v10421_v5 = vld [vmem:[#allocation13_spill] sm:$0xff]  ;;  %v10424_v37 = vand.u32 4294901760, %v10423_v3  ;;  %v1175_v22 = vand.u32 4294901760, %v1174_v14 }
  0x85   :  { %10413 = vst [vmem:[#allocation60_spill] sm:$0xff] %v7835_v19  ;;  %v1352_v12 = vsub.f32 %v7500_v45, %v10420_v24  ;;  %v10422_v6 = vand.u32 4294901760, %v10421_v5  ;;  %v10426_v15 = vld [vmem:[#allocation18_spill] sm:$0xff]  ;;  %v10428_v46 = vand.u32 4294901760, %v10427_v16  ;;  %v10430_v11 = vand.u32 4294901760, %v10429_v9  ;;  %v10434_v24 = vld [vmem:[#allocation33_spill] sm:$0xff] }
  0x86   :  { %966 = vmatmul.mubr.f32.vlgmr.msra.gmra.mrb[4].mxu0 %v10426_v15  ;;  %1070 = vmatmul.mubr.f32.vlgmr.msra.gmra.mrb[4].mxu1 %v10426_v15  ;;  %v10433_v57 = vand.u32 4294901760, %v10432_v51  ;;  %v10435_v59 = vand.u32 4294901760, %v10434_v24  ;;  %v1220_v32 = vand.u32 4294901760, %v1219_v26  ;;  %v1227_v3 = vand.u32 4294901760, %v1226_v1 }
  0x87   :  { %v7860_v61 = vpack.c.bf16 %v10424_v37, %v10422_v6  ;;  %v7868_v63 = vpack.c.bf16 %v10430_v11, %v10428_v46  ;;  %v10436_v6 = vld [vmem:[#allocation25_spill] sm:$0xff]  ;;  %6020 = vmatpush3.bf16.msra.mxu1 %v6019_v55  ;;  %v6025_v14 = vpack.c.bf16 %v1339_v18, %v1332_v43  ;;  %v10437_v37 = vand.u32 4294901760, %v7506_v27  ;;  %1176 = vmatprep.mubr.f32.mxu0 %v1175_v22  ;;  %v10442_v18 = vld [vmem:[#allocation12_spill] sm:$0xff] }
  0x88   :  { %v6023_v5 = vpack.c.bf16 %v10435_v59, %v10433_v57  ;;  %5988 = vmatpush3.bf16.msra.mxu0 %v10436_v6  ;;  %v10438_v16 = vand.u32 4294901760, %v7515_v25  ;;  %6022 = vmatprep.subr.bf16.mxu1 %v6021_v28  ;;  %v1346_v51 = vand.u32 4294901760, %v1345_v35  ;;  %v1353_v9 = vand.u32 4294901760, %v1352_v12  ;;  %v10444_v28 = vld [vmem:[#allocation24_spill] sm:$0xff] }
  0x89   :  { %10425 = vst [vmem:[#allocation30_spill] sm:$0xff] %v7860_v61  ;;  %10431 = vst [vmem:[#allocation13_spill] sm:$0xff] %v7868_v63  ;;  %v1233_v15 = vsub.f32 %v7506_v27, %v10437_v37  ;;  %5990 = vmatprep.subr.bf16.mxu0 %v7835_v19  ;;  %v10439_v57 = vand.u32 4294901760, %v7532_v34  ;;  %v10440_v26 = vand.u32 4294901760, %v7553_v54  ;;  %v10441_v43 = vand.u32 4294901760, %v7580_v41  ;;  %1412 = vmatprep.mubr.f32.mxu1 %v7575_v56  ;;  %v10455_v56 = vld [vmem:[#allocation27_spill] sm:$0xff] }
  0x8a   :  { %v1240_v46 = vsub.f32 %v7515_v25, %v10438_v16  ;;  %v10443_v11 = vand.u32 4294901760, %v10442_v18  ;;  %v10445_v35 = vand.u32 4294901760, %v10444_v28  ;;  %v6027_v24 = vpack.c.bf16 %v1227_v3, %v1220_v32  ;;  %v10450_v32 = vld [vmem:[#allocation14_spill] sm:$0xff]  ;;  %v10457_v19 = vld [vmem:[#allocation28_spill] sm:$0xff] }
  0x8b   :  { %v1359_v59 = vsub.f32 %v7532_v34, %v10439_v57  ;;  %v1366_v1 = vsub.f32 %v7553_v54, %v10440_v26  ;;  %v1247_v55 = vsub.f32 %v7580_v41, %v10441_v43  ;;  %v10447_v37 = vand.u32 4294901760, %v7605_v38  ;;  %6024 = vmatpush3.bf16.msra.mxu1 %v6023_v5 }
  0x8c   :  { %v7896_v12 = vpack.c.bf16 %v10445_v35, %v10443_v11  ;;  %5992 = vmatpush3.bf16.msra.mxu0 %v7860_v61  ;;  %v1234_v57 = vand.u32 4294901760, %v1233_v15  ;;  %v1241_v26 = vand.u32 4294901760, %v1240_v46  ;;  %v10448_v22 = vand.u32 4294901760, %v7615_v62  ;;  %v10452_v11 = vld [vmem:[#allocation26_spill] sm:$0xff]  ;;  %6026 = vmatprep.subr.bf16.mxu1 %v6025_v14  ;;  %v10461_v14 = vld [vmem:[#allocation35_spill] sm:$0xff] }
  0x8d   :  { %v1254_v16 = vsub.f32 %v7605_v38, %v10447_v37  ;;  %v10449_v18 = vand.u32 4294901760, %v7639_v60  ;;  %5994 = vmatprep.subr.bf16.mxu0 %v7868_v63  ;;  %v10451_v3 = vand.u32 4294901760, %v10450_v32  ;;  %v10453_v35 = vand.u32 4294901760, %v10452_v11 }
  0x8e   :  { %10446 = vst [vmem:[#allocation10_spill] sm:$0xff] %v7896_v12  ;;  %v1373_v43 = vsub.f32 %v7615_v62, %v10448_v22  ;;  %v6029_v5 = vpack.c.bf16 %v1353_v9, %v1346_v51  ;;  %v1360_v15 = vand.u32 4294901760, %v1359_v59  ;;  %v1367_v46 = vand.u32 4294901760, %v1366_v1 }
  0x8f   :  { %v1380_v28 = vsub.f32 %v7639_v60, %v10449_v18  ;;  %v7913_v37 = vpack.c.bf16 %v10453_v35, %v10451_v3  ;;  %v10456_v61 = vand.u32 4294901760, %v10455_v56  ;;  %v10458_v22 = vand.u32 4294901760, %v10457_v19  ;;  %v10463_v56 = vld [vmem:[#allocation19_spill] sm:$0xff]  ;;  %v10465_v19 = vld [vmem:[#allocation29_spill] sm:$0xff]  ;;  %6028 = vmatpush3.bf16.msra.mxu1 %v6027_v24 }
  0x90   :  { %v1248_v36 = vand.u32 4294901760, %v1247_v55  ;;  %v1255_v18 = vand.u32 4294901760, %v1254_v16  ;;  %v10459_v63 = vand.u32 4294901760, %v7649_v2  ;;  %v10460_v11 = vand.u32 4294901760, %v7654_v10  ;;  %5996 = vmatpush3.bf16.msra.mxu0 %v7896_v12  ;;  %6030 = vmatprep.subr.bf16.mxu1 %v6029_v5  ;;  %v10469_v12 = vld [vmem:[#allocation31_spill] sm:$0xff] }
  0x91   :  { %10454 = vst [vmem:[#allocation18_spill] sm:$0xff] %v7913_v37  ;;  %v7919_v6 = vpack.c.bf16 %v10458_v22, %v10456_v61  ;;  %v7928_v51 = vand.u32 4294901760, %v10461_v14  ;;  %v10464_v9 = vand.u32 4294901760, %v10463_v56  ;;  %v10466_v61 = vand.u32 4294901760, %v10465_v19  ;;  %5998 = vmatprep.subr.bf16.mxu0 %v7913_v37 }
  0x92   :  { %v1261_v32 = vsub.f32 %v7649_v2, %v10459_v63  ;;  %v1268_v3 = vsub.f32 %v7654_v10, %v10460_v11  ;;  %v6031_v1 = vpack.c.bf16 %v1241_v26, %v1234_v57  ;;  %v1374_v55 = vand.u32 4294901760, %v1373_v43  ;;  %v10473_v57 = vld [vmem:[#allocation36_spill] sm:$0xff] }
  0x93   :  { %10462 = vst [vmem:[#allocation15_spill] sm:$0xff] %v7928_v51  ;;  %v7935_v59 = vpack.c.bf16 %v10466_v61, %v10464_v9  ;;  %v1381_v16 = vand.u32 4294901760, %v1380_v28  ;;  %v6033_v63 = vpack.c.bf16 %v1367_v46, %v1360_v15  ;;  %v10467_v35 = vand.u32 4294901760, %v7659_v21  ;;  %v10471_v9 = vld [vmem:[#allocation34_spill] sm:$0xff] }
  0x94   :  { %v10468_v11 = vand.u32 4294901760, %v7667_v8  ;;  %v10470_v19 = vand.u32 4294901760, %v10469_v12  ;;  %v10472_v61 = vand.u32 4294901760, %v10471_v9  ;;  %v10474_v26 = vand.u32 4294901760, %v10473_v57  ;;  %6000 = vmatpush3.bf16.msra.mxu0 %v7919_v6  ;;  %6032 = vmatpush3.bf16.msra.mxu1 %v6031_v1 }
  0x95   :  { %v1387_v22 = vsub.f32 %v7659_v21, %v10467_v35  ;;  %v10475_v43 = vand.u32 4294901760, %v7521_v39  ;;  %v6035_v5 = vpack.c.bf16 %v1255_v18, %v1248_v36  ;;  %v1262_v15 = vand.u32 4294901760, %v1261_v32  ;;  %6002 = vmatprep.subr.bf16.mxu0 %v7935_v59  ;;  %6034 = vmatprep.subr.bf16.mxu1 %v6033_v63 }
  0x96   :  { %v1394_v56 = vsub.f32 %v7667_v8, %v10468_v11  ;;  %v7948_v24 = vpack.c.bf16 %v10472_v61, %v10470_v19  ;;  %v1269_v46 = vand.u32 4294901760, %v1268_v3  ;;  %v7958_v35 = vsub.f32 %v10461_v14, %v7928_v51  ;;  %v10483_v61 = vld [vmem:[#allocation21_spill] sm:$0xff] }
  0x97   :  { %v7954_v28 = vpack.c.bf16 %v10475_v43, %v10474_v26  ;;  %v6037_v12 = vpack.c.bf16 %v1381_v16, %v1374_v55  ;;  %v10477_v11 = vand.u32 4294901760, %v7673_v0  ;;  %v10478_v9 = vand.u32 4294901760, %v7679_v30  ;;  %v10481_v55 = vld [vmem:[#allocation20_spill] sm:$0xff] }
  0x98   :  { %10476 = vst [vmem:[#allocation11_spill] sm:$0xff] %v7958_v35  ;;  %v1388_v36 = vand.u32 4294901760, %v1387_v22  ;;  %v1395_v18 = vand.u32 4294901760, %v1394_v56  ;;  %v10479_v32 = vand.u32 4294901760, %v7684_v58  ;;  %v10480_v14 = vand.u32 4294901760, %v7689_v7  ;;  %6004 = vmatpush3.bf16.msra.mxu0 %v7948_v24  ;;  %6036 = vmatpush3.bf16.msra.mxu1 %v6035_v5 }
  0x99   :  { %v1275_v19 = vsub.f32 %v7673_v0, %v10477_v11  ;;  %v1282_v39 = vsub.f32 %v7679_v30, %v10478_v9  ;;  %v10482_v16 = vand.u32 4294901760, %v10481_v55  ;;  %v10484_v57 = vand.u32 4294901760, %v10483_v61  ;;  %6006 = vmatprep.subr.bf16.mxu0 %v7954_v28  ;;  %v10487_v55 = vld [vmem:[#allocation37_spill] sm:$0xff]  ;;  %6038 = vmatprep.subr.bf16.mxu1 %v6037_v12 }
  0x9a   :  { %v1401_v3 = vsub.f32 %v7684_v58, %v10479_v32  ;;  %v1408_v1 = vsub.f32 %v7689_v7, %v10480_v14  ;;  %v6039_v43 = vpack.c.bf16 %v1269_v46, %v1262_v15  ;;  %v10485_v56 = vand.u32 4294901760, %v7702_v17  ;;  %v10489_v15 = vld [vmem:[#allocation38_spill] sm:$0xff]  ;;  %v10495_v12 = vld [vmem:[#allocation41_spill] sm:$0xff] }
  0x9b   :  { %v7978_v26 = vpack.c.bf16 %v10484_v57, %v10482_v16  ;;  %v1276_v63 = vand.u32 4294901760, %v1275_v19  ;;  %v1283_v22 = vand.u32 4294901760, %v1282_v39  ;;  %v10486_v32 = vand.u32 4294901760, %v7711_v31  ;;  %v10491_v57 = vld [vmem:[#allocation39_spill] sm:$0xff] }
  0x9c   :  { %v1289_v9 = vsub.f32 %v7702_v17, %v10485_v56  ;;  %v10488_v16 = vand.u32 4294901760, %v10487_v55  ;;  %v10490_v46 = vand.u32 4294901760, %v10489_v15  ;;  %v6041_v5 = vpack.c.bf16 %v1395_v18, %v1388_v36  ;;  %6040 = vmatpush3.bf16.msra.mxu1 %v6039_v43  ;;  %v8020_v43 = vld [vmem:[%s9999_s2 + $0x288] sm:$0xff] }
  0x9d   :  { %v1296_v14 = vsub.f32 %v7711_v31, %v10486_v32  ;;  %v1402_v19 = vand.u32 4294901760, %v1401_v3  ;;  %v1409_v39 = vand.u32 4294901760, %v1408_v1  ;;  %v10492_v11 = vand.u32 4294901760, %v10491_v57  ;;  %6008 = vmatpush3.bf16.msra.mxu0 %v7978_v26  ;;  %v8015_v1 = vld [vmem:[%s9999_s2 + $0x280] sm:$0xff]  ;;  %10500 = vst [vmem:[#allocation12_spill] sm:$0xff] %v8020_v43 }
  0x9e   :  { %v7993_v61 = vpack.c.bf16 %v10490_v46, %v10488_v16  ;;  %v10493_v56 = vand.u32 4294901760, %v7588_v50  ;;  %v10494_v32 = vand.u32 4294901760, %v7958_v35  ;;  %v6043_v15 = vpack.c.bf16 %v1283_v22, %v1276_v63  ;;  %6042 = vmatprep.subr.bf16.mxu1 %v6041_v5  ;;  %10499 = vst [vmem:[#allocation33_spill] sm:$0xff] %v8015_v1  ;;  %v10502_v63 = vld [vmem:[#allocation22_spill] sm:$0xff] }
  0x9f   :  { %v1290_v16 = vand.u32 4294901760, %v1289_v9  ;;  %v1297_v46 = vand.u32 4294901760, %v1296_v14  ;;  %v10496_v36 = vand.u32 4294901760, %v10495_v12  ;;  %v10497_v18 = vand.u32 4294901760, %v7598_v47  ;;  %v10505_v47 = vld [vmem:[#allocation9_spill] sm:$0xff]  ;;  %v8069_v12 = vld [vmem:[%s9999_s2 + $0x210] sm:$0xff] }
  0xa0   :  { %v7999_v17 = vpack.c.bf16 %v10493_v56, %v10492_v11  ;;  %v1180_v55 = vsub.f32 %v7958_v35, %v10494_v32  ;;  %6010 = vmatprep.subr.bf16.mxu0 %v7993_v61  ;;  %v6045_v50 = vpack.c.bf16 %v1409_v39, %v1402_v19  ;;  %v10501_v11 = vand.u32 4294901760, %v7623_v23  ;;  %v8037_v39 = vld [vmem:[%s9999_s2 + $0x200] sm:$0xff]  ;;  %v8042_v23 = vld [vmem:[%s9999_s2 + $0x208] sm:$0xff]  ;;  %6044 = vmatpush3.bf16.msra.mxu1 %v6043_v15  ;;  %v8051_v56 = vld [vmem:[%s9999_s2 + $0x290] sm:$0xff] }
  0xa1   :  { %v8010_v3 = vpack.c.bf16 %v10497_v18, %v10496_v36  ;;  %v10503_v22 = vand.u32 4294901760, %v10502_v63  ;;  %v6049_v14 = vpack.c.bf16 %v7265_v40, %v10505_v47  ;;  %v6051_v5 = vpack.c.bf16 %v7302_v53, %v7294_v33  ;;  %10506 = vst [vmem:[#allocation14_spill] sm:$0xff] %v8037_v39  ;;  %10507 = vst [vmem:[#allocation26_spill] sm:$0xff] %v8042_v23  ;;  %v8074_v36 = vld [vmem:[%s9999_s2 + $0x218] sm:$0xff]  ;;  %v8090_v47 = vld [vmem:[%s9999_s2 + $0x2a8] sm:$0xff] }
  0xa2   :  { %6012 = vmatpush3.bf16.msra.mxu0 %v7999_v17  ;;  %v1181_v57 = vand.u32 4294901760, %v1180_v55  ;;  %v6047_v40 = vpack.c.bf16 %v1297_v46, %v1290_v16  ;;  %v10110_v53 = vand.u32 4294901760, %v8015_v1  ;;  %10508 = vst [vmem:[#allocation27_spill] sm:$0xff] %v8051_v56  ;;  %6046 = vmatprep.subr.bf16.mxu1 %v6045_v50  ;;  %v10112_v16 = vand.u32 4294901760, %v8020_v43  ;;  %v8064_v46 = vld [vmem:[%s9999_s2 + $0x298] sm:$0xff]  ;;  %10510 = vst [vmem:[#allocation35_spill] sm:$0xff] %v8069_v12 }
  0xa3   :  { %10498 = vst [vmem:[#allocation32_spill] sm:$0xff] %v8010_v3  ;;  %v8026_v9 = vpack.c.bf16 %v10503_v22, %v10501_v11  ;;  %6014 = vmatprep.subr.bf16.mxu0 %v8010_v3  ;;  %10509 = vst [vmem:[#allocation28_spill] sm:$0xff] %v8064_v46  ;;  %v10113_v11 = vand.u32 4294901760, %v8037_v39  ;;  %v8085_v22 = vld [vmem:[%s9999_s2 + $0x2a0] sm:$0xff]  ;;  %v10518_v19 = vand.u32 4294901760, %v8042_v23  ;;  %v8150_v55 = vld [vmem:[%s9999_s2 + $0x2b8] sm:$0xff] }
  0xa4   :  { %10511 = vst [vmem:[#allocation19_spill] sm:$0xff] %v8074_v36  ;;  %10512 = vst [vmem:[#allocation29_spill] sm:$0xff] %v8085_v22  ;;  %6048 = vmatpush3.bf16.msra.mxu1 %v6047_v40  ;;  %v8103_v32 = vsub.f32 %v8015_v1, %v10110_v53  ;;  %v8111_v15 = vld [vmem:[%s9999_s2 + $0x220] sm:$0xff]  ;;  %v8116_v40 = vld [vmem:[%s9999_s2 + $0x228] sm:$0xff]  ;;  %v8129_v18 = vsub.f32 %v8020_v43, %v10112_v16 }
  0xa5   :  { %10504 = vst [vmem:[#allocation24_spill] sm:$0xff] %v8026_v9  ;;  %10513 = vst [vmem:[#allocation31_spill] sm:$0xff] %v8090_v47  ;;  %v8121_v53 = vld [vmem:[%s9999_s2 + $0x2b0] sm:$0xff]  ;;  %v10517_v50 = vld [vmem:[#allocation16_spill] sm:$0xff]  ;;  %v8140_v1 = vsub.f32 %v8037_v39, %v10113_v11  ;;  %v8145_v16 = vsub.f32 %v8042_v23, %v10518_v19  ;;  %v10525_v19 = vand.u32 4294901760, %v8064_v46  ;;  %v10528_v39 = vand.u32 4294901760, %v8074_v36 }
  0xa6   :  { %6016 = vmatpush3.bf16.msra.mxu0 %v8026_v9  ;;  %10514 = vst [vmem:[#allocation34_spill] sm:$0xff] %v8111_v15  ;;  %10515 = vst [vmem:[#allocation36_spill] sm:$0xff] %v8116_v40  ;;  %6082 = vmatprep.subr.bf16.mxu1 %v10517_v50  ;;  %v8164_v23 = vld [vmem:[%s9999_s2 + $0x230] sm:$0xff]  ;;  %v10524_v11 = vld [vmem:[#allocation25_spill] sm:$0xff]  ;;  %v10542_v50 = vand.u32 4294901760, %v8116_v40 }
  0xa7   :  { %10516 = vst [vmem:[#allocation20_spill] sm:$0xff] %v8121_v53  ;;  %6050 = vmatprep.subr.bf16.mxu0 %v6049_v14  ;;  %10519 = vst [vmem:[#allocation21_spill] sm:$0xff] %v8150_v55  ;;  %1414 = vmatmul.mubr.f32.vlgmr.msra.gmra.mrb[6].mxu1 %v7928_v51  ;;  %v10520_v14 = vand.u32 4294901760, %v8051_v56  ;;  %v8180_v33 = vsub.f32 %v8064_v46, %v10525_v19  ;;  %v10526_v51 = vand.u32 4294901760, %v8069_v12  ;;  %v10532_v19 = vand.u32 4294901760, %v8085_v22 }
  0xa8   :  { %10521 = vst [vmem:[#allocation37_spill] sm:$0xff] %v8164_v23  ;;  %6084 = vmatpush3.bf16.msra.mxu1 %v10524_v11  ;;  %v8190_v43 = vsub.f32 %v8074_v36, %v10528_v39  ;;  %v10531_v11 = vld [vmem:[#allocation60_spill] sm:$0xff]  ;;  %v10541_v36 = vand.u32 4294901760, %v8111_v15  ;;  %v8239_v9 = vsub.f32 %v8116_v40, %v10542_v50  ;;  %v10550_v50 = vand.u32 4294901760, %v8150_v55 }
  0xa9   :  { %1182 = vmatmul.mubr.f32.vlgmr.msra.gmra.mrb[6].mxu0 %v1181_v57  ;;  %v8156_v63 = vsub.f32 %v8051_v56, %v10520_v14  ;;  %v8169_v57 = vld [vmem:[%s9999_s2 + $0x238] sm:$0xff]  ;;  %v8174_v14 = vld [vmem:[%s9999_s2 + $0x2c0] sm:$0xff]  ;;  %v8185_v56 = vsub.f32 %v8069_v12, %v10526_v51  ;;  %6086 = vmatprep.subr.bf16.mxu1 %v10531_v11  ;;  %v8200_v46 = vsub.f32 %v8085_v22, %v10532_v19  ;;  %v10534_v51 = vand.u32 4294901760, %v8090_v47  ;;  %v10539_v19 = vld [vmem:[#allocation42_spill] sm:$0xff] }
  0xaa   :  { %10522 = vst [vmem:[#allocation38_spill] sm:$0xff] %v8169_v57  ;;  %10523 = vst [vmem:[#allocation39_spill] sm:$0xff] %v8174_v14  ;;  %6052 = vmatpush3.bf16.msra.mxu0 %v6051_v5  ;;  %v10530_v5 = vpack.c.bf16 %v7333_v13, %v7317_v44  ;;  %v8212_v44 = vld [vmem:[%s9999_s2 + $0x2c8] sm:$0xff]  ;;  %v8217_v13 = vld [vmem:[%s9999_s2 + $0x240] sm:$0xff]  ;;  %1549 = vmatprep.mubr.f32.mxu0 %v10539_v19  ;;  %v8234_v11 = vsub.f32 %v8111_v15, %v10541_v36  ;;  %v10552_v15 = vand.u32 4294901760, %v8164_v23 }
  0xab   :  { %10527 = vst [vmem:[#allocation41_spill] sm:$0xff] %v8185_v56  ;;  %10529 = vst [vmem:[#allocation22_spill] sm:$0xff] %v8190_v43  ;;  %v8205_v12 = vsub.f32 %v8090_v47, %v10534_v51  ;;  %v10540_v51 = vand.u32 4294901760, %v10539_v19  ;;  %v8250_v22 = vld [vmem:[%s9999_s2 + $0x2d0] sm:$0xff]  ;;  %v10545_v36 = vpack.c.bf16 %v7357_v49, %v7352_v4  ;;  %v10548_v49 = vpack.c.bf16 %v7403_v52, %v7398_v20  ;;  %v8301_v40 = vld [vmem:[%s9999_s2 + $0x258] sm:$0xff] }
  0xac   :  { %6054 = vmatprep.subr.bf16.mxu0 %v10530_v5  ;;  %10533 = vst [vmem:[#allocation9_spill] sm:$0xff] %v8200_v46  ;;  %10536 = vst [vmem:[#allocation62_spill] sm:$0xff] %v8212_v44  ;;  %v8222_v5 = vld [vmem:[%s9999_s2 + $0x248] sm:$0xff]  ;;  %v8268_v4 = vld [vmem:[%s9999_s2 + $0x250] sm:$0xff]  ;;  %v10553_v20 = vand.u32 4294901760, %v8169_v57  ;;  %v10560_v19 = vand.u32 4294901760, %v8217_v13 }
  0xad   :  { %10535 = vst [vmem:[#allocation61_spill] sm:$0xff] %v8205_v12  ;;  %10537 = vst [vmem:[#allocation63_spill] sm:$0xff] %v8217_v13  ;;  %1656 = vmatprep.mubr.f32.mxu1 %v10540_v51  ;;  %v10543_v51 = vand.u32 4294901760, %v8121_v53  ;;  %v10546_v47 = vld [vmem:[#allocation30_spill] sm:$0xff]  ;;  %v10562_v35 = vand.u32 4294901760, %v8222_v5 }
  0xae   :  { %10538 = vst [vmem:[#allocation64_spill] sm:$0xff] %v8222_v5  ;;  %10544 = vst [vmem:[#allocation42_spill] sm:$0xff] %v8250_v22  ;;  %6056 = vmatpush3.bf16.msra.mxu0 %v10545_v36  ;;  %6088 = vmatpush3.bf16.msra.mxu1 %v10546_v47  ;;  %v10549_v36 = vld [vmem:[#allocation13_spill] sm:$0xff]  ;;  %v8285_v47 = vsub.f32 %v8164_v23, %v10552_v15  ;;  %v8290_v52 = vsub.f32 %v8169_v57, %v10553_v20 }
  0xaf   :  { %v8245_v39 = vsub.f32 %v8121_v53, %v10543_v51  ;;  %v8263_v53 = vld [vmem:[%s9999_s2 + $0x2d8] sm:$0xff]  ;;  %6058 = vmatprep.subr.bf16.mxu0 %v10548_v49  ;;  %6090 = vmatprep.subr.bf16.mxu1 %v10549_v36  ;;  %v8277_v51 = vsub.f32 %v8150_v55, %v10550_v50  ;;  %v10554_v49 = vand.u32 4294901760, %v8174_v14  ;;  %v8306_v15 = vld [vmem:[%s9999_s2 + $0x2e0] sm:$0xff]  ;;  %v8311_v20 = vld [vmem:[%s9999_s2 + $0x2e8] sm:$0xff]  ;;  %v10556_v23 = vpack.c.bf16 %v7422_v48, %v7417_v42 }
  0xb0   :  { %10547 = vst [vmem:[#allocation65_spill] sm:$0xff] %v8263_v53  ;;  %v8320_v57 = vld [vmem:[%s9999_s2 + $0x260] sm:$0xff]  ;;  %v10557_v55 = vld [vmem:[#allocation10_spill] sm:$0xff]  ;;  %v10558_v36 = vand.u32 4294901760, %v8212_v44  ;;  %v8339_v3 = vsub.f32 %v8222_v5, %v10562_v35  ;;  %v10575_v5 = vpack.c.bf16 %v7515_v25, %v7506_v27  ;;  %v10577_v35 = vand.u32 4294901760, %v8301_v40 }
  0xb1   :  { %10551 = vst [vmem:[#allocation66_spill] sm:$0xff] %v8277_v51  ;;  %v8295_v50 = vsub.f32 %v8174_v14, %v10554_v49  ;;  %v8334_v14 = vsub.f32 %v8217_v13, %v10560_v19  ;;  %v8345_v48 = vld [vmem:[%s9999_s2 + $0x268] sm:$0xff]  ;;  %v10566_v19 = vpack.c.bf16 %v7500_v45, %v7438_v29  ;;  %v8363_v13 = vld [vmem:[%s9999_s2 + $0x2f8] sm:$0xff]  ;;  %v8368_v45 = vld [vmem:[%s9999_s2 + $0x270] sm:$0xff]  ;;  %v10569_v29 = vand.u32 4294901760, %v8250_v22 }
  0xb2   :  { %6060 = vmatpush3.bf16.msra.mxu0 %v10556_v23  ;;  %6092 = vmatpush3.bf16.msra.mxu1 %v10557_v55  ;;  %v8329_v49 = vsub.f32 %v8212_v44, %v10558_v36  ;;  %10563 = vst [vmem:[#allocation70_spill] sm:$0xff] %v8339_v3  ;;  %10564 = vst [vmem:[#allocation71_spill] sm:$0xff] %v8345_v48  ;;  %v8350_v23 = vld [vmem:[%s9999_s2 + $0x2f0] sm:$0xff]  ;;  %v8381_v36 = vld [vmem:[%s9999_s2 + $0x278] sm:$0xff]  ;;  %v10572_v44 = vand.u32 4294901760, %v8263_v53  ;;  %v10574_v55 = vand.u32 4294901760, %v8268_v4 }
  0xb3   :  { %10555 = vst [vmem:[#allocation67_spill] sm:$0xff] %v8295_v50  ;;  %10561 = vst [vmem:[#allocation69_spill] sm:$0xff] %v8334_v14  ;;  %6062 = vmatprep.subr.bf16.mxu0 %v10566_v19  ;;  %6094 = vmatprep.subr.bf16.mxu1 %v7913_v37  ;;  %v8373_v19 = vsub.f32 %v8250_v22, %v10569_v29  ;;  %v10145_v42 = vand.u32 4294901760, %v8345_v48  ;;  %v8410_v27 = vsub.f32 %v8301_v40, %v10577_v35 }
  0xb4   :  { %10559 = vst [vmem:[#allocation68_spill] sm:$0xff] %v8329_v49  ;;  %10565 = vst [vmem:[#allocation72_spill] sm:$0xff] %v8350_v23  ;;  %v8386_v37 = vsub.f32 %v8263_v53, %v10572_v44  ;;  %v8391_v29 = vsub.f32 %v8268_v4, %v10574_v55  ;;  %v10576_v55 = vpack.c.bf16 %v7553_v54, %v7532_v34  ;;  %v10578_v25 = vand.u32 4294901760, %v8306_v15 }
  0xb5   :  { %10567 = vst [vmem:[#allocation73_spill] sm:$0xff] %v8363_v13  ;;  %10568 = vst [vmem:[#allocation74_spill] sm:$0xff] %v8368_v45  ;;  %v10579_v22 = vand.u32 4294901760, %v8311_v20  ;;  %v10580_v53 = vand.u32 4294901760, %v8320_v57  ;;  %v10584_v54 = vand.u32 4294901760, %v8368_v45 }
  0xb6   :  { %10570 = vst [vmem:[#allocation75_spill] sm:$0xff] %v8373_v19  ;;  %10571 = vst [vmem:[#allocation76_spill] sm:$0xff] %v8381_v36  ;;  %6064 = vmatpush3.bf16.msra.mxu0 %v10575_v5  ;;  %6096 = vmatpush3.bf16.msra.mxu1 %v7919_v6  ;;  %v8415_v5 = vsub.f32 %v8306_v15, %v10578_v25  ;;  %v8434_v25 = vsub.f32 %v8345_v48, %v10145_v42  ;;  %v10583_v42 = vand.u32 4294901760, %v8363_v13 }
  0xb7   :  { %10573 = vst [vmem:[#allocation77_spill] sm:$0xff] %v8386_v37  ;;  %6066 = vmatprep.subr.bf16.mxu0 %v10576_v55  ;;  %6098 = vmatprep.subr.bf16.mxu1 %v7935_v59  ;;  %v8420_v58 = vsub.f32 %v8311_v20, %v10579_v22  ;;  %v8428_v35 = vsub.f32 %v8320_v57, %v10580_v53  ;;  %v10582_v53 = vand.u32 4294901760, %v8350_v23  ;;  %v10594_v22 = vand.u32 4294901760, %v8180_v33 }
  0xb8   :  { %v10581_v55 = vpack.c.bf16 %v7605_v38, %v7580_v41  ;;  %v8451_v48 = vsub.f32 %v8363_v13, %v10583_v42  ;;  %v8456_v34 = vsub.f32 %v8368_v45, %v10584_v54  ;;  %v10585_v41 = vpack.c.bf16 %v7639_v60, %v7615_v62 }
  0xb9   :  { %v8446_v44 = vsub.f32 %v8350_v23, %v10582_v53  ;;  %v10587_v38 = vand.u32 4294901760, %v8103_v32  ;;  %v10588_v62 = vand.u32 4294901760, %v8129_v18  ;;  %v10591_v13 = vand.u32 4294901760, %v8145_v16 }
  0xba   :  { %6068 = vmatpush3.bf16.msra.mxu0 %v10581_v55  ;;  %6100 = vmatpush3.bf16.msra.mxu1 %v7948_v24  ;;  %v10586_v55 = vand.u32 4294901760, %v8381_v36  ;;  %v10593_v42 = vand.u32 4294901760, %v8156_v63  ;;  %v10596_v45 = vand.u32 4294901760, %v8185_v56  ;;  %v10597_v54 = vand.u32 4294901760, %v8190_v43 }
  0xbb   :  { %6070 = vmatprep.subr.bf16.mxu0 %v10585_v41  ;;  %6102 = vmatprep.subr.bf16.mxu1 %v7954_v28  ;;  %v8476_v60 = vpack.c.bf16 %v10588_v62, %v10587_v38  ;;  %v10590_v41 = vand.u32 4294901760, %v8140_v1  ;;  %v10599_v38 = vand.u32 4294901760, %v8200_v46  ;;  %v10600_v62 = vand.u32 4294901760, %v8205_v12 }
  0xbc   :  { %v8466_v53 = vsub.f32 %v8381_v36, %v10586_v55  ;;  %v8488_v36 = vpack.c.bf16 %v10594_v22, %v10593_v42  ;;  %v8494_v23 = vpack.c.bf16 %v10597_v54, %v10596_v45  ;;  %v10605_v22 = vand.u32 4294901760, %v8245_v39 }
  0xbd   :  { %10589 = vst [vmem:[#allocation78_spill] sm:$0xff] %v8476_v60  ;;  %v8482_v55 = vpack.c.bf16 %v10591_v13, %v10590_v41  ;;  %v8500_v60 = vpack.c.bf16 %v10600_v62, %v10599_v38  ;;  %v10602_v13 = vand.u32 4294901760, %v8234_v11  ;;  %v10603_v41 = vand.u32 4294901760, %v8239_v9 }
  0xbe   :  { %10595 = vst [vmem:[#allocation80_spill] sm:$0xff] %v8488_v36  ;;  %10598 = vst [vmem:[#allocation81_spill] sm:$0xff] %v8494_v23  ;;  %v10606_v42 = vand.u32 4294901760, %v8277_v51  ;;  %v10608_v45 = vpack.c.bf16 %v7654_v10, %v7649_v2  ;;  %6104 = vmatpush3.bf16.msra.mxu1 %v7978_v26  ;;  %v10609_v38 = vand.u32 4294901760, %v8285_v47  ;;  %v10610_v62 = vand.u32 4294901760, %v8290_v52 }
  0xbf   :  { %10592 = vst [vmem:[#allocation79_spill] sm:$0xff] %v8482_v55  ;;  %10601 = vst [vmem:[#allocation82_spill] sm:$0xff] %v8500_v60  ;;  %v8506_v55 = vpack.c.bf16 %v10603_v41, %v10602_v13  ;;  %v10612_v41 = vand.u32 4294901760, %v8295_v50  ;;  %v10616_v2 = vand.u32 4294901760, %v8339_v3  ;;  %6106 = vmatprep.subr.bf16.mxu1 %v7993_v61 }
  0xc0   :  { %v8512_v36 = vpack.c.bf16 %v10606_v42, %v10605_v22  ;;  %6072 = vmatpush3.bf16.msra.mxu0 %v10608_v45  ;;  %v8523_v13 = vpack.c.bf16 %v10610_v62, %v10609_v38  ;;  %v10615_v42 = vand.u32 4294901760, %v8334_v14  ;;  %v10618_v45 = vpack.c.bf16 %v7667_v8, %v7659_v21 }
  0xc1   :  { %10604 = vst [vmem:[#allocation83_spill] sm:$0xff] %v8506_v55  ;;  %v10613_v55 = vand.u32 4294901760, %v8329_v49  ;;  %v10619_v38 = vand.u32 4294901760, %v8373_v19  ;;  %v10620_v62 = vand.u32 4294901760, %v8386_v37  ;;  %v10152_v8 = vand.u32 4294901760, %v8446_v44 }
  0xc2   :  { %10607 = vst [vmem:[#allocation84_spill] sm:$0xff] %v8512_v36  ;;  %10611 = vst [vmem:[#allocation85_spill] sm:$0xff] %v8523_v13  ;;  %v8535_v10 = vpack.c.bf16 %v10616_v2, %v10615_v42  ;;  %6074 = vmatprep.subr.bf16.mxu0 %v10618_v45  ;;  %v10625_v42 = vand.u32 4294901760, %v8415_v5  ;;  %v10626_v2 = vand.u32 4294901760, %v8420_v58  ;;  %v10151_v45 = vand.u32 4294901760, %v8451_v48  ;;  %6108 = vmatpush3.bf16.msra.mxu1 %v7999_v17  ;;  %v10678_v36 = vld [vmem:[#allocation33_spill] sm:$0xff] }
  0xc3   :  { %v8529_v22 = vpack.c.bf16 %v10613_v55, %v10612_v41  ;;  %v8545_v54 = vpack.c.bf16 %v10620_v62, %v10619_v38  ;;  %v10622_v55 = vand.u32 4294901760, %v8391_v29  ;;  %v10623_v41 = vand.u32 4294901760, %v8410_v27 }
  0xc4   :  { %10617 = vst [vmem:[#allocation87_spill] sm:$0xff] %v8535_v10  ;;  %v8557_v21 = vpack.c.bf16 %v10626_v2, %v10625_v42  ;;  %v10628_v10 = vand.u32 4294901760, %v8428_v35  ;;  %v10629_v38 = vand.u32 4294901760, %v8434_v25  ;;  %v10632_v42 = vld [vmem:[#allocation43_spill] sm:$0xff] }
  0xc5   :  { %10614 = vst [vmem:[#allocation86_spill] sm:$0xff] %v8529_v22  ;;  %10621 = vst [vmem:[#allocation88_spill] sm:$0xff] %v8545_v54  ;;  %v8551_v22 = vpack.c.bf16 %v10623_v41, %v10622_v55  ;;  %v10153_v54 = vand.u32 4294901760, %v8456_v34  ;;  %v10631_v41 = vpack.c.bf16 %v7679_v30, %v7673_v0  ;;  %v6079_v2 = vpack.c.bf16 %v7711_v31, %v10632_v42  ;;  %v10636_v55 = vld [vmem:[#allocation32_spill] sm:$0xff] }
  0xc6   :  { %10627 = vst [vmem:[#allocation90_spill] sm:$0xff] %v8557_v21  ;;  %v8565_v62 = vpack.c.bf16 %v10629_v38, %v10628_v10  ;;  %v8579_v21 = vpack.c.bf16 %v10151_v45, %v10152_v8  ;;  %v10634_v10 = vld [vmem:[#allocation23_spill] sm:$0xff]  ;;  %6110 = vmatprep.subr.bf16.mxu1 %v10636_v55  ;;  %v10637_v0 = vand.u32 4294901760, %v8466_v53  ;;  %v10639_v31 = vld [vmem:[#allocation24_spill] sm:$0xff]  ;;  %v10646_v8 = vld [vmem:[#allocation46_spill] sm:$0xff] }
  0xc7   :  { %10624 = vst [vmem:[#allocation89_spill] sm:$0xff] %v8551_v22  ;;  %6076 = vmatpush3.bf16.msra.mxu0 %v10631_v41  ;;  %v10635_v38 = vpack.c.bf16 %v7689_v7, %v10634_v10  ;;  %6112 = vmatpush3.bf16.msra.mxu1 %v10639_v31  ;;  %v10640_v41 = vld [vmem:[#allocation44_spill] sm:$0xff]  ;;  %v10642_v45 = vld [vmem:[#allocation11_spill] sm:$0xff]  ;;  %v10644_v10 = vld [vmem:[#allocation45_spill] sm:$0xff] }
  0xc8   :  { %10630 = vst [vmem:[#allocation91_spill] sm:$0xff] %v8565_v62  ;;  %10633 = vst [vmem:[#allocation43_spill] sm:$0xff] %v8579_v21  ;;  %v8589_v30 = vpack.c.bf16 %v10637_v0, %v10153_v54  ;;  %v10641_v42 = vld [vmem:[#allocation16_spill] sm:$0xff]  ;;  %v10643_v7 = vand.u32 4294901760, %v10642_v45  ;;  %v10657_v54 = vld [vmem:[#allocation50_spill] sm:$0xff] }
  0xc9   :  { %6078 = vmatprep.subr.bf16.mxu0 %v10635_v38  ;;  %6146 = vmatprep.subr.bf16.mxu1 %v10641_v42  ;;  %v10645_v38 = vld [vmem:[#allocation25_spill] sm:$0xff]  ;;  %v10647_v0 = vld [vmem:[#allocation60_spill] sm:$0xff]  ;;  %v10650_v42 = vld [vmem:[#allocation47_spill] sm:$0xff] }
  0xca   :  { %10638 = vst [vmem:[#allocation23_spill] sm:$0xff] %v8589_v30  ;;  %1660 = vmatmul.mubr.f32.vlgmr.msra.gmra.mrb[8].mxu1 %v10643_v7  ;;  %v10652_v7 = vld [vmem:[#allocation48_spill] sm:$0xff]  ;;  %v10658_v30 = vld [vmem:[#allocation18_spill] sm:$0xff] }
  0xcb   :  { %6080 = vmatpush3.bf16.msra.mxu0 %v6079_v2  ;;  %6148 = vmatpush3.bf16.msra.mxu1 %v10645_v38  ;;  %v10648_v2 = vld [vmem:[#allocation40_spill] sm:$0xff] }
  0xcc   :  { %6114 = vmatprep.subr.bf16.mxu0 %v10640_v41  ;;  %6150 = vmatprep.subr.bf16.mxu1 %v10647_v0  ;;  %v8606_v41 = vld [vmem:[%s9998_s1 + $0x8] sm:$0xff] }
  0xcd   :  { %1930 = vmatprep.mubr.f32.mxu1 %v10648_v2  ;;  %10649 = vst [vmem:[#allocation32_spill] sm:$0xff] %v8606_v41  ;;  %v10655_v0 = vld [vmem:[#allocation49_spill] sm:$0xff] }
  0xce   :  { %1552 = vmatmul.mubr.f32.vlgmr.msra.gmra.mrb[8].mxu0 %v10642_v45  ;;  %v10651_v45 = vld [vmem:[#allocation30_spill] sm:$0xff] }
  0xcf   :  { %6116 = vmatpush3.bf16.msra.mxu0 %v10644_v10  ;;  %1826 = vmatprep.mubr.f32.mxu0 %v10648_v2  ;;  %v10653_v10 = vld [vmem:[#allocation13_spill] sm:$0xff]  ;;  %v10656_v2 = vld [vmem:[#allocation10_spill] sm:$0xff] }
  0xd0   :  { %6118 = vmatprep.subr.bf16.mxu0 %v10646_v8  ;;  %6152 = vmatpush3.bf16.msra.mxu1 %v10651_v45  ;;  %v10654_v8 = vld [vmem:[#allocation17_spill] sm:$0xff]  ;;  %v10659_v45 = vld [vmem:[#allocation51_spill] sm:$0xff] }
  0xd1   :  { %6154 = vmatprep.subr.bf16.mxu1 %v10653_v10  ;;  %v8614_v38 = vrot.slane %v8606_v41, %v10654_v8  ;;  %v10680_v8 = vld [vmem:[#allocation12_spill] sm:$0xff]  ;;  %v10682_v41 = vld [vmem:[#allocation14_spill] sm:$0xff] }
  0xd2   :  { %v10681_v60 = vand.u32 4294901760, %v10680_v8  ;;  %v10689_v8 = vld [vmem:[#allocation28_spill] sm:$0xff] }
  0xd3   :  { %6120 = vmatpush3.bf16.msra.mxu0 %v10650_v42  ;;  %v203_v42 = vcombine.high %v8614_v38, %v8614_v38 }
  0xd4   :  { %6122 = vmatprep.subr.bf16.mxu0 %v10652_v7  ;;  %6156 = vmatpush3.bf16.msra.mxu1 %v10656_v2  ;;  %v10660_v7 = vld [vmem:[#allocation52_spill] sm:$0xff] }
  0xd5   :  { %6158 = vmatprep.subr.bf16.mxu1 %v10658_v30  ;;  %v8626_v10 = vand.u32 4294901760, %v203_v42  ;;  %v10664_v30 = vand.u32 4294901760, %v8103_v32 }
  0xd7   :  { %6124 = vmatpush3.bf16.msra.mxu0 %v10655_v0  ;;  %10661 = vst [vmem:[#allocation24_spill] sm:$0xff] %v8626_v10  ;;  %v10662_v0 = vld [vmem:[#allocation53_spill] sm:$0xff]  ;;  %v2165_v2 = vsub.f32 %v8103_v32, %v10664_v30  ;;  %v10669_v30 = vld [vmem:[#allocation56_spill] sm:$0xff] }
  0xd8   :  { %6126 = vmatprep.subr.bf16.mxu0 %v10657_v54  ;;  %6160 = vmatpush3.bf16.msra.mxu1 %v7919_v6  ;;  %v10663_v54 = vld [vmem:[#allocation54_spill] sm:$0xff]  ;;  %v10665_v6 = vand.u32 4294901760, %v8129_v18 }
  0xd9   :  { %6162 = vmatprep.subr.bf16.mxu1 %v7935_v59  ;;  %v8639_v59 = vsub.f32 %v203_v42, %v8626_v10  ;;  %v10670_v42 = vand.u32 4294901760, %v8156_v63 }
  0xdb   :  { %6128 = vmatpush3.bf16.msra.mxu0 %v10659_v45  ;;  %v2172_v45 = vsub.f32 %v8129_v18, %v10665_v6  ;;  %v2166_v6 = vand.u32 4294901760, %v2165_v2  ;;  %v2179_v62 = vsub.f32 %v8156_v63, %v10670_v42  ;;  %v10675_v42 = vand.u32 4294901760, %v8200_v46 }
  0xdc   :  { %6130 = vmatprep.subr.bf16.mxu0 %v10660_v7  ;;  %6164 = vmatpush3.bf16.msra.mxu1 %v7948_v24  ;;  %v10666_v7 = vand.u32 4294901760, %v8140_v1  ;;  %v10667_v24 = vand.u32 4294901760, %v8145_v16 }
  0xdd   :  { %6166 = vmatprep.subr.bf16.mxu1 %v7954_v28  ;;  %v10668_v28 = vld [vmem:[#allocation55_spill] sm:$0xff]  ;;  %v2173_v21 = vand.u32 4294901760, %v2172_v45  ;;  %v10674_v45 = vld [vmem:[#allocation57_spill] sm:$0xff] }
  0xdf   :  { %6132 = vmatpush3.bf16.msra.mxu0 %v10662_v0  ;;  %v2053_v0 = vsub.f32 %v8140_v1, %v10666_v7  ;;  %v10671_v7 = vand.u32 4294901760, %v8180_v33 }
  0xe0   :  { %6134 = vmatprep.subr.bf16.mxu0 %v10663_v54  ;;  %v2060_v54 = vsub.f32 %v8145_v16, %v10667_v24  ;;  %6168 = vmatpush3.bf16.msra.mxu1 %v7978_v26  ;;  %v10672_v26 = vand.u32 4294901760, %v8185_v56  ;;  %v10676_v24 = vand.u32 4294901760, %v8205_v12 }
  0xe1   :  { %6170 = vmatprep.subr.bf16.mxu1 %v7993_v61  ;;  %v2186_v22 = vsub.f32 %v8180_v33, %v10671_v7  ;;  %v2054_v13 = vand.u32 4294901760, %v2053_v0  ;;  %v10673_v61 = vand.u32 4294901760, %v8190_v43  ;;  %v2193_v7 = vsub.f32 %v8200_v46, %v10675_v42  ;;  %v10684_v42 = vld [vmem:[#allocation26_spill] sm:$0xff] }
  0xe2   :  { %v2200_v0 = vsub.f32 %v8205_v12, %v10676_v24  ;;  %v10685_v46 = vand.u32 4294901760, %v10684_v42  ;;  %v10686_v24 = vand.u32 4294901760, %v8639_v59  ;;  %v10693_v42 = vand.u32 4294901760, %v8239_v9 }
  0xe3   :  { %6136 = vmatpush3.bf16.msra.mxu0 %v10668_v28  ;;  %v2061_v28 = vand.u32 4294901760, %v2060_v54  ;;  %v2074_v2 = vsub.f32 %v8190_v43, %v10673_v61  ;;  %v10677_v54 = vld [vmem:[#allocation58_spill] sm:$0xff]  ;;  %v6209_v61 = vpack.c.bf16 %v2173_v21, %v2166_v6  ;;  %v10683_v43 = vand.u32 4294901760, %v10682_v41 }
  0xe4   :  { %6138 = vmatprep.subr.bf16.mxu0 %v10669_v30  ;;  %v2067_v30 = vsub.f32 %v8185_v56, %v10672_v26  ;;  %6172 = vmatpush3.bf16.msra.mxu1 %v7999_v17  ;;  %v10679_v26 = vand.u32 4294901760, %v10678_v36  ;;  %v2180_v17 = vand.u32 4294901760, %v2179_v62  ;;  %v10687_v36 = vld [vmem:[#allocation27_spill] sm:$0xff]  ;;  %v2194_v41 = vand.u32 4294901760, %v2193_v7 }
  0xe5   :  { %6174 = vmatprep.subr.bf16.mxu1 %v10636_v55  ;;  %v8684_v56 = vpack.c.bf16 %v10685_v46, %v10683_v43  ;;  %v10688_v12 = vand.u32 4294901760, %v10687_v36  ;;  %v6211_v55 = vpack.c.bf16 %v2061_v28, %v2054_v13  ;;  %v2075_v62 = vand.u32 4294901760, %v2074_v2  ;;  %v10697_v36 = vld [vmem:[#allocation15_spill] sm:$0xff] }
  0xe6   :  { %v8677_v23 = vpack.c.bf16 %v10681_v60, %v10679_v26  ;;  %v10690_v60 = vand.u32 4294901760, %v10689_v8  ;;  %v2068_v21 = vand.u32 4294901760, %v2067_v30  ;;  %v2201_v43 = vand.u32 4294901760, %v2200_v0  ;;  %v10698_v8 = vld [vmem:[#allocation35_spill] sm:$0xff] }
  0xe7   :  { %6140 = vmatpush3.bf16.msra.mxu0 %v10674_v45  ;;  %v2187_v45 = vand.u32 4294901760, %v2186_v22  ;;  %v10691_v22 = vld [vmem:[#allocation59_spill] sm:$0xff]  ;;  %v10692_v46 = vand.u32 4294901760, %v8234_v11  ;;  %v10694_v13 = vand.u32 4294901760, %v8245_v39  ;;  %v10696_v2 = vand.u32 4294901760, %v8285_v47 }
  0xe8   :  { %6142 = vmatprep.subr.bf16.mxu0 %v10677_v54  ;;  %v2036_v54 = vsub.f32 %v8639_v59, %v10686_v24  ;;  %v8693_v26 = vpack.c.bf16 %v10690_v60, %v10688_v12  ;;  %6176 = vmatpush3.bf16.msra.mxu1 %v10639_v31  ;;  %v2088_v24 = vsub.f32 %v8239_v9, %v10693_v42  ;;  %v10695_v31 = vand.u32 4294901760, %v8277_v51  ;;  %v10704_v42 = vld [vmem:[#allocation31_spill] sm:$0xff] }
  0xe9   :  { %v2081_v6 = vsub.f32 %v8234_v11, %v10692_v46  ;;  %6210 = vmatprep.subr.bf16.mxu1 %v6209_v61  ;;  %v6213_v12 = vpack.c.bf16 %v2187_v45, %v2180_v17  ;;  %v2207_v28 = vsub.f32 %v8245_v39, %v10694_v13  ;;  %v2095_v7 = vsub.f32 %v8285_v47, %v10696_v2  ;;  %v10702_v45 = vld [vmem:[#allocation29_spill] sm:$0xff] }
  0xea   :  { %v2214_v30 = vsub.f32 %v8277_v51, %v10695_v31  ;;  %v2037_v0 = vand.u32 4294901760, %v2036_v54  ;;  %v10699_v60 = vand.u32 4294901760, %v10698_v8  ;;  %v10703_v46 = vand.u32 4294901760, %v10702_v45 }
  0xeb   :  { %6144 = vmatpush3.bf16.msra.mxu0 %v10691_v22  ;;  %v10700_v22 = vld [vmem:[#allocation19_spill] sm:$0xff]  ;;  %1932 = vmatmul.mubr.f32.vlgmr.msra.gmra.mrb[10].mxu1 %v10697_v36  ;;  %v10705_v13 = vand.u32 4294901760, %v10704_v42  ;;  %v10706_v51 = vand.u32 4294901760, %v8290_v52  ;;  %v6215_v2 = vpack.c.bf16 %v2075_v62, %v2068_v21  ;;  %v6217_v8 = vpack.c.bf16 %v2201_v43, %v2194_v41 }
  0xec   :  { %6178 = vmatprep.subr.bf16.mxu0 %v8677_v23  ;;  %v10701_v61 = vand.u32 4294901760, %v10700_v22  ;;  %6212 = vmatpush3.bf16.msra.mxu1 %v6211_v55  ;;  %v2082_v22 = vand.u32 4294901760, %v2081_v6  ;;  %v10707_v45 = vand.u32 4294901760, %v8295_v50  ;;  %v10708_v42 = vand.u32 4294901760, %v8329_v49 }
  0xed   :  { %v8725_v31 = vpack.c.bf16 %v10705_v13, %v10703_v46  ;;  %v2102_v54 = vsub.f32 %v8290_v52, %v10706_v51  ;;  %6214 = vmatprep.subr.bf16.mxu1 %v6213_v12  ;;  %v2096_v13 = vand.u32 4294901760, %v2095_v7  ;;  %2274 = vmatprep.mubr.f32.mxu1 %v8626_v10  ;;  %v10709_v21 = vand.u32 4294901760, %v8334_v14  ;;  %v10712_v12 = vld [vmem:[#allocation34_spill] sm:$0xff]  ;;  %v10719_v10 = vld [vmem:[#allocation21_spill] sm:$0xff] }
  0xee   :  { %1828 = vmatmul.mubr.f32.vlgmr.msra.gmra.mrb[10].mxu0 %v10697_v36  ;;  %v8718_v17 = vpack.c.bf16 %v10701_v61, %v10699_v60  ;;  %v2089_v60 = vand.u32 4294901760, %v2088_v24  ;;  %v2208_v36 = vand.u32 4294901760, %v2207_v28  ;;  %v2215_v61 = vand.u32 4294901760, %v2214_v30  ;;  %v10714_v30 = vld [vmem:[#allocation36_spill] sm:$0xff] }
  0xef   :  { %6180 = vmatpush3.bf16.msra.mxu0 %v8684_v56  ;;  %v2221_v46 = vsub.f32 %v8295_v50, %v10707_v45  ;;  %v2228_v51 = vsub.f32 %v8329_v49, %v10708_v42  ;;  %2038 = vmatprep.mubr.f32.mxu0 %v2037_v0  ;;  %v2103_v55 = vand.u32 4294901760, %v2102_v54  ;;  %v2109_v62 = vsub.f32 %v8334_v14, %v10709_v21  ;;  %v10717_v21 = vld [vmem:[#allocation20_spill] sm:$0xff]  ;;  %v10725_v14 = vld [vmem:[#allocation39_spill] sm:$0xff] }
  0xf0   :  { %6182 = vmatprep.subr.bf16.mxu0 %v8693_v26  ;;  %v10710_v41 = vand.u32 4294901760, %v8339_v3  ;;  %v10711_v6 = vand.u32 4294901760, %v8373_v19  ;;  %v10713_v28 = vand.u32 4294901760, %v10712_v12  ;;  %v10715_v7 = vand.u32 4294901760, %v10714_v30  ;;  %6216 = vmatpush3.bf16.msra.mxu1 %v6215_v2  ;;  %v10723_v2 = vld [vmem:[#allocation38_spill] sm:$0xff] }
  0xf1   :  { %v6219_v54 = vpack.c.bf16 %v2089_v60, %v2082_v22  ;;  %v10716_v45 = vand.u32 4294901760, %v8386_v37  ;;  %6218 = vmatprep.subr.bf16.mxu1 %v6217_v8  ;;  %v6221_v12 = vpack.c.bf16 %v2215_v61, %v2208_v36  ;;  %v2229_v30 = vand.u32 4294901760, %v2228_v51 }
  0xf2   :  { %v2116_v43 = vsub.f32 %v8339_v3, %v10710_v41  ;;  %v2235_v24 = vsub.f32 %v8373_v19, %v10711_v6  ;;  %v8753_v0 = vpack.c.bf16 %v10715_v7, %v10713_v28  ;;  %v10718_v41 = vand.u32 4294901760, %v10717_v21  ;;  %v10721_v28 = vld [vmem:[#allocation37_spill] sm:$0xff] }
  0xf3   :  { %6184 = vmatpush3.bf16.msra.mxu0 %v8718_v17  ;;  %v2242_v42 = vsub.f32 %v8386_v37, %v10716_v45  ;;  %v10720_v6 = vand.u32 4294901760, %v10719_v10  ;;  %v2222_v3 = vand.u32 4294901760, %v2221_v46  ;;  %v10722_v7 = vand.u32 4294901760, %v10721_v28  ;;  %v10727_v37 = vld [vmem:[#allocation62_spill] sm:$0xff] }
  0xf4   :  { %6186 = vmatprep.subr.bf16.mxu0 %v8725_v31  ;;  %v10724_v22 = vand.u32 4294901760, %v10723_v2  ;;  %v10726_v45 = vand.u32 4294901760, %v10725_v14  ;;  %v10728_v49 = vand.u32 4294901760, %v10727_v37  ;;  %v6223_v21 = vpack.c.bf16 %v2103_v55, %v2096_v13  ;;  %6220 = vmatpush3.bf16.msra.mxu1 %v6219_v54  ;;  %v10736_v54 = vld [vmem:[#allocation64_spill] sm:$0xff] }
  0xf5   :  { %v8763_v19 = vpack.c.bf16 %v10720_v6, %v10718_v41  ;;  %v2110_v10 = vand.u32 4294901760, %v2109_v62  ;;  %v2117_v41 = vand.u32 4294901760, %v2116_v43  ;;  %v2236_v6 = vand.u32 4294901760, %v2235_v24  ;;  %6222 = vmatprep.subr.bf16.mxu1 %v6221_v12  ;;  %v10734_v43 = vld [vmem:[#allocation63_spill] sm:$0xff] }
  0xf6   :  { %v8769_v60 = vpack.c.bf16 %v10724_v22, %v10722_v7  ;;  %v8775_v50 = vpack.c.bf16 %v10728_v49, %v10726_v45  ;;  %v2243_v8 = vand.u32 4294901760, %v2242_v42  ;;  %v10729_v36 = vand.u32 4294901760, %v8391_v29  ;;  %v10738_v7 = vld [vmem:[#allocation42_spill] sm:$0xff]  ;;  %v10740_v22 = vld [vmem:[#allocation65_spill] sm:$0xff] }
  0xf7   :  { %6188 = vmatpush3.bf16.msra.mxu0 %v8753_v0  ;;  %v10730_v46 = vand.u32 4294901760, %v8410_v27  ;;  %v8785_v37 = vand.u32 4294901760, %v8614_v38  ;;  %v6225_v49 = vpack.c.bf16 %v2229_v30, %v2222_v3  ;;  %v10732_v51 = vand.u32 4294901760, %v8415_v5 }
  0xf8   :  { %v2123_v61 = vsub.f32 %v8391_v29, %v10729_v36  ;;  %6190 = vmatprep.subr.bf16.mxu0 %v8763_v19  ;;  %v10733_v55 = vand.u32 4294901760, %v8420_v58  ;;  %v10735_v24 = vand.u32 4294901760, %v10734_v43  ;;  %v10737_v42 = vand.u32 4294901760, %v10736_v54  ;;  %6224 = vmatpush3.bf16.msra.mxu1 %v6223_v21 }
  0xf9   :  { %v2130_v14 = vsub.f32 %v8410_v27, %v10730_v46  ;;  %10731 = vst [vmem:[#allocation44_spill] sm:$0xff] %v8785_v37  ;;  %v2249_v13 = vsub.f32 %v8415_v5, %v10732_v51  ;;  %v10739_v2 = vand.u32 4294901760, %v10738_v7  ;;  %v10741_v45 = vand.u32 4294901760, %v10740_v22  ;;  %6226 = vmatprep.subr.bf16.mxu1 %v6225_v49 }
  0xfa   :  { %v2256_v62 = vsub.f32 %v8420_v58, %v10733_v55  ;;  %v8798_v28 = vpack.c.bf16 %v10737_v42, %v10735_v24  ;;  %v6227_v3 = vpack.c.bf16 %v2117_v41, %v2110_v10  ;;  %v10742_v30 = vand.u32 4294901760, %v8428_v35 }
  0xfb   :  { %v8804_v12 = vpack.c.bf16 %v10741_v45, %v10739_v2  ;;  %v10743_v46 = vand.u32 4294901760, %v8434_v25  ;;  %6192 = vmatpush3.bf16.msra.mxu0 %v8769_v60  ;;  %v6229_v55 = vpack.c.bf16 %v2243_v8, %v2236_v6  ;;  %v2124_v43 = vand.u32 4294901760, %v2123_v61 }
  0xfc   :  { %v2137_v36 = vsub.f32 %v8428_v35, %v10742_v30  ;;  %v2131_v24 = vand.u32 4294901760, %v2130_v14  ;;  %v8815_v54 = vsub.f32 %v8614_v38, %v8785_v37  ;;  %6194 = vmatprep.subr.bf16.mxu0 %v8775_v50  ;;  %v2250_v10 = vand.u32 4294901760, %v2249_v13  ;;  %6228 = vmatpush3.bf16.msra.mxu1 %v6227_v3 }
  0xfd   :  { %v2144_v51 = vsub.f32 %v8434_v25, %v10743_v46  ;;  %v2257_v41 = vand.u32 4294901760, %v2256_v62  ;;  %v10744_v42 = vand.u32 4294901760, %v8446_v44  ;;  %v10745_v2 = vand.u32 4294901760, %v8451_v48  ;;  %6230 = vmatprep.subr.bf16.mxu1 %v6229_v55 }
  0xfe   :  { %v10746_v6 = vand.u32 4294901760, %v8268_v4  ;;  %v10747_v8 = vand.u32 4294901760, %v8301_v40  ;;  %v10748_v38 = vand.u32 4294901760, %v8306_v15  ;;  %v10749_v14 = vand.u32 4294901760, %v8311_v20  ;;  %v8846_v15 = vld [vmem:[%s9999_s2 + $0x380] sm:$0xff]  ;;  %v8851_v20 = vld [vmem:[%s9999_s2 + $0x388] sm:$0xff] }
  0xff   :  { %v2263_v7 = vsub.f32 %v8446_v44, %v10744_v42  ;;  %v2270_v21 = vsub.f32 %v8451_v48, %v10745_v2  ;;  %v2138_v13 = vand.u32 4294901760, %v2137_v36  ;;  %v2145_v62 = vand.u32 4294901760, %v2144_v51  ;;  %6196 = vmatpush3.bf16.msra.mxu0 %v8798_v28  ;;  %10752 = vst [vmem:[#allocation16_spill] sm:$0xff] %v8846_v15  ;;  %10753 = vst [vmem:[#allocation11_spill] sm:$0xff] %v8851_v20  ;;  %v10757_v2 = vld [vmem:[#allocation71_spill] sm:$0xff] }
 0x100   :  { %v8828_v61 = vpack.c.bf16 %v10747_v8, %v10746_v6  ;;  %v8834_v49 = vpack.c.bf16 %v10749_v14, %v10748_v38  ;;  %v6231_v22 = vpack.c.bf16 %v2131_v24, %v2124_v43  ;;  %v10750_v45 = vand.u32 4294901760, %v8456_v34  ;;  %6198 = vmatprep.subr.bf16.mxu0 %v8804_v12  ;;  %v8858_v43 = vld [vmem:[%s9999_s2 + $0x300] sm:$0xff]  ;;  %v8863_v24 = vld [vmem:[%s9999_s2 + $0x308] sm:$0xff] }
 0x101   :  { %v10751_v40 = vand.u32 4294901760, %v8466_v53  ;;  %v10168_v3 = vand.u32 4294901760, %v8815_v54  ;;  %v6233_v36 = vpack.c.bf16 %v2257_v41, %v2250_v10  ;;  %v2264_v46 = vand.u32 4294901760, %v2263_v7  ;;  %10754 = vst [vmem:[#allocation45_spill] sm:$0xff] %v8858_v43  ;;  %10755 = vst [vmem:[#allocation25_spill] sm:$0xff] %v8863_v24  ;;  %v10759_v8 = vld [vmem:[#allocation72_spill] sm:$0xff] }
 0x102   :  { %v2151_v4 = vsub.f32 %v8456_v34, %v10750_v45  ;;  %v2271_v51 = vand.u32 4294901760, %v2270_v21  ;;  %v10756_v42 = vand.u32 4294901760, %v8320_v57  ;;  %v10758_v6 = vand.u32 4294901760, %v10757_v2  ;;  %v10761_v41 = vld [vmem:[#allocation73_spill] sm:$0xff]  ;;  %v8887_v57 = vld [vmem:[%s9999_s2 + $0x398] sm:$0xff]  ;;  %6232 = vmatpush3.bf16.msra.mxu1 %v6231_v22 }
 0x103   :  { %v2158_v30 = vsub.f32 %v8466_v53, %v10751_v40  ;;  %v10760_v10 = vand.u32 4294901760, %v10759_v8  ;;  %v10762_v7 = vand.u32 4294901760, %v10761_v41  ;;  %v6235_v38 = vpack.c.bf16 %v2145_v62, %v2138_v13  ;;  %v8882_v40 = vld [vmem:[%s9999_s2 + $0x390] sm:$0xff]  ;;  %10764 = vst [vmem:[#allocation60_spill] sm:$0xff] %v8887_v57  ;;  %6200 = vmatpush3.bf16.msra.mxu0 %v8828_v61  ;;  %v8900_v8 = vld [vmem:[%s9999_s2 + $0x318] sm:$0xff]  ;;  %6234 = vmatprep.subr.bf16.mxu1 %v6233_v36  ;;  %v8915_v13 = vld [vmem:[%s9999_s2 + $0x3a0] sm:$0xff] }
 0x104   :  { %v8869_v55 = vpack.c.bf16 %v10758_v6, %v10756_v42  ;;  %v10169_v14 = vand.u32 4294901760, %v8846_v15  ;;  %10763 = vst [vmem:[#allocation46_spill] sm:$0xff] %v8882_v40  ;;  %v2152_v42 = vand.u32 4294901760, %v2151_v4  ;;  %v8895_v6 = vld [vmem:[%s9999_s2 + $0x310] sm:$0xff]  ;;  %10766 = vst [vmem:[#allocation47_spill] sm:$0xff] %v8900_v8  ;;  %6202 = vmatprep.subr.bf16.mxu0 %v8834_v49  ;;  %v10769_v4 = vld [vmem:[#allocation76_spill] sm:$0xff]  ;;  %v6237_v62 = vpack.c.bf16 %v2271_v51, %v2264_v46 }
 0x105   :  { %v8875_v21 = vpack.c.bf16 %v10762_v7, %v10760_v10  ;;  %v2159_v2 = vand.u32 4294901760, %v2158_v30  ;;  %10765 = vst [vmem:[#allocation40_spill] sm:$0xff] %v8895_v6  ;;  %v10767_v10 = vld [vmem:[#allocation74_spill] sm:$0xff]  ;;  %v10770_v30 = vand.u32 4294901760, %v10769_v4  ;;  %v2042_v7 = vsub.f32 %v8815_v54, %v10168_v3  ;;  %10771 = vst [vmem:[#allocation30_spill] sm:$0xff] %v8915_v13  ;;  %v8931_v46 = vld [vmem:[%s9999_s2 + $0x320] sm:$0xff] }
 0x106   :  { %v10768_v22 = vand.u32 4294901760, %v10767_v10  ;;  %v6241_v45 = vpack.c.bf16 %v8129_v18, %v8103_v32  ;;  %v6243_v10 = vpack.c.bf16 %v8145_v16, %v8140_v1  ;;  %v8926_v36 = vld [vmem:[%s9999_s2 + $0x3a8] sm:$0xff]  ;;  %10773 = vst [vmem:[#allocation13_spill] sm:$0xff] %v8931_v46  ;;  %v8936_v32 = vsub.f32 %v8846_v15, %v10169_v14  ;;  %6236 = vmatpush3.bf16.msra.mxu1 %v6235_v38 }
 0x107   :  { %10772 = vst [vmem:[#allocation48_spill] sm:$0xff] %v8926_v36  ;;  %v10774_v1 = vand.u32 4294901760, %v8851_v20  ;;  %6204 = vmatpush3.bf16.msra.mxu0 %v8869_v55  ;;  %v6239_v3 = vpack.c.bf16 %v2159_v2, %v2152_v42  ;;  %v10776_v14 = vand.u32 4294901760, %v8858_v43  ;;  %6238 = vmatprep.subr.bf16.mxu1 %v6237_v62  ;;  %v6245_v38 = vpack.c.bf16 %v8180_v33, %v8156_v63  ;;  %v8988_v2 = vld [vmem:[%s9999_s2 + $0x3b8] sm:$0xff] }
 0x108   :  { %v8907_v41 = vpack.c.bf16 %v10770_v30, %v10768_v22  ;;  %v8948_v30 = vld [vmem:[%s9999_s2 + $0x328] sm:$0xff]  ;;  %6206 = vmatprep.subr.bf16.mxu0 %v8875_v21  ;;  %v2043_v22 = vand.u32 4294901760, %v2042_v7  ;;  %v10782_v51 = vand.u32 4294901760, %v8882_v40  ;;  %v10784_v62 = vand.u32 4294901760, %v8887_v57  ;;  %10785 = vst [vmem:[#allocation51_spill] sm:$0xff] %v8988_v2 }
 0x109   :  { %v8941_v16 = vsub.f32 %v8851_v20, %v10774_v1  ;;  %10775 = vst [vmem:[#allocation49_spill] sm:$0xff] %v8948_v30  ;;  %v8954_v4 = vsub.f32 %v8858_v43, %v10776_v14  ;;  %v10777_v1 = vand.u32 4294901760, %v8863_v24  ;;  %v8970_v14 = vld [vmem:[%s9999_s2 + $0x3b0] sm:$0xff]  ;;  %v10786_v42 = vand.u32 4294901760, %v8895_v6 }
 0x10a   :  { %10779 = vst [vmem:[#allocation50_spill] sm:$0xff] %v8970_v14  ;;  %v8977_v7 = vsub.f32 %v8882_v40, %v10782_v51  ;;  %v8982_v33 = vsub.f32 %v8887_v57, %v10784_v62  ;;  %v10787_v51 = vand.u32 4294901760, %v8900_v8  ;;  %v10180_v62 = vand.u32 4294901760, %v8936_v32  ;;  %6240 = vmatpush3.bf16.msra.mxu1 %v6239_v3  ;;  %v9019_v3 = vld [vmem:[%s9999_s2 + $0x338] sm:$0xff]  ;;  %v9054_v57 = vld [vmem:[%s9999_s2 + $0x3c8] sm:$0xff] }
 0x10b   :  { %v8959_v18 = vsub.f32 %v8863_v24, %v10777_v1  ;;  %v10780_v1 = vld [vmem:[#allocation41_spill] sm:$0xff]  ;;  %v10781_v24 = vld [vmem:[#allocation22_spill] sm:$0xff]  ;;  %6208 = vmatpush3.bf16.msra.mxu0 %v8907_v41  ;;  %v10788_v63 = vand.u32 4294901760, %v8915_v13  ;;  %10790 = vst [vmem:[#allocation53_spill] sm:$0xff] %v9019_v3  ;;  %6274 = vmatprep.subr.bf16.mxu1 %v8677_v23  ;;  %v10792_v20 = vand.u32 4294901760, %v8931_v46  ;;  %10798 = vst [vmem:[#allocation57_spill] sm:$0xff] %v9054_v57 }
 0x10c   :  { %v6247_v43 = vpack.c.bf16 %v10781_v24, %v10780_v1  ;;  %10783 = vst [vmem:[#allocation18_spill] sm:$0xff] %v8977_v7  ;;  %v8993_v24 = vsub.f32 %v8895_v6, %v10786_v42  ;;  %v8998_v1 = vsub.f32 %v8900_v8, %v10787_v51  ;;  %v9014_v51 = vld [vmem:[%s9999_s2 + $0x330] sm:$0xff]  ;;  %6242 = vmatprep.subr.bf16.mxu0 %v6241_v45  ;;  %v10795_v45 = vand.u32 4294901760, %v8948_v30 }
 0x10d   :  { %10778 = vst [vmem:[#allocation10_spill] sm:$0xff] %v8959_v18  ;;  %v9006_v40 = vsub.f32 %v8915_v13, %v10788_v63  ;;  %10789 = vst [vmem:[#allocation52_spill] sm:$0xff] %v9014_v51  ;;  %v10791_v63 = vand.u32 4294901760, %v8926_v36  ;;  %v9030_v6 = vsub.f32 %v8931_v46, %v10792_v20  ;;  %v10793_v13 = vand.u32 4294901760, %v8941_v16  ;;  %v9049_v20 = vld [vmem:[%s9999_s2 + $0x3c0] sm:$0xff]  ;;  %2276 = vmatmul.mubr.f32.vlgmr.msra.gmra.mrb[12].mxu1 %v8785_v37 }
 0x10e   :  { %v9042_v15 = vsub.f32 %v8948_v30, %v10795_v45  ;;  %10797 = vst [vmem:[#allocation56_spill] sm:$0xff] %v9049_v20  ;;  %2044 = vmatmul.mubr.f32.vlgmr.msra.gmra.mrb[12].mxu0 %v2043_v22  ;;  %v9070_v46 = vld [vmem:[%s9999_s2 + $0x340] sm:$0xff]  ;;  %6276 = vmatpush3.bf16.msra.mxu1 %v8684_v56 }
 0x10f   :  { %v9025_v42 = vsub.f32 %v8926_v36, %v10791_v63  ;;  %v9037_v8 = vpack.c.bf16 %v10793_v13, %v10180_v62  ;;  %v10799_v13 = vand.u32 4294901760, %v8954_v4  ;;  %v10800_v62 = vand.u32 4294901760, %v8959_v18  ;;  %10802 = vst [vmem:[#allocation33_spill] sm:$0xff] %v9070_v46  ;;  %6244 = vmatpush3.bf16.msra.mxu0 %v6243_v10  ;;  %v10804_v22 = vld [vmem:[#allocation9_spill] sm:$0xff]  ;;  %6278 = vmatprep.subr.bf16.mxu1 %v8693_v26  ;;  %v9115_v18 = vld [vmem:[%s9999_s2 + $0x3d0] sm:$0xff] }
 0x110   :  { %10796 = vst [vmem:[#allocation55_spill] sm:$0xff] %v9042_v15  ;;  %v10806_v63 = vand.u32 4294901760, %v8970_v14  ;;  %6246 = vmatprep.subr.bf16.mxu0 %v6245_v38  ;;  %v10811_v10 = vand.u32 4294901760, %v8988_v2  ;;  %2411 = vmatprep.mubr.f32.mxu0 %v8639_v59  ;;  %10817 = vst [vmem:[#allocation59_spill] sm:$0xff] %v9115_v18  ;;  %v10822_v38 = vld [vmem:[#allocation66_spill] sm:$0xff] }
 0x111   :  { %10794 = vst [vmem:[#allocation54_spill] sm:$0xff] %v9037_v8  ;;  %v9060_v45 = vpack.c.bf16 %v10800_v62, %v10799_v13  ;;  %v9075_v62 = vld [vmem:[%s9999_s2 + $0x348] sm:$0xff]  ;;  %v10808_v8 = vand.u32 4294901760, %v8977_v7 }
 0x112   :  { %10803 = vst [vmem:[#allocation12_spill] sm:$0xff] %v9075_v62  ;;  %v10805_v13 = vld [vmem:[#allocation61_spill] sm:$0xff]  ;;  %v9083_v30 = vsub.f32 %v8970_v14, %v10806_v63  ;;  %v10813_v63 = vand.u32 4294901760, %v8993_v24  ;;  %v10814_v14 = vand.u32 4294901760, %v8998_v1  ;;  %6280 = vmatpush3.bf16.msra.mxu1 %v8718_v17 }
 0x113   :  { %10801 = vst [vmem:[#allocation58_spill] sm:$0xff] %v9060_v45  ;;  %v6249_v36 = vpack.c.bf16 %v10805_v13, %v10804_v22  ;;  %v10809_v45 = vand.u32 4294901760, %v8982_v33  ;;  %v9095_v22 = vsub.f32 %v8988_v2, %v10811_v10  ;;  %6248 = vmatpush3.bf16.msra.mxu0 %v6247_v43  ;;  %v6251_v13 = vpack.c.bf16 %v8239_v9, %v8234_v11  ;;  %v10842_v2 = vld [vmem:[#allocation68_spill] sm:$0xff] }
 0x114   :  { %10807 = vst [vmem:[#allocation14_spill] sm:$0xff] %v9083_v30  ;;  %v9103_v7 = vpack.c.bf16 %v10814_v14, %v10813_v63  ;;  %v10818_v14 = vand.u32 4294901760, %v9014_v51  ;;  %v10825_v43 = vand.u32 4294901760, %v9006_v40  ;;  %v10826_v10 = vand.u32 4294901760, %v9025_v42  ;;  %6282 = vmatprep.subr.bf16.mxu1 %v8725_v31 }
 0x115   :  { %v9089_v37 = vpack.c.bf16 %v10809_v45, %v10808_v8  ;;  %10812 = vst [vmem:[#allocation27_spill] sm:$0xff] %v9095_v22  ;;  %v10816_v8 = vand.u32 4294901760, %v8639_v59  ;;  %v10820_v59 = vand.u32 4294901760, %v9019_v3  ;;  %6250 = vmatprep.subr.bf16.mxu0 %v6249_v36  ;;  %v10828_v11 = vand.u32 4294901760, %v9049_v20 }
 0x116   :  { %10815 = vst [vmem:[#allocation28_spill] sm:$0xff] %v9103_v7  ;;  %v9120_v63 = vsub.f32 %v9014_v51, %v10818_v14  ;;  %v6253_v7 = vpack.c.bf16 %v10822_v38, %v8245_v39  ;;  %v9137_v14 = vld [vmem:[%s9999_s2 + $0x3d8] sm:$0xff]  ;;  %v9148_v9 = vpack.c.bf16 %v10826_v10, %v10825_v43  ;;  %v10830_v38 = vand.u32 4294901760, %v9054_v57  ;;  %6284 = vmatpush3.bf16.msra.mxu1 %v8753_v0 }
 0x117   :  { %10810 = vst [vmem:[#allocation26_spill] sm:$0xff] %v9089_v37  ;;  %2518 = vmatprep.mubr.f32.mxu1 %v10816_v8  ;;  %v9125_v8 = vsub.f32 %v9019_v3, %v10820_v59  ;;  %10823 = vst [vmem:[#allocation19_spill] sm:$0xff] %v9137_v14  ;;  %v9142_v59 = vld [vmem:[%s9999_s2 + $0x350] sm:$0xff]  ;;  %v9154_v39 = vsub.f32 %v9049_v20, %v10828_v11  ;;  %v9165_v10 = vld [vmem:[%s9999_s2 + $0x358] sm:$0xff]  ;;  %v10833_v36 = vand.u32 4294901760, %v9030_v6  ;;  %v10834_v43 = vand.u32 4294901760, %v9042_v15 }
 0x118   :  { %10819 = vst [vmem:[#allocation15_spill] sm:$0xff] %v9120_v63  ;;  %10824 = vst [vmem:[#allocation29_spill] sm:$0xff] %v9142_v59  ;;  %v9159_v45 = vsub.f32 %v9054_v57, %v10830_v38  ;;  %v10836_v11 = vand.u32 4294901760, %v9070_v46  ;;  %v10838_v38 = vand.u32 4294901760, %v9075_v62  ;;  %6252 = vmatpush3.bf16.msra.mxu0 %v6251_v13  ;;  %v6255_v51 = vpack.c.bf16 %v8290_v52, %v8285_v47  ;;  %v10841_v3 = vld [vmem:[#allocation67_spill] sm:$0xff]  ;;  %v10847_v15 = vld [vmem:[#allocation70_spill] sm:$0xff] }
 0x119   :  { %10821 = vst [vmem:[#allocation35_spill] sm:$0xff] %v9125_v8  ;;  %10827 = vst [vmem:[#allocation31_spill] sm:$0xff] %v9148_v9  ;;  %v9171_v9 = vpack.c.bf16 %v10834_v43, %v10833_v36  ;;  %v6257_v57 = vpack.c.bf16 %v10842_v2, %v10841_v3  ;;  %v10843_v36 = vand.u32 4294901760, %v9083_v30  ;;  %6254 = vmatprep.subr.bf16.mxu0 %v6253_v7  ;;  %6286 = vmatprep.subr.bf16.mxu1 %v8763_v19  ;;  %v9222_v2 = vld [vmem:[%s9999_s2 + $0x360] sm:$0xff]  ;;  %v9227_v3 = vld [vmem:[%s9999_s2 + $0x368] sm:$0xff] }
 0x11a   :  { %10829 = vst [vmem:[#allocation34_spill] sm:$0xff] %v9154_v39  ;;  %10831 = vst [vmem:[#allocation36_spill] sm:$0xff] %v9159_v45  ;;  %v9176_v20 = vsub.f32 %v9070_v46, %v10836_v11  ;;  %v9181_v37 = vsub.f32 %v9075_v62, %v10838_v38  ;;  %v9192_v11 = vld [vmem:[%s9999_s2 + $0x3e0] sm:$0xff]  ;;  %v9197_v38 = vld [vmem:[%s9999_s2 + $0x3e8] sm:$0xff]  ;;  %v10848_v47 = vand.u32 4294901760, %v9115_v18  ;;  %v10852_v7 = vand.u32 4294901760, %v9120_v63  ;;  %6288 = vmatpush3.bf16.msra.mxu1 %v8769_v60 }
 0x11b   :  { %10832 = vst [vmem:[#allocation20_spill] sm:$0xff] %v9165_v10  ;;  %10835 = vst [vmem:[#allocation21_spill] sm:$0xff] %v9171_v9  ;;  %v10844_v9 = vand.u32 4294901760, %v9095_v22  ;;  %v10846_v46 = vld [vmem:[#allocation69_spill] sm:$0xff]  ;;  %v10857_v22 = vand.u32 4294901760, %v9142_v59  ;;  %v9272_v43 = vld [vmem:[%s9999_s2 + $0x370] sm:$0xff]  ;;  %6290 = vmatprep.subr.bf16.mxu1 %v8775_v50 }
 0x11c   :  { %10837 = vst [vmem:[#allocation37_spill] sm:$0xff] %v9176_v20  ;;  %10839 = vst [vmem:[#allocation38_spill] sm:$0xff] %v9181_v37  ;;  %v6259_v13 = vpack.c.bf16 %v10847_v15, %v10846_v46  ;;  %v9217_v52 = vsub.f32 %v9115_v18, %v10848_v47  ;;  %v10853_v15 = vand.u32 4294901760, %v9125_v8  ;;  %v10213_v47 = vand.u32 4294901760, %v9154_v39  ;;  %6256 = vmatpush3.bf16.msra.mxu0 %v6255_v51  ;;  %v9277_v51 = vld [vmem:[%s9999_s2 + $0x378] sm:$0xff] }
 0x11d   :  { %10840 = vst [vmem:[#allocation39_spill] sm:$0xff] %v9197_v38  ;;  %v9209_v62 = vpack.c.bf16 %v10844_v9, %v10843_v36  ;;  %10850 = vst [vmem:[#allocation64_spill] sm:$0xff] %v9222_v2  ;;  %v9247_v63 = vsub.f32 %v9142_v59, %v10857_v22  ;;  %v9254_v36 = vld [vmem:[%s9999_s2 + $0x3f0] sm:$0xff]  ;;  %v9259_v9 = vld [vmem:[%s9999_s2 + $0x3f8] sm:$0xff]  ;;  %6258 = vmatprep.subr.bf16.mxu0 %v6257_v57  ;;  %v6263_v59 = vpack.c.bf16 %v8410_v27, %v8391_v29 }
 0x11e   :  { %10849 = vst [vmem:[#allocation63_spill] sm:$0xff] %v9217_v52  ;;  %10851 = vst [vmem:[#allocation42_spill] sm:$0xff] %v9227_v3  ;;  %v9233_v46 = vpack.c.bf16 %v10853_v15, %v10852_v7  ;;  %v10863_v15 = vld [vmem:[#allocation75_spill] sm:$0xff]  ;;  %v10866_v8 = vand.u32 4294901760, %v9181_v37  ;;  %v10868_v39 = vand.u32 4294901760, %v9192_v11  ;;  %v10869_v57 = vand.u32 4294901760, %v9197_v38  ;;  %6292 = vmatpush3.bf16.msra.mxu1 %v8798_v28 }
 0x11f   :  { %10845 = vst [vmem:[#allocation62_spill] sm:$0xff] %v9209_v62  ;;  %v10855_v62 = vand.u32 4294901760, %v9137_v14  ;;  %10858 = vst [vmem:[#allocation72_spill] sm:$0xff] %v9254_v36  ;;  %v10871_v29 = vand.u32 4294901760, %v9227_v3  ;;  %6294 = vmatprep.subr.bf16.mxu1 %v8804_v12 }
 0x120   :  { %10854 = vst [vmem:[#allocation65_spill] sm:$0xff] %v9233_v46  ;;  %10859 = vst [vmem:[#allocation73_spill] sm:$0xff] %v9259_v9  ;;  %v10861_v46 = vand.u32 4294901760, %v9159_v45  ;;  %6260 = vmatpush3.bf16.msra.mxu0 %v6259_v13  ;;  %v6265_v13 = vpack.c.bf16 %v8420_v58, %v8415_v5  ;;  %v10877_v58 = vand.u32 4294901760, %v9259_v9 }
 0x121   :  { %v9242_v18 = vsub.f32 %v9137_v14, %v10855_v62  ;;  %v10860_v62 = vand.u32 4294901760, %v9165_v10  ;;  %v10865_v14 = vand.u32 4294901760, %v9176_v20  ;;  %v9321_v27 = vsub.f32 %v9227_v3, %v10871_v29 }
 0x122   :  { %v6267_v29 = vpack.c.bf16 %v8434_v25, %v8428_v35  ;;  %v9344_v5 = vsub.f32 %v9259_v9, %v10877_v58  ;;  %v4759_v35 = vld [vmem:[%s10000_s3] ss:$0 sm:$0xff]  ;;  %v10884_v58 = vand.u32 4294901760, %v9277_v51  ;;  %6296 = vmatpush3.bf16.msra.mxu1 %v8828_v61 }
 0x123   :  { %10856 = vst [vmem:[#allocation71_spill] sm:$0xff] %v9242_v18  ;;  %v9265_v22 = vsub.f32 %v9165_v10, %v10860_v62  ;;  %v9283_v62 = vpack.c.bf16 %v10861_v46, %v10213_v47  ;;  %v10864_v10 = vld [vmem:[#allocation77_spill] sm:$0xff]  ;;  %v9294_v30 = vpack.c.bf16 %v10866_v8, %v10865_v14  ;;  %v9299_v46 = vsub.f32 %v9192_v11, %v10868_v39 }
 0x124   :  { %v6261_v7 = vpack.c.bf16 %v10864_v10, %v10863_v15  ;;  %v9304_v10 = vsub.f32 %v9197_v38, %v10869_v57  ;;  %v10870_v39 = vand.u32 4294901760, %v9222_v2  ;;  %v10872_v14 = vand.u32 4294901760, %v9217_v52  ;;  %10878 = vst [vmem:[#allocation9_spill] sm:$0xff] %v9344_v5  ;;  %6298 = vmatprep.subr.bf16.mxu1 %v8834_v49 }
 0x125   :  { %10862 = vst [vmem:[#allocation74_spill] sm:$0xff] %v9283_v62  ;;  %10867 = vst [vmem:[#allocation76_spill] sm:$0xff] %v9294_v30  ;;  %v4793_v30 = vpop.f32.mrb[0].mxu0  ;;  %v4828_v62 = vpop.f32.mrb[0].mxu1  ;;  %v10875_v15 = vand.u32 4294901760, %v9254_v36  ;;  %v10879_v47 = vand.u32 4294901760, %v9247_v63  ;;  %v9363_v9 = vsub.f32 %v9277_v51, %v10884_v58 }
 0x126   :  { %v9316_v57 = vsub.f32 %v9222_v2, %v10870_v39  ;;  %6262 = vmatprep.subr.bf16.mxu0 %v6261_v7  ;;  %v10873_v39 = vand.u32 4294901760, %v9242_v18  ;;  %v4794_v25 = vpop.f32.mrb[1].mxu0  ;;  %v10226_v3 = vand.u32 4294901760, %v9299_v46  ;;  %v10223_v38 = vand.u32 4294901760, %v9321_v27  ;;  %6300 = vmatpush3.bf16.msra.mxu1 %v8869_v55 }
 0x127   :  { %v9339_v7 = vsub.f32 %v9254_v36, %v10875_v15  ;;  %v10882_v15 = vand.u32 4294901760, %v9272_v43  ;;  %10885 = vst [vmem:[#allocation67_spill] sm:$0xff] %v9363_v9  ;;  %6264 = vmatpush3.bf16.msra.mxu0 %v6263_v59  ;;  %6302 = vmatprep.subr.bf16.mxu1 %v8875_v21 }
 0x128   :  { %v9332_v8 = vpack.c.bf16 %v10873_v39, %v10872_v14  ;;  %v10880_v14 = vand.u32 4294901760, %v9265_v22  ;;  %v10224_v2 = vand.u32 4294901760, %v9316_v57  ;;  %6266 = vmatprep.subr.bf16.mxu0 %v6265_v13 }
 0x129   :  { %10876 = vst [vmem:[#allocation22_spill] sm:$0xff] %v9339_v7  ;;  %v9358_v36 = vsub.f32 %v9272_v43, %v10882_v15  ;;  %v6269_v15 = vpack.c.bf16 %v8451_v48, %v8446_v44  ;;  %v10222_v59 = vand.u32 4294901760, %v9339_v7  ;;  %v10219_v44 = vand.u32 4294901760, %v9363_v9 }
 0x12a   :  { %10874 = vst [vmem:[#allocation41_spill] sm:$0xff] %v9332_v8  ;;  %v9350_v39 = vpack.c.bf16 %v10880_v14, %v10879_v47  ;;  %v4829_v8 = vpop.f32.mrb[1].mxu1  ;;  %v10225_v47 = vand.u32 4294901760, %v9304_v10  ;;  %v4795_v14 = vadd.f32 %v4794_v25, %v4793_v30  ;;  %v6271_v25 = vpack.c.bf16 %v8466_v53, %v8456_v34  ;;  %6304 = vmatpush3.bf16.msra.mxu1 %v8907_v41  ;;  %v10890_v34 = vld [vmem:[#allocation78_spill] sm:$0xff] }
 0x12b   :  { %10883 = vst [vmem:[#allocation66_spill] sm:$0xff] %v9358_v36  ;;  %v10220_v48 = vand.u32 4294901760, %v9358_v36  ;;  %6268 = vmatpush3.bf16.msra.mxu0 %v6267_v29  ;;  %6338 = vmatprep.subr.bf16.mxu1 %v8677_v23  ;;  %v10891_v53 = vand.u32 4294901760, %v8815_v54 }
 0x12c   :  { %10881 = vst [vmem:[#allocation61_spill] sm:$0xff] %v9350_v39  ;;  %v4830_v39 = vadd.f32 %v4829_v8, %v4828_v62  ;;  %v9377_v58 = vpack.c.bf16 %v10225_v47, %v10226_v3  ;;  %v322_v30 = vadd.f32 %v4795_v14, %v4759_v35  ;;  %v10221_v62 = vand.u32 4294901760, %v9344_v5  ;;  %6270 = vmatprep.subr.bf16.mxu0 %v6269_v15  ;;  %v10893_v14 = vld [vmem:[#allocation80_spill] sm:$0xff] }
 0x12d   :  { %v9385_v8 = vpack.c.bf16 %v10223_v38, %v10224_v2  ;;  %v9403_v29 = vpack.c.bf16 %v10219_v44, %v10220_v48  ;;  %2522 = vmatmul.mubr.f32.vlgmr.msra.gmra.mrb[14].mxu1 %v10891_v53  ;;  %v10894_v15 = vld [vmem:[#allocation24_spill] sm:$0xff]  ;;  %v10899_v53 = vld [vmem:[#allocation83_spill] sm:$0xff]  ;;  %v10915_v38 = vand.u32 4294901760, %v8982_v33 }
 0x12e   :  { %10886 = vst [vmem:[#allocation68_spill] sm:$0xff] %v9377_v58  ;;  %v554_v13 = vadd.f32 %v4830_v39, %v322_v30  ;;  %v9396_v35 = vpack.c.bf16 %v10221_v62, %v10222_v59  ;;  %v10892_v39 = vld [vmem:[#allocation79_spill] sm:$0xff]  ;;  %6340 = vmatpush3.bf16.msra.mxu1 %v8684_v56  ;;  %2792 = vmatprep.mubr.f32.mxu1 %v10894_v15  ;;  %v10895_v30 = vld [vmem:[#allocation32_spill] sm:$0xff]  ;;  %v10898_v56 = vld [vmem:[#allocation17_spill] sm:$0xff] }
 0x12f   :  { %10887 = vst [vmem:[#allocation69_spill] sm:$0xff] %v9385_v8  ;;  %10889 = vst [vmem:[#allocation75_spill] sm:$0xff] %v9403_v29  ;;  %6272 = vmatpush3.bf16.msra.mxu0 %v6271_v25  ;;  %6342 = vmatprep.subr.bf16.mxu1 %v8693_v26  ;;  %v188_v23 = vcombine.high %v10895_v30, %v10895_v30  ;;  %v10896_v25 = vld [vmem:[#allocation81_spill] sm:$0xff]  ;;  %v10900_v26 = vld [vmem:[#allocation84_spill] sm:$0xff] }
 0x130   :  { %10888 = vst [vmem:[#allocation70_spill] sm:$0xff] %v9396_v35  ;;  %6306 = vmatprep.subr.bf16.mxu0 %v10890_v34  ;;  %v10913_v62 = vld [vmem:[#allocation18_spill] sm:$0xff]  ;;  %v10924_v2 = vld [vmem:[#allocation11_spill] sm:$0xff] }
 0x131   :  { %v9424_v34 = vrot.slane %v188_v23, %v10898_v56  ;;  %v10914_v59 = vand.u32 4294901760, %v10913_v62  ;;  %v10952_v58 = vld [vmem:[#allocation15_spill] sm:$0xff] }
 0x132   :  { %2414 = vmatmul.mubr.f32.vlgmr.msra.gmra.mrb[14].mxu0 %v8815_v54  ;;  %6344 = vmatpush3.bf16.msra.mxu1 %v8718_v17  ;;  %v10897_v54 = vld [vmem:[#allocation82_spill] sm:$0xff] }
 0x133   :  { %6308 = vmatpush3.bf16.msra.mxu0 %v10892_v39  ;;  %2688 = vmatprep.mubr.f32.mxu0 %v10894_v15  ;;  %v204_v39 = vcombine.high %v9424_v34, %v9424_v34  ;;  %v10902_v17 = vld [vmem:[#allocation86_spill] sm:$0xff]  ;;  %v10904_v15 = vld [vmem:[#allocation87_spill] sm:$0xff] }
 0x134   :  { %6310 = vmatprep.subr.bf16.mxu0 %v10893_v14  ;;  %6346 = vmatprep.subr.bf16.mxu1 %v8725_v31  ;;  %v10901_v14 = vld [vmem:[#allocation85_spill] sm:$0xff] }
 0x135   :  { %v9436_v31 = vand.u32 4294901760, %v204_v39 }
 0x136   :  { %6348 = vmatpush3.bf16.msra.mxu1 %v8753_v0  ;;  %v10905_v0 = vld [vmem:[#allocation88_spill] sm:$0xff] }
 0x137   :  { %6312 = vmatpush3.bf16.msra.mxu0 %v10896_v25  ;;  %6350 = vmatprep.subr.bf16.mxu1 %v8763_v19  ;;  %10903 = vst [vmem:[#allocation77_spill] sm:$0xff] %v9436_v31  ;;  %v10906_v19 = vand.u32 4294901760, %v8936_v32  ;;  %v4863_v25 = vpop.f32.mrb[2].mxu0 }
 0x138   :  { %6314 = vmatprep.subr.bf16.mxu0 %v10897_v54  ;;  %v9449_v54 = vsub.f32 %v204_v39, %v9436_v31 }
 0x139   :  { %v3027_v30 = vsub.f32 %v8936_v32, %v10906_v19  ;;  %v10911_v19 = vld [vmem:[#allocation89_spill] sm:$0xff] }
 0x13a   :  { %6352 = vmatpush3.bf16.msra.mxu1 %v8769_v60  ;;  %v10907_v60 = vand.u32 4294901760, %v8941_v16 }
 0x13b   :  { %6316 = vmatpush3.bf16.msra.mxu0 %v10899_v53  ;;  %6354 = vmatprep.subr.bf16.mxu1 %v8775_v50  ;;  %v4898_v50 = vpop.f32.mrb[2].mxu1  ;;  %v4864_v53 = vpop.f32.mrb[3].mxu0  ;;  %v3028_v39 = vand.u32 4294901760, %v3027_v30 }
 0x13c   :  { %6318 = vmatprep.subr.bf16.mxu0 %v10900_v26  ;;  %v3034_v23 = vsub.f32 %v8941_v16, %v10907_v60  ;;  %v4899_v26 = vpop.f32.mrb[3].mxu1  ;;  %v10912_v60 = vld [vmem:[#allocation90_spill] sm:$0xff] }
 0x13d   :  { %v4900_v44 = vadd.f32 %v4899_v26, %v4898_v50 }
 0x13e   :  { %6356 = vmatpush3.bf16.msra.mxu1 %v8798_v28  ;;  %v10908_v28 = vand.u32 4294901760, %v8954_v4  ;;  %v3035_v48 = vand.u32 4294901760, %v3034_v23  ;;  %v10918_v23 = vld [vmem:[#allocation91_spill] sm:$0xff] }
 0x13f   :  { %6320 = vmatpush3.bf16.msra.mxu0 %v10901_v14  ;;  %6358 = vmatprep.subr.bf16.mxu1 %v8804_v12  ;;  %v10909_v12 = vld [vmem:[#allocation10_spill] sm:$0xff] }
 0x140   :  { %6322 = vmatprep.subr.bf16.mxu0 %v10902_v17  ;;  %v2915_v14 = vsub.f32 %v8954_v4, %v10908_v28  ;;  %v10910_v17 = vand.u32 4294901760, %v10909_v12  ;;  %v3041_v28 = vsub.f32 %v10913_v62, %v10914_v59 }
 0x142   :  { %6360 = vmatpush3.bf16.msra.mxu1 %v8828_v61  ;;  %v2916_v50 = vand.u32 4294901760, %v2915_v14  ;;  %v10916_v61 = vand.u32 4294901760, %v8993_v24  ;;  %v10920_v14 = vand.u32 4294901760, %v9025_v42 }
 0x143   :  { %6324 = vmatpush3.bf16.msra.mxu0 %v10904_v15  ;;  %v2922_v15 = vsub.f32 %v10909_v12, %v10910_v17  ;;  %6362 = vmatprep.subr.bf16.mxu1 %v8834_v49  ;;  %v3048_v17 = vsub.f32 %v8982_v33, %v10915_v38  ;;  %v10917_v49 = vand.u32 4294901760, %v8998_v1  ;;  %v10919_v38 = vand.u32 4294901760, %v9006_v40 }
 0x144   :  { %6326 = vmatprep.subr.bf16.mxu0 %v10905_v0  ;;  %v4865_v0 = vadd.f32 %v4864_v53, %v4863_v25 }
 0x145   :  { %v2923_v26 = vand.u32 4294901760, %v2922_v15  ;;  %v2936_v30 = vsub.f32 %v8998_v1, %v10917_v49  ;;  %v3062_v15 = vsub.f32 %v9025_v42, %v10920_v14  ;;  %v10925_v49 = vand.u32 4294901760, %v10924_v2  ;;  %v10933_v2 = vld [vmem:[#allocation60_spill] sm:$0xff] }
 0x146   :  { %v692_v25 = vadd.f32 %v4865_v0, %v554_v13  ;;  %6364 = vmatpush3.bf16.msra.mxu1 %v8869_v55  ;;  %v3055_v13 = vsub.f32 %v9006_v40, %v10919_v38  ;;  %v10921_v0 = vld [vmem:[#allocation43_spill] sm:$0xff]  ;;  %v3042_v55 = vand.u32 4294901760, %v3041_v28  ;;  %v10928_v38 = vld [vmem:[#allocation25_spill] sm:$0xff]  ;;  %v10930_v14 = vand.u32 4294901760, %v9449_v54 }
 0x147   :  { %6328 = vmatpush3.bf16.msra.mxu0 %v10911_v19  ;;  %v2929_v19 = vsub.f32 %v8993_v24, %v10916_v61  ;;  %6366 = vmatprep.subr.bf16.mxu1 %v8875_v21  ;;  %v10929_v53 = vand.u32 4294901760, %v10928_v38  ;;  %v6403_v21 = vpack.c.bf16 %v2923_v26, %v2916_v50  ;;  %v10935_v28 = vld [vmem:[#allocation23_spill] sm:$0xff]  ;;  %v10939_v50 = vld [vmem:[#allocation14_spill] sm:$0xff] }
 0x148   :  { %6330 = vmatprep.subr.bf16.mxu0 %v10912_v60  ;;  %v9475_v59 = vadd.f32 %v4900_v44, %v692_v25  ;;  %v10922_v60 = vld [vmem:[#allocation16_spill] sm:$0xff]  ;;  %v6401_v44 = vpack.c.bf16 %v3035_v48, %v3028_v39  ;;  %v3049_v25 = vand.u32 4294901760, %v3048_v17  ;;  %v2937_v39 = vand.u32 4294901760, %v2936_v30  ;;  %v10937_v38 = vld [vmem:[#allocation55_spill] sm:$0xff] }
 0x149   :  { %v10923_v61 = vand.u32 4294901760, %v10922_v60  ;;  %v10931_v60 = vld [vmem:[#allocation46_spill] sm:$0xff]  ;;  %v2930_v48 = vand.u32 4294901760, %v2929_v19  ;;  %v3056_v17 = vand.u32 4294901760, %v3055_v13  ;;  %v10940_v26 = vand.u32 4294901760, %v10939_v50  ;;  %v10941_v30 = vld [vmem:[#allocation27_spill] sm:$0xff] }
 0x14a   :  { %v10932_v29 = vand.u32 4294901760, %v10931_v60  ;;  %6368 = vmatpush3.bf16.msra.mxu1 %v8907_v41  ;;  %v10942_v41 = vand.u32 4294901760, %v10941_v30 }
 0x14b   :  { %6332 = vmatpush3.bf16.msra.mxu0 %v10918_v23  ;;  %v9489_v47 = vpack.c.bf16 %v10925_v49, %v10923_v61  ;;  %v10926_v23 = vld [vmem:[#allocation45_spill] sm:$0xff]  ;;  %v10934_v61 = vand.u32 4294901760, %v10933_v2  ;;  %6402 = vmatprep.subr.bf16.mxu1 %v6401_v44  ;;  %v3069_v19 = vsub.f32 %v10939_v50, %v10940_v26  ;;  %v10948_v44 = vld [vmem:[#allocation30_spill] sm:$0xff]  ;;  %v10953_v50 = vand.u32 4294901760, %v10952_v58 }
 0x14c   :  { %6334 = vmatprep.subr.bf16.mxu0 %v10921_v0  ;;  %v10927_v3 = vand.u32 4294901760, %v10926_v23  ;;  %v2898_v0 = vsub.f32 %v9449_v54, %v10930_v14  ;;  %v10938_v14 = vand.u32 4294901760, %v10937_v38  ;;  %v3076_v13 = vsub.f32 %v10941_v30, %v10942_v41 }
 0x14d   :  { %v9505_v49 = vpack.c.bf16 %v10934_v61, %v10932_v29  ;;  %v6405_v29 = vpack.c.bf16 %v3049_v25, %v3042_v55  ;;  %v10945_v61 = vld [vmem:[#allocation47_spill] sm:$0xff]  ;;  %v10949_v55 = vand.u32 4294901760, %v10948_v44  ;;  %v10950_v25 = vld [vmem:[#allocation48_spill] sm:$0xff]  ;;  %v2957_v41 = vsub.f32 %v10952_v58, %v10953_v50 }
 0x14e   :  { %v9496_v56 = vpack.c.bf16 %v10929_v53, %v10927_v3  ;;  %v3063_v3 = vand.u32 4294901760, %v3062_v15  ;;  %v10936_v53 = vand.u32 4294901760, %v9030_v6  ;;  %v2950_v60 = vsub.f32 %v10937_v38, %v10938_v14  ;;  %v10943_v15 = vld [vmem:[#allocation40_spill] sm:$0xff] }
 0x14f   :  { %6336 = vmatpush3.bf16.msra.mxu0 %v10935_v28  ;;  %v10944_v2 = vand.u32 4294901760, %v10943_v15  ;;  %v10946_v28 = vand.u32 4294901760, %v10945_v61  ;;  %v2899_v35 = vand.u32 4294901760, %v2898_v0  ;;  %v10947_v14 = vld [vmem:[#allocation44_spill] sm:$0xff]  ;;  %v10951_v8 = vand.u32 4294901760, %v10950_v25  ;;  %v10954_v15 = vld [vmem:[#allocation35_spill] sm:$0xff] }
 0x150   :  { %v2943_v23 = vsub.f32 %v9030_v6, %v10936_v53  ;;  %6370 = vmatprep.subr.bf16.mxu0 %v9489_v47  ;;  %2794 = vmatmul.mubr.f32.vlgmr.msra.gmra.mrb[16].mxu1 %v10947_v14  ;;  %v10955_v30 = vand.u32 4294901760, %v10954_v15  ;;  %v6407_v0 = vpack.c.bf16 %v2937_v39, %v2930_v48  ;;  %v6409_v61 = vpack.c.bf16 %v3063_v3, %v3056_v17 }
 0x151   :  { %v9526_v53 = vpack.c.bf16 %v10946_v28, %v10944_v2  ;;  %v9534_v26 = vpack.c.bf16 %v10951_v8, %v10949_v55  ;;  %6404 = vmatpush3.bf16.msra.mxu1 %v6403_v21  ;;  %v3070_v8 = vand.u32 4294901760, %v3069_v19  ;;  %v3077_v44 = vand.u32 4294901760, %v3076_v13  ;;  %v10956_v55 = vld [vmem:[#allocation34_spill] sm:$0xff]  ;;  %v10961_v21 = vld [vmem:[#allocation49_spill] sm:$0xff]  ;;  %3136 = vmatprep.mubr.f32.mxu1 %v9436_v31 }
 0x152   :  { %2690 = vmatmul.mubr.f32.vlgmr.msra.gmra.mrb[16].mxu0 %v10947_v14  ;;  %v2964_v2 = vsub.f32 %v10954_v15, %v10955_v30  ;;  %v2944_v28 = vand.u32 4294901760, %v2943_v23  ;;  %v2951_v14 = vand.u32 4294901760, %v2950_v60  ;;  %6406 = vmatprep.subr.bf16.mxu1 %v6405_v29  ;;  %v10957_v25 = vand.u32 4294901760, %v10956_v55  ;;  %v10959_v15 = vld [vmem:[#allocation13_spill] sm:$0xff] }
 0x153   :  { %6372 = vmatpush3.bf16.msra.mxu0 %v9496_v56  ;;  %v10958_v58 = vand.u32 4294901760, %v9159_v45  ;;  %v10960_v38 = vand.u32 4294901760, %v10959_v15  ;;  %v10962_v48 = vand.u32 4294901760, %v10961_v21  ;;  %2900 = vmatprep.mubr.f32.mxu0 %v2899_v35  ;;  %v2958_v17 = vand.u32 4294901760, %v2957_v41  ;;  %v10967_v15 = vld [vmem:[#allocation50_spill] sm:$0xff]  ;;  %v10973_v31 = vld [vmem:[#allocation53_spill] sm:$0xff] }
 0x154   :  { %6374 = vmatprep.subr.bf16.mxu0 %v9505_v49  ;;  %v3083_v50 = vsub.f32 %v10956_v55, %v10957_v25  ;;  %v2965_v3 = vand.u32 4294901760, %v2964_v2  ;;  %v10963_v23 = vand.u32 4294901760, %v9176_v20  ;;  %v10964_v29 = vand.u32 4294901760, %v9181_v37  ;;  %v10969_v25 = vld [vmem:[#allocation51_spill] sm:$0xff] }
 0x155   :  { %v3090_v30 = vsub.f32 %v9159_v45, %v10958_v58  ;;  %v9554_v39 = vpack.c.bf16 %v10962_v48, %v10960_v38  ;;  %6408 = vmatpush3.bf16.msra.mxu1 %v6407_v0  ;;  %v6411_v58 = vpack.c.bf16 %v2951_v14, %v2944_v28  ;;  %v10965_v38 = vand.u32 4294901760, %v9217_v52  ;;  %v10971_v14 = vld [vmem:[#allocation52_spill] sm:$0xff] }
 0x156   :  { %v2971_v60 = vsub.f32 %v9176_v20, %v10963_v23  ;;  %v2978_v19 = vsub.f32 %v9181_v37, %v10964_v29  ;;  %v10966_v13 = vand.u32 4294901760, %v9242_v18  ;;  %v10968_v2 = vand.u32 4294901760, %v10967_v15  ;;  %6410 = vmatprep.subr.bf16.mxu1 %v6409_v61  ;;  %v10975_v37 = vld [vmem:[#allocation56_spill] sm:$0xff] }
 0x157   :  { %6376 = vmatpush3.bf16.msra.mxu0 %v9526_v53  ;;  %v3097_v35 = vsub.f32 %v9217_v52, %v10965_v38  ;;  %v10970_v21 = vand.u32 4294901760, %v10969_v25  ;;  %v6413_v23 = vpack.c.bf16 %v3077_v44, %v3070_v8  ;;  %v3084_v0 = vand.u32 4294901760, %v3083_v50 }
 0x158   :  { %v3104_v41 = vsub.f32 %v9242_v18, %v10966_v13  ;;  %6378 = vmatprep.subr.bf16.mxu0 %v9534_v26  ;;  %v3091_v28 = vand.u32 4294901760, %v3090_v30  ;;  %v10972_v29 = vand.u32 4294901760, %v10971_v14  ;;  %v10974_v38 = vand.u32 4294901760, %v10973_v31  ;;  %v10977_v18 = vld [vmem:[#allocation57_spill] sm:$0xff] }
 0x159   :  { %v9575_v48 = vpack.c.bf16 %v10970_v21, %v10968_v2  ;;  %v10976_v13 = vand.u32 4294901760, %v10975_v37  ;;  %v10978_v20 = vand.u32 4294901760, %v10977_v18  ;;  %v6415_v15 = vpack.c.bf16 %v2965_v3, %v2958_v17  ;;  %6412 = vmatpush3.bf16.msra.mxu1 %v6411_v58  ;;  %v10985_v58 = vld [vmem:[#allocation12_spill] sm:$0xff]  ;;  %v10987_v21 = vld [vmem:[#allocation59_spill] sm:$0xff] }
 0x15a   :  { %v9581_v52 = vpack.c.bf16 %v10974_v38, %v10972_v29  ;;  %v2972_v25 = vand.u32 4294901760, %v2971_v60  ;;  %v2979_v2 = vand.u32 4294901760, %v2978_v19  ;;  %v3098_v61 = vand.u32 4294901760, %v3097_v35  ;;  %6414 = vmatprep.subr.bf16.mxu1 %v6413_v23  ;;  %v10983_v60 = vld [vmem:[#allocation33_spill] sm:$0xff]  ;;  %v10989_v29 = vld [vmem:[#allocation19_spill] sm:$0xff] }
 0x15b   :  { %v9587_v45 = vpack.c.bf16 %v10978_v20, %v10976_v13  ;;  %6380 = vmatpush3.bf16.msra.mxu0 %v9554_v39  ;;  %v3105_v8 = vand.u32 4294901760, %v3104_v41  ;;  %v10979_v44 = vand.u32 4294901760, %v9247_v63  ;;  %v10980_v50 = vand.u32 4294901760, %v9265_v22 }
 0x15c   :  { %6382 = vmatprep.subr.bf16.mxu0 %v9575_v48  ;;  %v6417_v18 = vpack.c.bf16 %v3091_v28, %v3084_v0  ;;  %v10981_v20 = vand.u32 4294901760, %v9299_v46  ;;  %v10982_v17 = vand.u32 4294901760, %v9304_v10  ;;  %v10984_v19 = vand.u32 4294901760, %v10983_v60 }
 0x15d   :  { %v2985_v31 = vsub.f32 %v9247_v63, %v10979_v44  ;;  %v2992_v37 = vsub.f32 %v9265_v22, %v10980_v50  ;;  %v10986_v35 = vand.u32 4294901760, %v10985_v58  ;;  %v10988_v14 = vand.u32 4294901760, %v10987_v21  ;;  %6416 = vmatpush3.bf16.msra.mxu1 %v6415_v15  ;;  %v10997_v15 = vld [vmem:[#allocation20_spill] sm:$0xff] }
 0x15e   :  { %v3111_v30 = vsub.f32 %v9299_v46, %v10981_v20  ;;  %v3118_v3 = vsub.f32 %v9304_v10, %v10982_v17  ;;  %v10990_v38 = vand.u32 4294901760, %v10989_v29  ;;  %v9616_v0 = vand.u32 4294901760, %v9424_v34  ;;  %6418 = vmatprep.subr.bf16.mxu1 %v6417_v18 }
 0x15f   :  { %v9607_v41 = vpack.c.bf16 %v10986_v35, %v10984_v19  ;;  %v10991_v28 = vand.u32 4294901760, %v9316_v57  ;;  %v10992_v44 = vand.u32 4294901760, %v9321_v27  ;;  %6384 = vmatpush3.bf16.msra.mxu0 %v9581_v52  ;;  %v6419_v20 = vpack.c.bf16 %v2979_v2, %v2972_v25 }
 0x160   :  { %v9613_v23 = vpack.c.bf16 %v10990_v38, %v10988_v14  ;;  %v6421_v17 = vpack.c.bf16 %v3105_v8, %v3098_v61  ;;  %v2986_v60 = vand.u32 4294901760, %v2985_v31  ;;  %v2993_v19 = vand.u32 4294901760, %v2992_v37  ;;  %6386 = vmatprep.subr.bf16.mxu0 %v9587_v45 }
 0x161   :  { %v2999_v13 = vsub.f32 %v9316_v57, %v10991_v28  ;;  %v3006_v50 = vsub.f32 %v9321_v27, %v10992_v44  ;;  %v3112_v58 = vand.u32 4294901760, %v3111_v30  ;;  %v3119_v35 = vand.u32 4294901760, %v3118_v3  ;;  %v10995_v28 = vld [vmem:[#allocation29_spill] sm:$0xff]  ;;  %6420 = vmatpush3.bf16.msra.mxu1 %v6419_v20 }
 0x162   :  { %v10993_v21 = vand.u32 4294901760, %v9339_v7  ;;  %v10994_v29 = vand.u32 4294901760, %v9344_v5  ;;  %v10996_v44 = vand.u32 4294901760, %v10995_v28  ;;  %v10998_v25 = vand.u32 4294901760, %v10997_v15  ;;  %6422 = vmatprep.subr.bf16.mxu1 %v6421_v17 }
 0x163   :  { %v9640_v61 = vsub.f32 %v9424_v34, %v9616_v0  ;;  %v3000_v8 = vand.u32 4294901760, %v2999_v13  ;;  %v3007_v31 = vand.u32 4294901760, %v3006_v50  ;;  %6388 = vmatpush3.bf16.msra.mxu0 %v9607_v41  ;;  %v6423_v37 = vpack.c.bf16 %v2993_v19, %v2986_v60  ;;  %v11002_v34 = vld [vmem:[#allocation39_spill] sm:$0xff]  ;;  %v4933_v19 = vpop.f32.mrb[4].mxu0 }
 0x164   :  { %v3125_v14 = vsub.f32 %v9339_v7, %v10993_v21  ;;  %v3132_v38 = vsub.f32 %v9344_v5, %v10994_v29  ;;  %v9636_v2 = vpack.c.bf16 %v10998_v25, %v10996_v44  ;;  %v10999_v18 = vand.u32 4294901760, %v9358_v36  ;;  %6390 = vmatprep.subr.bf16.mxu0 %v9613_v23  ;;  %v4968_v44 = vpop.f32.mrb[4].mxu1  ;;  %v4934_v15 = vpop.f32.mrb[5].mxu0  ;;  %v11004_v25 = vld [vmem:[#allocation64_spill] sm:$0xff] }
 0x165   :  { %v11000_v3 = vand.u32 4294901760, %v9363_v9  ;;  %v11001_v29 = vand.u32 4294901760, %v9192_v11  ;;  %v11003_v28 = vand.u32 4294901760, %v11002_v34  ;;  %v6425_v50 = vpack.c.bf16 %v3119_v35, %v3112_v58  ;;  %6424 = vmatpush3.bf16.msra.mxu1 %v6423_v37 }
 0x166   :  { %v3013_v30 = vsub.f32 %v9358_v36, %v10999_v18  ;;  %v3126_v20 = vand.u32 4294901760, %v3125_v14  ;;  %v3133_v60 = vand.u32 4294901760, %v3132_v38  ;;  %v11005_v18 = vand.u32 4294901760, %v11004_v25  ;;  %v11006_v36 = vld [vmem:[#allocation42_spill] sm:$0xff]  ;;  %v11008_v14 = vld [vmem:[#allocation72_spill] sm:$0xff] }
 0x167   :  { %v3020_v21 = vsub.f32 %v9363_v9, %v11000_v3  ;;  %v9654_v13 = vpack.c.bf16 %v11003_v28, %v11001_v29  ;;  %v11007_v5 = vand.u32 4294901760, %v11006_v36  ;;  %v4969_v9 = vpop.f32.mrb[5].mxu1  ;;  %v2903_v11 = vand.u32 4294901760, %v9640_v61  ;;  %6392 = vmatpush3.bf16.msra.mxu0 %v9636_v2  ;;  %v11010_v29 = vld [vmem:[#allocation73_spill] sm:$0xff]  ;;  %6426 = vmatprep.subr.bf16.mxu1 %v6425_v50 }
 0x168   :  { %v6427_v7 = vpack.c.bf16 %v3007_v31, %v3000_v8  ;;  %v4935_v34 = vadd.f32 %v4934_v15, %v4933_v19  ;;  %v4970_v17 = vadd.f32 %v4969_v9, %v4968_v44  ;;  %v3014_v58 = vand.u32 4294901760, %v3013_v30  ;;  %v11023_v44 = vld [vmem:[#allocation63_spill] sm:$0xff] }
 0x169   :  { %v9660_v3 = vpack.c.bf16 %v11007_v5, %v11005_v18  ;;  %v3021_v35 = vand.u32 4294901760, %v3020_v21  ;;  %6394 = vmatprep.subr.bf16.mxu0 %v9654_v13  ;;  %v11009_v38 = vand.u32 4294901760, %v11008_v14  ;;  %v11011_v28 = vand.u32 4294901760, %v11010_v29  ;;  %v11024_v15 = vld [vmem:[#allocation71_spill] sm:$0xff] }
 0x16a   :  { %v6429_v5 = vpack.c.bf16 %v3133_v60, %v3126_v20  ;;  %v968_v25 = vadd.f32 %v4935_v34, %v9475_v59  ;;  %v2904_v8 = vsub.f32 %v9640_v61, %v2903_v11  ;;  %v11012_v31 = vand.u32 4294901760, %v9272_v43  ;;  %6428 = vmatpush3.bf16.msra.mxu1 %v6427_v7  ;;  %v11022_v60 = vld [vmem:[#allocation38_spill] sm:$0xff] }
 0x16b   :  { %v9669_v36 = vpack.c.bf16 %v11011_v28, %v11009_v38  ;;  %6396 = vmatpush3.bf16.msra.mxu0 %v9660_v3  ;;  %v11013_v37 = vand.u32 4294901760, %v9277_v51  ;;  %v6431_v21 = vpack.c.bf16 %v3021_v35, %v3014_v58  ;;  %v6433_v59 = vpack.c.bf16 %v8941_v16, %v8936_v32 }
 0x16c   :  { %v1072_v9 = vadd.f32 %v4970_v17, %v968_v25  ;;  %6430 = vmatprep.subr.bf16.mxu1 %v6429_v5  ;;  %v2905_v50 = vand.u32 4294901760, %v2904_v8  ;;  %v6435_v20 = vpack.c.bf16 %v10909_v12, %v8954_v4  ;;  %v6437_v43 = vpack.c.bf16 %v8982_v33, %v10913_v62  ;;  %v11015_v33 = vld [vmem:[#allocation55_spill] sm:$0xff]  ;;  %v11027_v25 = vld [vmem:[#allocation66_spill] sm:$0xff] }
 0x16d   :  { %v9680_v30 = vpack.c.bf16 %v11013_v37, %v11012_v31  ;;  %6398 = vmatprep.subr.bf16.mxu0 %v9669_v36  ;;  %v6439_v32 = vpack.c.bf16 %v8998_v1, %v8993_v24  ;;  %v6441_v4 = vpack.c.bf16 %v9025_v42, %v9006_v40  ;;  %v11014_v16 = vand.u32 4294901760, %v9449_v54  ;;  %v11016_v24 = vld [vmem:[#allocation14_spill] sm:$0xff]  ;;  %v11017_v1 = vld [vmem:[#allocation27_spill] sm:$0xff]  ;;  %v11032_v37 = vld [vmem:[#allocation77_spill] sm:$0xff] }
 0x16e   :  { %6432 = vmatpush3.bf16.msra.mxu1 %v6431_v21  ;;  %v6443_v51 = vpack.c.bf16 %v11015_v33, %v9030_v6  ;;  %v6445_v7 = vpack.c.bf16 %v11017_v1, %v11016_v24  ;;  %v11018_v40 = vld [vmem:[#allocation15_spill] sm:$0xff]  ;;  %v11021_v6 = vld [vmem:[#allocation37_spill] sm:$0xff]  ;;  %v6453_v18 = vpack.c.bf16 %v11024_v15, %v11023_v44  ;;  %v6455_v34 = vpack.c.bf16 %v9265_v22, %v9247_v63  ;;  %v11025_v63 = vld [vmem:[#allocation22_spill] sm:$0xff] }
 0x16f   :  { %6400 = vmatpush3.bf16.msra.mxu0 %v9680_v30  ;;  %6466 = vmatprep.subr.bf16.mxu1 %v9489_v47  ;;  %v11019_v42 = vld [vmem:[#allocation35_spill] sm:$0xff]  ;;  %v6451_v19 = vpack.c.bf16 %v11022_v60, %v11021_v6  ;;  %v6459_v29 = vpack.c.bf16 %v9321_v27, %v9316_v57  ;;  %v11026_v22 = vld [vmem:[#allocation9_spill] sm:$0xff]  ;;  %v11029_v27 = vld [vmem:[#allocation54_spill] sm:$0xff] }
 0x170   :  { %6434 = vmatprep.subr.bf16.mxu0 %v6433_v59  ;;  %v6447_v62 = vpack.c.bf16 %v11019_v42, %v11018_v40  ;;  %v6461_v5 = vpack.c.bf16 %v11026_v22, %v11025_v63  ;;  %v11028_v8 = vld [vmem:[#allocation67_spill] sm:$0xff]  ;;  %v11030_v57 = vld [vmem:[#allocation58_spill] sm:$0xff]  ;;  %v11033_v21 = vld [vmem:[#allocation28_spill] sm:$0xff] }
 0x171   :  { %3138 = vmatmul.mubr.f32.vlgmr.msra.gmra.mrb[18].mxu1 %v9616_v0  ;;  %v6463_v31 = vpack.c.bf16 %v11028_v8, %v11027_v25 }
 0x172   :  { %2906 = vmatmul.mubr.f32.vlgmr.msra.gmra.mrb[18].mxu0 %v2905_v50  ;;  %6468 = vmatpush3.bf16.msra.mxu1 %v9496_v56 }
 0x173   :  { %6436 = vmatpush3.bf16.msra.mxu0 %v6435_v20  ;;  %6470 = vmatprep.subr.bf16.mxu1 %v9505_v49 }
 0x174   :  { %6438 = vmatprep.subr.bf16.mxu0 %v6437_v43  ;;  %3273 = vmatprep.mubr.f32.mxu0 %v9449_v54  ;;  %v11020_v54 = vld [vmem:[#allocation36_spill] sm:$0xff]  ;;  %v11041_v43 = vld [vmem:[#allocation61_spill] sm:$0xff] }
 0x175   :  { %3380 = vmatprep.mubr.f32.mxu1 %v11014_v16  ;;  %v6449_v12 = vpack.c.bf16 %v11020_v54, %v10956_v55  ;;  %v6457_v55 = vpack.c.bf16 %v9304_v10, %v9299_v46  ;;  %v11045_v16 = vld [vmem:[#allocation75_spill] sm:$0xff] }
 0x176   :  { %6472 = vmatpush3.bf16.msra.mxu1 %v9526_v53 }
 0x177   :  { %6440 = vmatpush3.bf16.msra.mxu0 %v6439_v32  ;;  %6474 = vmatprep.subr.bf16.mxu1 %v9534_v26  ;;  %v11042_v32 = vld [vmem:[#allocation68_spill] sm:$0xff] }
 0x178   :  { %6442 = vmatprep.subr.bf16.mxu0 %v6441_v4 }
 0x17a   :  { %6476 = vmatpush3.bf16.msra.mxu1 %v9554_v39  ;;  %v5038_v58 = vpop.f32.mrb[6].mxu1 }
 0x17b   :  { %6444 = vmatpush3.bf16.msra.mxu0 %v6443_v51  ;;  %6478 = vmatprep.subr.bf16.mxu1 %v9575_v48  ;;  %v5039_v14 = vpop.f32.mrb[7].mxu1 }
 0x17c   :  { %6446 = vmatprep.subr.bf16.mxu0 %v6445_v7  ;;  %v5003_v17 = vpop.f32.mrb[6].mxu0  ;;  %v5040_v28 = vadd.f32 %v5039_v14, %v5038_v58  ;;  %v11046_v58 = vld [vmem:[#allocation17_spill] sm:$0xff] }
 0x17d   :  { %v5004_v35 = vpop.f32.mrb[7].mxu0 }
 0x17e   :  { %6480 = vmatpush3.bf16.msra.mxu1 %v9581_v52  ;;  %v5005_v38 = vadd.f32 %v5004_v35, %v5003_v17 }
 0x17f   :  { %6448 = vmatpush3.bf16.msra.mxu0 %v6447_v62  ;;  %6482 = vmatprep.subr.bf16.mxu1 %v9587_v45 }
 0x180   :  { %6450 = vmatprep.subr.bf16.mxu0 %v6449_v12  ;;  %v1184_v46 = vadd.f32 %v5005_v38, %v1072_v9  ;;  %v11031_v9 = vld [vmem:[#allocation26_spill] sm:$0xff] }
 0x182   :  { %6484 = vmatpush3.bf16.msra.mxu1 %v9607_v41  ;;  %v1416_v10 = vadd.f32 %v5040_v28, %v1184_v46  ;;  %v6665_v28 = vld [vmem:[%s9998_s1 + $0x8] sm:$0xff] }
 0x183   :  { %6452 = vmatpush3.bf16.msra.mxu0 %v6451_v19  ;;  %6486 = vmatprep.subr.bf16.mxu1 %v9613_v23  ;;  %v4161_v63 = vmul.f32 %v6665_v28, %v6665_v28 }
 0x184   :  { %6454 = vmatprep.subr.bf16.mxu0 %v6453_v18 }
 0x185   :  { %v4181_v25 = vcombine.high %v4161_v63, %v4161_v63  ;;  %v4188_v8 = vrot.slane %v4161_v63, %v11046_v58 }
 0x186   :  { %6488 = vmatpush3.bf16.msra.mxu1 %v9636_v2 }
 0x187   :  { %6456 = vmatpush3.bf16.msra.mxu0 %v6455_v34  ;;  %6490 = vmatprep.subr.bf16.mxu1 %v9654_v13 }
 0x188   :  { %6458 = vmatprep.subr.bf16.mxu0 %v6457_v55 }
 0x18a   :  { %6492 = vmatpush3.bf16.msra.mxu1 %v9660_v3 }
 0x18b   :  { %6460 = vmatpush3.bf16.msra.mxu0 %v6459_v29  ;;  %6494 = vmatprep.subr.bf16.mxu1 %v9669_v36 }
 0x18c   :  { %6462 = vmatprep.subr.bf16.mxu0 %v6461_v5 }
 0x18e   :  { %6496 = vmatpush3.bf16.msra.mxu1 %v9680_v30 }
 0x18f   :  { %6464 = vmatpush3.bf16.msra.mxu0 %v6463_v31  ;;  %6530 = vmatprep.subr.bf16.mxu1 %v9489_v47  ;;  %v11034_v47 = vld [vmem:[#allocation31_spill] sm:$0xff] }
 0x190   :  { %6498 = vmatprep.subr.bf16.mxu0 %v11029_v27 }
 0x191   :  { %3384 = vmatmul.mubr.f32.vlgmr.msra.gmra.mrb[20].mxu1 %v2903_v11  ;;  %v11038_v11 = vld [vmem:[#allocation74_spill] sm:$0xff] }
 0x192   :  { %3276 = vmatmul.mubr.f32.vlgmr.msra.gmra.mrb[20].mxu0 %v9640_v61  ;;  %6532 = vmatpush3.bf16.msra.mxu1 %v9496_v56  ;;  %v11035_v61 = vld [vmem:[#allocation21_spill] sm:$0xff]  ;;  %v11036_v56 = vld [vmem:[#allocation62_spill] sm:$0xff] }
 0x193   :  { %6500 = vmatpush3.bf16.msra.mxu0 %v11030_v57  ;;  %6534 = vmatprep.subr.bf16.mxu1 %v9505_v49  ;;  %v11037_v49 = vld [vmem:[#allocation65_spill] sm:$0xff] }
 0x194   :  { %6502 = vmatprep.subr.bf16.mxu0 %v11031_v9  ;;  %3550 = vmatprep.mubr.f32.mxu0 %v11032_v37  ;;  %v4195_v9 = vrot.slane %v4181_v25, %v11046_v58 }
 0x195   :  { %3654 = vmatprep.mubr.f32.mxu1 %v11032_v37  ;;  %v4196_v37 = vcombine.high %v4188_v8, %v4188_v8 }
 0x196   :  { %6536 = vmatpush3.bf16.msra.mxu1 %v9526_v53  ;;  %v11039_v53 = vld [vmem:[#allocation76_spill] sm:$0xff] }
 0x197   :  { %6504 = vmatpush3.bf16.msra.mxu0 %v11033_v21  ;;  %6538 = vmatprep.subr.bf16.mxu1 %v9534_v26  ;;  %v11040_v26 = vld [vmem:[#allocation41_spill] sm:$0xff] }
 0x198   :  { %6506 = vmatprep.subr.bf16.mxu0 %v11034_v47 }
 0x19a   :  { %6540 = vmatpush3.bf16.msra.mxu1 %v9554_v39 }
 0x19b   :  { %6508 = vmatpush3.bf16.msra.mxu0 %v11035_v61  ;;  %6542 = vmatprep.subr.bf16.mxu1 %v9575_v48  ;;  %v4214_v61 = vsel %vm4206_vm0, %v4188_v8, 0.0 }
 0x19c   :  { %6510 = vmatprep.subr.bf16.mxu0 %v11036_v56 }
 0x19d   :  { %v5108_v59 = vpop.f32.mrb[8].mxu1 }
 0x19e   :  { %6544 = vmatpush3.bf16.msra.mxu1 %v9581_v52  ;;  %v5109_v48 = vpop.f32.mrb[9].mxu1 }
 0x19f   :  { %6512 = vmatpush3.bf16.msra.mxu0 %v11037_v49  ;;  %6546 = vmatprep.subr.bf16.mxu1 %v9587_v45  ;;  %v5110_v52 = vadd.f32 %v5109_v48, %v5108_v59  ;;  %v4197_v49 = vcombine.high %v4195_v9, %v4195_v9 }
 0x1a0   :  { %6514 = vmatprep.subr.bf16.mxu0 %v11038_v11  ;;  %v4216_v11 = vsel %vm4206_vm0, %v4196_v37, 0.0 }
 0x1a1   :  { %v5073_v39 = vpop.f32.mrb[8].mxu0  ;;  %v4220_v59 = vsel %vm4206_vm0, %v4197_v49, 0.0 }
 0x1a2   :  { %6548 = vmatpush3.bf16.msra.mxu1 %v9607_v41  ;;  %v5074_v50 = vpop.f32.mrb[9].mxu0  ;;  %v11043_v41 = vld [vmem:[#allocation69_spill] sm:$0xff] }
 0x1a3   :  { %6516 = vmatpush3.bf16.msra.mxu0 %v11039_v53  ;;  %6550 = vmatprep.subr.bf16.mxu1 %v9613_v23  ;;  %v5075_v20 = vadd.f32 %v5074_v50, %v5073_v39  ;;  %v11044_v23 = vld [vmem:[#allocation70_spill] sm:$0xff] }
 0x1a4   :  { %6518 = vmatprep.subr.bf16.mxu0 %v11040_v26  ;;  %v4218_v26 = vsel %vm4206_vm0, %v4195_v9, 0.0 }
 0x1a5   :  { %v1554_v45 = vadd.f32 %v5075_v20, %v1416_v10  ;;  %v6715_v10 = vmov 0.0|0.0   ;;  %v158_v20 = vld [vmem:[%s10001_s4] sm:$0xff] }
 0x1a6   :  { %6552 = vmatpush3.bf16.msra.mxu1 %v9636_v2 }
 0x1a7   :  { %6520 = vmatpush3.bf16.msra.mxu0 %v11041_v43  ;;  %6554 = vmatprep.subr.bf16.mxu1 %v9654_v13  ;;  %v1662_v4 = vadd.f32 %v5110_v52, %v1554_v45  ;;  %v159_v43 = vld [vmem:[%s10001_s4 + $0x8] sm:$0xff]  ;;  %v3674_v52 = vand.u32 4294901760, %v158_v20 }
 0x1a8   :  { %6522 = vmatprep.subr.bf16.mxu0 %v11042_v32  ;;  %v3677_v32 = vand.u32 4294901760, %v159_v43 }
 0x1aa   :  { %6556 = vmatpush3.bf16.msra.mxu1 %v9660_v3  ;;  %v9803_v45 = vpack.c.bf16 %v3677_v32, %v3674_v52 }
 0x1ab   :  { %6524 = vmatpush3.bf16.msra.mxu0 %v11043_v41  ;;  %6558 = vmatprep.subr.bf16.mxu1 %v9669_v36  ;;  %v9805_v41 = vsub.f32 %v158_v20, %v3674_v52 }
 0x1ac   :  { %6526 = vmatprep.subr.bf16.mxu0 %v11044_v23  ;;  %v160_v23 = vld [vmem:[%s10001_s4 + $0x10] sm:$0xff] }
 0x1ae   :  { %6560 = vmatpush3.bf16.msra.mxu1 %v9680_v30 }
 0x1af   :  { %6528 = vmatpush3.bf16.msra.mxu0 %v11045_v16  ;;  %6597 = vmatprep.subr.bf16.mxu1 %v6715_v10  ;;  %v161_v16 = vld [vmem:[%s10001_s4 + $0x18] sm:$0xff] }
 0x1b0   :  { %6561 = vmatprep.subr.bf16.mxu0 %v6715_v10 }
 0x1b1   :  { %3656 = vmatmul.mubr.f32.vlgmr.msra.gmra.mrb[22].mxu1 %v9616_v0 }
 0x1b2   :  { %3552 = vmatmul.mubr.f32.vlgmr.msra.gmra.mrb[22].mxu0 %v9616_v0  ;;  %v6664_v0 = vld [vmem:[%s9998_s1] sm:$0xff] }
 0x1b3   :  { %v4160_v44 = vmul.f32 %v6664_v0, %v6664_v0  ;;  %6563 = vmatpush3.bf16.msra.mxu0 %v9803_v45 }
 0x1b4   :  { %6564 = vmatprep.subr.bf16.mxu0 %v6715_v10 }
 0x1b5   :  { %v4171_v35 = vrot.slane %v4160_v44, %v11046_v58  ;;  %v4164_v38 = vcombine.high %v4160_v44, %v4160_v44 }
 0x1b7   :  { %v4179_v29 = vcombine.high %v4171_v35, %v4171_v35  ;;  %v4178_v22 = vrot.slane %v4164_v38, %v11046_v58  ;;  %v4207_v5 = vsel %vm4206_vm0, %v4171_v35, 0.0 }
 0x1b9   :  { %v4208_v46 = vsel %vm4206_vm0, %v4179_v29, 0.0  ;;  %v4180_v27 = vcombine.high %v4178_v22, %v4178_v22  ;;  %v4210_v57 = vsel %vm4206_vm0, %v4178_v22, 0.0 }
 0x1ba   :  { %v4209_v31 = vadd.f32 %v4208_v46, %v4207_v5 }
 0x1bb   :  { %v4212_v47 = vsel %vm4206_vm0, %v4180_v27, 0.0 }
 0x1bc   :  { %v4211_v21 = vadd.f32 %v4210_v57, %v4209_v31 }
 0x1be   :  { %v5178_v13 = vpop.f32.mrb[10].mxu1  ;;  %v4213_v56 = vadd.f32 %v4212_v47, %v4211_v21 }
 0x1bf   :  { %v5179_v51 = vpop.f32.mrb[11].mxu1 }
 0x1c0   :  { %v5180_v1 = vadd.f32 %v5179_v51, %v5178_v13  ;;  %v4215_v53 = vadd.f32 %v4214_v61, %v4213_v56  ;;  %v4232_v13 = vmul.f32 %v159_v43, %v159_v43  ;;  %v3683_v51 = vand.u32 4294901760, %v161_v16 }
 0x1c1   :  { %v5143_v2 = vpop.f32.mrb[10].mxu0 }
 0x1c2   :  { %v5144_v33 = vpop.f32.mrb[11].mxu0  ;;  %v4217_v39 = vadd.f32 %v4216_v11, %v4215_v53 }
 0x1c3   :  { %v5145_v24 = vadd.f32 %v5144_v33, %v5143_v2  ;;  %v4231_v2 = vmul.f32 %v158_v20, %v158_v20  ;;  %v3680_v33 = vand.u32 4294901760, %v160_v23 }
 0x1c4   :  { %v4219_v50 = vadd.f32 %v4218_v26, %v4217_v39 }
 0x1c5   :  { %v1830_v7 = vadd.f32 %v5145_v24, %v1662_v4  ;;  %v9807_v4 = vsub.f32 %v159_v43, %v3677_v32  ;;  %v6717_v24 = vmov 0.0  }
 0x1c6   :  { %v4221_v48 = vadd.f32 %v4220_v59, %v4219_v50  ;;  %5669 = vmatprep.mubr.msk.f32.mxu0 %vm6716_vm1, %v6717_v24  ;;  %5735 = vmatprep.mubr.msk.f32.mxu1 %vm6716_vm1, %v6717_v24 }
 0x1c7   :  { %v1934_v3 = vadd.f32 %v5180_v1, %v1830_v7  ;;  %v3755_v1 = vand.u32 4294901760, %v9805_v41  ;;  %v3762_v7 = vand.u32 4294901760, %v9807_v4 }
 0x1c8   :  { %4222 = vadd.xlane.f32.xlu0 %v4221_v48 }
 0x1c9   :  { %v3763_v0 = vsub.f32 %v9807_v4, %v3762_v7 }
 0x1cb   :  { %v3764_v38 = vand.u32 4294901760, %v3763_v0 }
 0x1e0   :  { %v5248_v42 = vpop.f32.mrb[12].mxu1 }
 0x1e1   :  { %v5213_v40 = vpop.f32.mrb[12].mxu0  ;;  %v5249_v36 = vpop.f32.mrb[13].mxu1 }
 0x1e2   :  { %v5214_v62 = vpop.f32.mrb[13].mxu0  ;;  %v5250_v12 = vadd.f32 %v5249_v36, %v5248_v42  ;;  %v9823_v42 = vpack.c.bf16 %v3683_v51, %v3680_v33  ;;  %v9827_v36 = vsub.f32 %v161_v16, %v3683_v51 }
 0x1e3   :  { %v5215_v54 = vadd.f32 %v5214_v62, %v5213_v40  ;;  %v4242_v40 = vand.u32 4294901760, %v4232_v13  ;;  %v9825_v62 = vsub.f32 %v160_v23, %v3680_v33 }
 0x1e4   :  { %6566 = vmatpush3.bf16.msra.mxu0 %v9823_v42  ;;  %v3776_v29 = vand.u32 4294901760, %v9827_v36 }
 0x1e5   :  { %v2046_v6 = vadd.f32 %v5215_v54, %v1934_v3  ;;  %v4239_v3 = vand.u32 4294901760, %v4231_v2  ;;  %v3756_v54 = vsub.f32 %v9805_v41, %v3755_v1  ;;  %6567 = vmatprep.subr.bf16.mxu0 %v6715_v10  ;;  %v6577_v48 = vpack.c.bf16 %v9827_v36, %v9825_v62 }
 0x1e6   :  { %v3777_v8 = vsub.f32 %v9827_v36, %v3776_v29 }
 0x1e7   :  { %v2278_v30 = vadd.f32 %v5250_v12, %v2046_v6 }
 0x1e8   :  { %v3778_v47 = vand.u32 4294901760, %v3777_v8 }
 0x200   :  { %v5318_v19 = vpop.f32.mrb[14].mxu1 }
 0x201   :  { %v5319_v18 = vpop.f32.mrb[15].mxu1 }
 0x202   :  { %v5320_v55 = vadd.f32 %v5319_v18, %v5318_v19  ;;  %v9836_v19 = vsub.f32 %v4232_v13, %v4242_v40  ;;  %v3757_v18 = vand.u32 4294901760, %v3756_v54 }
 0x204   :  { %v9848_v25 = vpack.c.bf16 %v3764_v38, %v3757_v18  ;;  %v4327_v31 = vand.u32 4294901760, %v9836_v19 }
 0x205   :  { %v5283_v60 = vpop.f32.mrb[14].mxu0 }
 0x206   :  { %v5284_v15 = vpop.f32.mrb[15].mxu0  ;;  %v4328_v56 = vsub.f32 %v9836_v19, %v4327_v31 }
 0x207   :  { %v5285_v34 = vadd.f32 %v5284_v15, %v5283_v60  ;;  %v9834_v60 = vsub.f32 %v4231_v2, %v4239_v3  ;;  %v9880_v2 = vpack.c.bf16 %v3762_v7, %v3755_v1 }
 0x208   :  { %v4329_v39 = vand.u32 4294901760, %v4328_v56 }
 0x209   :  { %v2416_v17 = vadd.f32 %v5285_v34, %v2278_v30  ;;  %v9832_v30 = vpack.c.bf16 %v4242_v40, %v4239_v3  ;;  %v4233_v34 = vmul.f32 %v160_v23, %v160_v23  ;;  %v4320_v5 = vand.u32 4294901760, %v9834_v60 }
 0x20a   :  { %v6610_v32 = vpack.c.bf16 %v9836_v19, %v9834_v60 }
 0x20b   :  { %v9779_v14 = vadd.f32 %v5320_v55, %v2416_v17  ;;  %v4234_v55 = vmul.f32 %v161_v16, %v161_v16  ;;  %v3769_v17 = vand.u32 4294901760, %v9825_v62  ;;  %6599 = vmatpush3.bf16.msra.mxu1 %v9832_v30  ;;  %v4245_v28 = vand.u32 4294901760, %v4233_v34 }
 0x20c   :  { %6600 = vmatprep.subr.bf16.mxu1 %v6715_v10  ;;  %v4321_v61 = vsub.f32 %v9834_v60, %v4320_v5  ;;  %v9884_v33 = vpack.c.bf16 %v4327_v31, %v4320_v5 }
 0x20d   :  { %v4248_v63 = vand.u32 4294901760, %v4234_v55  ;;  %v3770_v22 = vsub.f32 %v9825_v62, %v3769_v17  ;;  %v9854_v57 = vsub.f32 %v4233_v34, %v4245_v28  ;;  %v9882_v13 = vpack.c.bf16 %v3776_v29, %v3769_v17 }
 0x20e   :  { %v4322_v26 = vand.u32 4294901760, %v4321_v61 }
 0x20f   :  { %v9852_v27 = vpack.c.bf16 %v4248_v63, %v4245_v28  ;;  %v9856_v9 = vsub.f32 %v4234_v55, %v4248_v63  ;;  %v3771_v37 = vand.u32 4294901760, %v3770_v22  ;;  %v4334_v49 = vand.u32 4294901760, %v9854_v57 }
 0x210   :  { %v6604_v20 = vpack.c.bf16 %v4329_v39, %v4322_v26 }
 0x211   :  { %6602 = vmatpush3.bf16.msra.mxu1 %v9852_v27  ;;  %v4341_v11 = vand.u32 4294901760, %v9856_v9  ;;  %v9865_v53 = vpack.c.bf16 %v3778_v47, %v3771_v37  ;;  %v4335_v59 = vsub.f32 %v9854_v57, %v4334_v49  ;;  %v6613_v16 = vpack.c.bf16 %v9856_v9, %v9854_v57 }
 0x212   :  { %6603 = vmatprep.subr.bf16.mxu1 %v6715_v10 }
 0x213   :  { %v4342_v50 = vsub.f32 %v9856_v9, %v4341_v11  ;;  %v4336_v43 = vand.u32 4294901760, %v4335_v59  ;;  %v9886_v51 = vpack.c.bf16 %v4341_v11, %v4334_v49 }
 0x215   :  { %v4343_v52 = vand.u32 4294901760, %v4342_v50 }
 0x217   :  { %v9874_v23 = vpack.c.bf16 %v4343_v52, %v4336_v43 }
 0x223   :  { %v5388_v6 = vpop.f32.mrb[16].mxu1 }
 0x224   :  { %v5389_v15 = vpop.f32.mrb[17].mxu1 }
 0x225   :  { %v5353_v12 = vpop.f32.mrb[16].mxu0  ;;  %v5390_v35 = vadd.f32 %v5389_v15, %v5388_v6 }
 0x226   :  { %v5354_v44 = vpop.f32.mrb[17].mxu0 }
 0x227   :  { %v5355_v58 = vadd.f32 %v5354_v44, %v5353_v12 }
 0x229   :  { %v2692_v46 = vadd.f32 %v5355_v58, %v9779_v14  ;;  %v6574_v14 = vpack.c.bf16 %v9807_v4, %v9805_v41  ;;  %v4760_v41 = vld [vmem:[%s10002_s5] ss:$0 sm:$0xff] }
 0x22b   :  { %v2796_v21 = vadd.f32 %v5390_v35, %v2692_v46 }
 0x244   :  { %v5458_v40 = vpop.f32.mrb[18].mxu1 }
 0x245   :  { %v5423_v3 = vpop.f32.mrb[18].mxu0  ;;  %v5459_v12 = vpop.f32.mrb[19].mxu1 }
 0x246   :  { %v5424_v54 = vpop.f32.mrb[19].mxu0  ;;  %v5460_v0 = vadd.f32 %v5459_v12, %v5458_v40 }
 0x247   :  { %v5425_v6 = vadd.f32 %v5424_v54, %v5423_v3 }
 0x249   :  { %v2908_v44 = vadd.f32 %v5425_v6, %v2796_v21 }
 0x24b   :  { %v3140_v15 = vadd.f32 %v5460_v0, %v2908_v44 }
 0x264   :  { %v5528_v34 = vpop.f32.mrb[20].mxu1 }
 0x265   :  { %v5493_v18 = vpop.f32.mrb[20].mxu0  ;;  %v5529_v58 = vpop.f32.mrb[21].mxu1 }
 0x266   :  { %v5494_v55 = vpop.f32.mrb[21].mxu0  ;;  %v5530_v7 = vadd.f32 %v5529_v58, %v5528_v34 }
 0x267   :  { %v5495_v1 = vadd.f32 %v5494_v55, %v5493_v18 }
 0x269   :  { %v3278_v17 = vadd.f32 %v5495_v1, %v3140_v15 }
 0x26b   :  { %v3386_v35 = vadd.f32 %v5530_v7, %v3278_v17 }
 0x284   :  { %v5598_v29 = vpop.f32.mrb[22].mxu1 }
 0x285   :  { %v5563_v38 = vpop.f32.mrb[22].mxu0  ;;  %v5599_v63 = vpop.f32.mrb[23].mxu1 }
 0x286   :  { %v5564_v28 = vpop.f32.mrb[23].mxu0  ;;  %v5600_v5 = vadd.f32 %v5599_v63, %v5598_v29 }
 0x287   :  { %v5565_v22 = vadd.f32 %v5564_v28, %v5563_v38 }
 0x289   :  { %v3554_v46 = vadd.f32 %v5565_v22, %v3386_v35 }
 0x28b   :  { %v3658_v8 = vadd.f32 %v5600_v5, %v3554_v46 }
 0x28d   :  { %6662 = vtanh.f32 %v3658_v8 }
 0x297   :  { %v6663_v31 = vpop.eup %6662 }
 0x298   :  { %v4224_v37 = vmul.f32 %v6663_v31, %v6663_v31  ;;  %v3671_v21 = vsel %vm3669_vm2, %v6663_v31, 0 }
 0x299   :  { %v9888_v47 = vand.u32 4294901760, %v3671_v21 }
 0x29a   :  { %v4226_v61 = vsel %vm4225_vm3, %v4224_v37, 0.0  ;;  %v4229_v56 = vsub.f32 1.0, %v4224_v37 }
 0x29b   :  { %4227 = vadd.xlane.f32.xlu0 %v4226_v61  ;;  %v3743_v49 = vsub.f32 %v3671_v21, %v9888_v47 }
 0x29c   :  { %v4230_v11 = vmul.f32 %v4229_v56, %v4229_v56 }
 0x29d   :  { %v3744_v26 = vand.u32 4294901760, %v3743_v49 }
 0x29e   :  { %v4236_v39 = vsel %vm3669_vm2, %v4230_v11, 0 }
 0x29f   :  { %v9891_v59 = vand.u32 4294901760, %v4236_v39  ;;  %v3745_v50 = vsub.f32 %v3743_v49, %v3744_v26 }
 0x2a1   :  { %v4308_v43 = vsub.f32 %v4236_v39, %v9891_v59  ;;  %v3746_v52 = vand.u32 4294901760, %v3745_v50 }
 0x2a3   :  { %5670 = vmatmul.mubr.f32.vlgmr.msra.gmra.mrb[24].mxu0 %v3746_v52  ;;  %v4309_v3 = vand.u32 4294901760, %v4308_v43 }
 0x2a4   :  { %6569 = vmatpush3.bf16.msra.mxu0 %v9848_v25  ;;  %5680 = vmatprep.mubr.msk.f32.mxu0 %vm6716_vm1, %v6717_v24 }
 0x2a5   :  { %6570 = vmatprep.subr.bf16.mxu0 %v6715_v10  ;;  %v4310_v40 = vsub.f32 %v4308_v43, %v4309_v3 }
 0x2a7   :  { %v4311_v54 = vand.u32 4294901760, %v4310_v40 }
 0x2a8   :  { %6572 = vmatpush3.bf16.msra.mxu0 %v9865_v53 }
 0x2a9   :  { %5736 = vmatmul.mubr.f32.vlgmr.msra.gmra.mrb[24].mxu1 %v4311_v54  ;;  %6573 = vmatprep.subr.bf16.mxu0 %v6715_v10 }
 0x2aa   :  { %6605 = vmatpush3.bf16.msra.mxu1 %v6604_v20  ;;  %5746 = vmatprep.mubr.msk.f32.mxu1 %vm6716_vm1, %v6717_v24 }
 0x2ab   :  { %5681 = vmatmul.mubr.f32.vlgmr.msra.gmra.mrb[24].mxu0 %v9888_v47  ;;  %6606 = vmatprep.subr.bf16.mxu1 %v6715_v10 }
 0x2ac   :  { %6575 = vmatpush3.bf16.msra.mxu0 %v6574_v14  ;;  %5691 = vmatprep.mubr.msk.f32.mxu0 %vm6716_vm1, %v6717_v24 }
 0x2ad   :  { %6576 = vmatprep.subr.bf16.mxu0 %v6715_v10 }
 0x2ae   :  { %6608 = vmatpush3.bf16.msra.mxu1 %v9874_v23 }
 0x2af   :  { %6609 = vmatprep.subr.bf16.mxu1 %v6715_v10 }
 0x2b0   :  { %6578 = vmatpush3.bf16.msra.mxu0 %v6577_v48 }
 0x2b1   :  { %5747 = vmatmul.mubr.f32.vlgmr.msra.gmra.mrb[24].mxu1 %v9891_v59  ;;  %6579 = vmatprep.subr.bf16.mxu0 %v6715_v10 }
 0x2b2   :  { %6611 = vmatpush3.bf16.msra.mxu1 %v6610_v32  ;;  %5757 = vmatprep.mubr.msk.f32.mxu1 %vm6716_vm1, %v6717_v24 }
 0x2b3   :  { %5692 = vmatmul.mubr.f32.vlgmr.msra.gmra.mrb[24].mxu0 %v3743_v49  ;;  %6612 = vmatprep.subr.bf16.mxu1 %v6715_v10 }
 0x2b4   :  { %6581 = vmatpush3.bf16.msra.mxu0 %v9803_v45  ;;  %5702 = vmatprep.mubr.msk.f32.mxu0 %vm6716_vm1, %v6717_v24 }
 0x2b5   :  { %6582 = vmatprep.subr.bf16.mxu0 %v6715_v10 }
 0x2b6   :  { %6614 = vmatpush3.bf16.msra.mxu1 %v6613_v16 }
 0x2b7   :  { %6615 = vmatprep.subr.bf16.mxu1 %v6715_v10 }
 0x2b8   :  { %6584 = vmatpush3.bf16.msra.mxu0 %v9823_v42 }
 0x2b9   :  { %5758 = vmatmul.mubr.f32.vlgmr.msra.gmra.mrb[24].mxu1 %v4308_v43  ;;  %6585 = vmatprep.subr.bf16.mxu0 %v6715_v10 }
 0x2ba   :  { %6617 = vmatpush3.bf16.msra.mxu1 %v9832_v30  ;;  %5768 = vmatprep.mubr.msk.f32.mxu1 %vm6716_vm1, %v6717_v24 }
 0x2bb   :  { %5703 = vmatmul.mubr.f32.vlgmr.msra.gmra.mrb[24].mxu0 %v3744_v26  ;;  %6618 = vmatprep.subr.bf16.mxu1 %v6715_v10 }
 0x2bc   :  { %6587 = vmatpush3.bf16.msra.mxu0 %v9880_v2  ;;  %5713 = vmatprep.mubr.msk.f32.mxu0 %vm6716_vm1, %v6717_v24 }
 0x2bd   :  { %6588 = vmatprep.subr.bf16.mxu0 %v6715_v10 }
 0x2be   :  { %6620 = vmatpush3.bf16.msra.mxu1 %v9852_v27 }
 0x2bf   :  { %6621 = vmatprep.subr.bf16.mxu1 %v6715_v10 }
 0x2c0   :  { %6590 = vmatpush3.bf16.msra.mxu0 %v9882_v13 }
 0x2c1   :  { %5769 = vmatmul.mubr.f32.vlgmr.msra.gmra.mrb[24].mxu1 %v4309_v3  ;;  %6591 = vmatprep.subr.bf16.mxu0 %v6715_v10 }
 0x2c2   :  { %6623 = vmatpush3.bf16.msra.mxu1 %v9884_v33  ;;  %5779 = vmatprep.mubr.msk.f32.mxu1 %vm6716_vm1, %v6717_v24 }
 0x2c3   :  { %5714 = vmatmul.mubr.f32.vlgmr.msra.gmra.mrb[24].mxu0 %v9888_v47  ;;  %6624 = vmatprep.subr.bf16.mxu1 %v6715_v10 }
 0x2c4   :  { %6593 = vmatpush3.bf16.msra.mxu0 %v9803_v45  ;;  %5724 = vmatprep.mubr.msk.f32.mxu0 %vm6716_vm1, %v6717_v24  ;;  %v4223_v45 = vpop.xlane.xlu0 %4222 }
 0x2c5   :  { %6594 = vmatprep.subr.bf16.mxu0 %v6715_v10 }
 0x2c6   :  { %6626 = vmatpush3.bf16.msra.mxu1 %v9886_v51 }
 0x2c7   :  { %6627 = vmatprep.subr.bf16.mxu1 %v6715_v10 }
 0x2c8   :  { %6596 = vmatpush3.bf16.msra.mxu0 %v9823_v42 }
 0x2c9   :  { %5780 = vmatmul.mubr.f32.vlgmr.msra.gmra.mrb[24].mxu1 %v9891_v59 }
 0x2ca   :  { %6629 = vmatpush3.bf16.msra.mxu1 %v9832_v30  ;;  %5790 = vmatprep.mubr.msk.f32.mxu1 %vm6716_vm1, %v6717_v24 }
 0x2cb   :  { %5725 = vmatmul.mubr.f32.vlgmr.msra.gmra.mrb[24].mxu0 %v9888_v47  ;;  %6630 = vmatprep.subr.bf16.mxu1 %v6715_v10 }
 0x2ce   :  { %6632 = vmatpush3.bf16.msra.mxu1 %v9852_v27 }
 0x2d1   :  { %5791 = vmatmul.mubr.f32.vlgmr.msra.gmra.mrb[24].mxu1 %v9891_v59 }
 0x328   :  { %v4228_v24 = vpop.xlane.xlu0 %4227 }
 0x39e   :  { %v4154_v4 = vpop.f32.mrb[24].mxu0 }
 0x39f   :  { %v6633_v42 = vadd.f32 %v4760_v41, %v4154_v4  ;;  %v5726_v62 = vpop.f32.mrb[25].mxu0 }
 0x3a1   :  { %4159 = vst.msk [vmem:[#allocation3] sm:$0x3] %vm4158_vm4, %v6633_v42 }
 0x3a2   :  { %6677 = shalt.err (!%p6674_p4)
}
 0x3a3   :  { %s6678_s5 = scalar_lea.hbm %s10003_s6, 32 }
 0x3a4   :  { %p6679_p5 = scmp.ne.s32.totalorder %s10003_s6, %s6678_s5  ;;  %p6682_p6 = scmp.lt.u32.totalorder %s6678_s5, %s10003_s6 }
 0x3a6   :  { %p6684_p7 = pnand %p6682_p6, %p6679_p5 }
 0x3a8   :  { %6687 = shalt.err (!%p6684_p7)
}
 0x3a9   :  { %4740 = dma.vmem_to_hbm [thread:$0]  %s4738_s21, 32, %s10003_s6, [#allocation4]   ;;  %v4724_v10 = vadd.f32 1.0, %v4223_v45  ;;  %v4719_v36 = vpop.f32.mrb[24].mxu1  ;;  %v4726_v30 = vadd.f32 1.0, %v4228_v24  ;;  %v4728_v25 = vstv %s9997_s0 }
 0x3aa   :  { %v5792_v19 = vpop.f32.mrb[25].mxu1  ;;  %s6719_s3 = smov [#allocation5]  }
 0x3ab   :  { %v4725_v60 = vmul.f32 %v4724_v10, %v4719_v36  ;;  %s4747_s9 = sshll.u32 %s6719_s3, 4  ;;  %s4748_s9 = int_to_ptr.vmem [resolvable:$true] %s4747_s9 }
 0x3ac   :  { %s6688_s10 = scalar_lea.vmem %s4748_s9, 32  ;;  %p6693_p9 = scmp.lt.s32.totalorder %s4748_s9, %s4748_s9 }
 0x3ad   :  { %v4727_v27 = vadd.f32 %v4726_v30, %v4725_v60  ;;  %p6689_p8 = scmp.ne.s32.totalorder %s4748_s9, %s6688_s10  ;;  %p6694_p10 = scmp.lt.s32.totalorder %s6688_s10, %s6688_s10 }
 0x3af   :  { %v4729_v57 = vmul.f32 %v4728_v25, %v4727_v27  ;;  %p6695_p11 = por %p6694_p10, %p6693_p9 }
 0x3b1   :  { %4730 = vst.msk [vmem:[#allocation5] sm:$0x3] %vm4158_vm4, %v4729_v57  ;;  %p6696_p12 = pnand %p6695_p11, %p6689_p8 }
 0x3b3   :  { %6699 = shalt.err (!%p6696_p12)
}
 0x3b4   :  { %s6700_s1 = scalar_lea.hbm %s10004_s7, 32 }
 0x3b5   :  { %p6701_p13 = scmp.ne.s32.totalorder %s10004_s7, %s6700_s1  ;;  %p6704_p0 = scmp.lt.u32.totalorder %s6700_s1, %s10004_s7 }
 0x3b7   :  { %p6706_p1 = pnand %p6704_p0, %p6701_p13 }
 0x3b9   :  { %6709 = shalt.err (!%p6706_p1)
}
 0x3ba   :  { %4750 = dma.vmem_to_hbm [thread:$0]  %s4748_s9, 32, %s10004_s7, [#allocation6]  }
 0x3bb   :  { %6710 = dma.done.wait [#allocation4], 32  }
 0x3bc   :  { %6711 = vsyncadd [#allocation4], 4294967264 }
 0x3bd   :  { %6712 = dma.done.wait [#allocation6], 32  }
 0x3be   :  { %6713 = vsyncadd [#allocation6], 4294967264 }
 0x3bf   :  { %4757 = vsyncpa [#allocation4], 1 }
 0x3c0   :  { %4758 = vsyncpa [#allocation6], 1 }

</bundles_post_ra>
